<compile_context>
chip_gen: v7x
topology: tpu7x:2x2x1
jax: 0.10.0
libtpu: 0.0.40
codegen_flags: <defaults>
</compile_context>

<pallas_src>
import functools
import math

import jax
import jax.numpy as jnp
from jax import lax
from jax.experimental import pallas as pl
from jax.experimental.pallas import tpu as pltpu


# ----------------------------- helpers (used inside the kernel) -----------------------------

def _layer_norm(x, w, b, eps=1e-5):
    mu = jnp.mean(x, axis=-1, keepdims=True)
    var = jnp.mean((x - mu) ** 2, axis=-1, keepdims=True)
    return (x - mu) * lax.rsqrt(var + eps) * w + b


# Packed small-parameter slab row layout (per layer, shape (16, D)):
#   0:sa_bq 1:sa_bk 2:sa_bv 3:sa_bo 4:ca_bq 5:ca_bk 6:ca_bv 7:ca_bo 8:ff2_b
#   9:n1_w 10:n1_b 11:n2_w 12:n2_b 13:n3_w 14:n3_b 15:(pad)


# ----------------------------- fused decoder + loss kernel -----------------------------

def _fused_kernel(
        h0_ref, mem_ref, bdm_s_ref, bdm_c_ref, cmask_ref, blk_s_ref, blk_c_ref,
        sa_wqkv_ref, sa_wo_ref, ca_wq_ref, ca_wkv_ref, ca_wo_ref,
        ff1_w_ref, ff2_w_ref, small_ref, ff1_b_ref,
        tgt_ref, dtar_ref, pp_ref, hw_ref, hb_ref,
        out_ref, h_scr,
        *, batch, seq, mem_len, head_num, landuse_dim):
    layer = pl.program_id(0)
    last = pl.num_programs(0) - 1

    B, S, M, H = batch, seq, mem_len, head_num
    BS = B * S
    D = h_scr.shape[-1]
    hd = D // H
    scale = 1.0 / math.sqrt(hd)

    # activation carrier, resident in VMEM across the layer axis
    @pl.when(layer == 0)
    def _():
        h_scr[...] = h0_ref[...]

    x = h_scr[...]                       # (BS, D) f32
    mem_flat = mem_ref[...]              # (B*M, D) f32
    small = small_ref[0]                 # (16, D) f32 packed per-layer params

    sa_bq, sa_bk, sa_bv, sa_bo = small[0:1], small[1:2], small[2:3], small[3:4]
    ca_bq, ca_bk, ca_bv, ca_bo = small[4:5], small[5:6], small[6:7], small[7:8]
    ff2_b = small[8:9]
    n1_w, n1_b = small[9:10], small[10:11]
    n2_w, n2_b = small[11:12], small[12:13]
    n3_w, n3_b = small[13:14], small[14:15]

    def attend(q, k, v, klen, bd_mask, blk_ones, add_mask):
        """Multi-head attention via a block-diagonal masked K/V (no per-head slicing).

        q: (BS, D); k, v: (B*klen, D); bd_mask: (H*klen, D) 0/1;
        blk_ones: (H*klen, H*klen) 0/1 block matrix; add_mask: (S, H*klen) or None.
        """
        C = H * klen
        q3 = q.reshape(B, S, D).astype(jnp.bfloat16)
        k3 = k.reshape(B, klen, D)
        v3 = v.reshape(B, klen, D)
        krep = jnp.concatenate([k3] * H, axis=1)          # (B, C, D)
        vrep = jnp.concatenate([v3] * H, axis=1)          # (B, C, D)
        kbd = (krep * bd_mask[None]).astype(jnp.bfloat16)
        vbd = (vrep * bd_mask[None]).astype(jnp.bfloat16)
        # per-head scores: kbd zeros out all d outside head c // klen
        s = jnp.einsum("bqd,bcd->bqc", q3, kbd,
                       preferred_element_type=jnp.float32) * scale   # (B, S, C) f32
        if add_mask is not None:
            s = s + add_mask[None]
        # global row max is constant within each head block -> exact per-head softmax
        s = s - jnp.max(s, axis=-1, keepdims=True)
        p = jnp.exp(s).reshape(BS, C)
        # per-head denominators broadcast back to every column of that head
        denom = jnp.dot(p, blk_ones, preferred_element_type=jnp.float32)
        denom = jnp.maximum(denom, 1e-30)                 # guard pathological underflow
        p = p * pl.reciprocal(denom, approx=True)
        p3 = p.reshape(B, S, C).astype(jnp.bfloat16)
        # vbd routes each key block only into its own head's output columns
        o = jnp.einsum("bqc,bcd->bqd", p3, vbd,
                       preferred_element_type=jnp.float32)            # (B, S, D)
        return o.reshape(BS, D)

    # ---- self attention (fused QKV projection) ----
    xb = x.astype(jnp.bfloat16)
    qkv = jnp.dot(xb, sa_wqkv_ref[0], preferred_element_type=jnp.float32)   # (BS, 3D)
    q = qkv[:, :D] + sa_bq
    k = qkv[:, D:2 * D] + sa_bk
    v = qkv[:, 2 * D:] + sa_bv
    sa = attend(q, k, v, S, bdm_s_ref[...], blk_s_ref[...], cmask_ref[...])
    sa = jnp.dot(sa.astype(jnp.bfloat16), sa_wo_ref[0],
                 preferred_element_type=jnp.float32) + sa_bo
    x1 = _layer_norm(x + sa, n1_w, n1_b)

    # ---- cross attention over comp_h (fused KV projection) ----
    q = jnp.dot(x1.astype(jnp.bfloat16), ca_wq_ref[0],
                preferred_element_type=jnp.float32) + ca_bq
    kv = jnp.dot(mem_flat.astype(jnp.bfloat16), ca_wkv_ref[0],
                 preferred_element_type=jnp.float32)                  # (B*M, 2D)
    k = kv[:, :D] + ca_bk
    v = kv[:, D:] + ca_bv
    ca = attend(q, k, v, M, bdm_c_ref[...], blk_c_ref[...], None)
    ca = jnp.dot(ca.astype(jnp.bfloat16), ca_wo_ref[0],
                 preferred_element_type=jnp.float32) + ca_bo
    x2 = _layer_norm(x1 + ca, n2_w, n2_b)

    # ---- ReLU FFN ----
    hidden = jnp.maximum(
        jnp.dot(x2.astype(jnp.bfloat16), ff1_w_ref[0],
                preferred_element_type=jnp.float32) + ff1_b_ref[0], 0.0)
    ff = jnp.dot(hidden.astype(jnp.bfloat16), ff2_w_ref[0],
                 preferred_element_type=jnp.float32) + ff2_b
    h_new = _layer_norm(x2 + ff, n3_w, n3_b)
    h_scr[...] = h_new

    # ---- fused output heads + losses on the final layer iteration ----
    @pl.when(layer == last)
    def _():
        Lc = landuse_dim
        # one fused matmul for all five heads: columns = [logits | plan | dist, dir, deg]
        z = jnp.dot(h_new.astype(jnp.bfloat16), hw_ref[...],
                    preferred_element_type=jnp.float32) + hb_ref[...]   # (BS, 2Lc+3)
        logits = z[:, :Lc]
        plan_logits = z[:, Lc:2 * Lc]
        reg = z[:, 2 * Lc:2 * Lc + 3]

        # --- cross entropy ---
        tgt = tgt_ref[...]                                 # (BS, 1) int32
        col = lax.broadcasted_iota(jnp.int32, (BS, Lc), 1)
        onehot = col == tgt
        mx = jnp.max(logits, axis=-1, keepdims=True)
        lse = mx + jnp.log(jnp.sum(jnp.exp(logits - mx), axis=-1, keepdims=True))
        picked = jnp.sum(jnp.where(onehot, logits, 0.0), axis=-1, keepdims=True)
        loss_ce = jnp.mean(lse - picked)

        # --- sigmoid regression heads + L1 losses (exact division) ---
        pred = 1.0 / (1.0 + jnp.exp(-reg))                 # (BS, 3)
        adiff = jnp.abs(pred - dtar_ref[...])
        loss1 = jnp.mean(adiff[:, 0:1])
        loss2 = jnp.mean(adiff[:, 1:2])
        loss3 = jnp.mean(adiff[:, 2:3])

        # --- plan head + KL divergence (reduction='mean' over all elements) ---
        pred_plan = 1.0 / (1.0 + jnp.exp(-plan_logits))
        proba = pred_plan / jnp.sum(pred_plan, axis=-1, keepdims=True)
        pp = pp_ref[...]
        safe_pp = jnp.maximum(pp, 1e-30)                   # no 0*log(0)=NaN in dead branch
        kl = jnp.where(pp > 0.0,
                       pp * (jnp.log(safe_pp) - jnp.log(proba + 1e-14)), 0.0)
        loss_pp = jnp.sum(kl) / float(BS * Lc)

        out_ref[0] = loss_ce
        out_ref[1] = loss1
        out_ref[2] = loss2
        out_ref[3] = loss3
        out_ref[4] = loss_pp


# ----------------------------- wrapper: glue + single pallas_call -----------------------------

def _bd_mask(head_num, klen, model_dim):
    hd = model_dim // head_num
    r = jnp.arange(head_num * klen) // klen
    c = jnp.arange(model_dim) // hd
    return (r[:, None] == c[None, :]).astype(jnp.float32)       # (H*klen, D)


def _block_ones(head_num, klen):
    g = jnp.arange(head_num * klen) // klen
    return (g[:, None] == g[None, :]).astype(jnp.float32)       # (H*klen, H*klen)


def _causal_tiled(head_num, seq):
    q = jnp.arange(seq)[:, None]
    k = jnp.arange(seq)[None, :]
    base = jnp.where(k > q, -1e30, 0.0).astype(jnp.float32)     # (S, S)
    return jnp.tile(base, (1, head_num))                        # (S, H*S)


def plan_spatial_causal_decoder_forward(params, x, d1, d2, d3, pp, comp_h,
                                        *, head_num, bos_value=0,
                                        vmem_limit_bytes=32 * 1024 * 1024):
    """x, d1, d2, d3: (bsz, qlen); pp: (bsz, qlen, landuse_dim); comp_h: (clen, bsz, dim)."""
    B, S = x.shape
    Mx = comp_h.shape[0]
    D = params["emb"].shape[1]
    Lc = params["emb"].shape[0]
    H = head_num
    ly = params["layers"]
    L = ly["sa_wqkv"].shape[0]
    F = ly["ff1_w"].shape[-1]
    BS = B * S

    # decode(): BOS shift, embedding lookup, positional embedding  (glue, not in-kernel)
    bos = jnp.full((B, 1), bos_value, dtype=x.dtype)
    x_shift = jnp.concatenate([bos, x[:, :-1]], axis=1)
    e = jnp.take(params["emb"], x_shift, axis=0) + params["pos_emb"][None, :S, :]
    h0 = e.reshape(BS, D).astype(jnp.float32)
    mem = jnp.transpose(comp_h, (1, 0, 2)).reshape(B * Mx, D).astype(jnp.float32)

    # constant masks (loaded once by the kernel via constant index_maps)
    bdm_s = _bd_mask(H, S, D)
    bdm_c = _bd_mask(H, Mx, D)
    cmask = _causal_tiled(H, S)
    blk_s = _block_ones(H, S)
    blk_c = _block_ones(H, Mx)

    # loss-side targets
    tgt = x.reshape(BS, 1).astype(jnp.int32)
    dtar = jnp.stack([d1.reshape(BS), d2.reshape(BS), d3.reshape(BS)],
                     axis=-1).astype(jnp.float32)                # (BS, 3)
    pp2 = pp.reshape(BS, Lc).astype(jnp.float32)

    c2 = lambda l: (0, 0)
    w3 = lambda l: (l, 0, 0)
    in_specs = [
        pl.BlockSpec((BS, D), c2),               # h0 (resident)
        pl.BlockSpec((B * Mx, D), c2),           # memory (resident)
        pl.BlockSpec((H * S, D), c2),            # block-diag head mask (self)
        pl.BlockSpec((H * Mx, D), c2),           # block-diag head mask (cross)
        pl.BlockSpec((S, H * S), c2),            # causal mask tiled over heads
        pl.BlockSpec((H * S, H * S), c2),        # block-ones (self softmax denom)
        pl.BlockSpec((H * Mx, H * Mx), c2),      # block-ones (cross softmax denom)
        pl.BlockSpec((1, D, 3 * D), w3),         # sa_wqkv
        pl.BlockSpec((1, D, D), w3),             # sa_wo
        pl.BlockSpec((1, D, D), w3),             # ca_wq
        pl.BlockSpec((1, D, 2 * D), w3),         # ca_wkv
        pl.BlockSpec((1, D, D), w3),             # ca_wo
        pl.BlockSpec((1, D, F), w3),             # ff1_w
        pl.BlockSpec((1, F, D), w3),             # ff2_w
        pl.BlockSpec((1, 16, D), w3),            # packed small per-layer params
        pl.BlockSpec((1, 1, F), w3),             # ff1_b
        pl.BlockSpec((BS, 1), c2),               # CE targets
        pl.BlockSpec((BS, 3), c2),               # spatial targets
        pl.BlockSpec((BS, Lc), c2),              # plan target distribution
        pl.BlockSpec((D, 2 * Lc + 3), c2),       # fused heads weight
        pl.BlockSpec((1, 2 * Lc + 3), c2),       # fused heads bias
    ]

    losses = pl.pallas_call(
        functools.partial(_fused_kernel, batch=B, seq=S, mem_len=Mx,
                          head_num=H, landuse_dim=Lc),
        grid=(L,),
        in_specs=in_specs,
        out_specs=pl.BlockSpec(memory_space=pltpu.MemorySpace.SMEM),
        out_shape=jax.ShapeDtypeStruct((5,), jnp.float32),
        scratch_shapes=[pltpu.VMEM((BS, D), jnp.float32)],
        compiler_params=pltpu.CompilerParams(
            dimension_semantics=("arbitrary",),
            vmem_limit_bytes=vmem_limit_bytes),
    )(h0, mem, bdm_s, bdm_c, cmask, blk_s, blk_c,
      ly["sa_wqkv"], ly["sa_wo"], ly["ca_wq"], ly["ca_wkv"], ly["ca_wo"],
      ly["ff1_w"], ly["ff2_w"], ly["small"], ly["ff1_b"],
      tgt, dtar, pp2, params["heads_w"], params["heads_b"])

    return losses[0], losses[1], losses[2], losses[3], losses[4]


# ----------------------------- deterministic parameter init -----------------------------

def init_params(key, *, landuse_dim, seq_length, model_dim, head_num, layer_num,
                ffn_dim=2048):
    D, F, L = model_dim, ffn_dim, layer_num
    del head_num  # layout is head-agnostic (fused projections)

    def nrm(k, shape, scale=0.05, dtype=jnp.float32):
        return (scale * jax.random.normal(k, shape)).astype(dtype)

    keys = jax.random.split(key, 14)
    heads_out = 2 * landuse_dim + 3     # [logits(Lc) | plan(Lc) | dist, dir, deg]
    params = {
        "emb": nrm(keys[0], (landuse_dim, D), 0.1),
        "pos_emb": nrm(keys[1], (seq_length, D), 0.1),
        "heads_w": nrm(keys[2], (D, heads_out), 0.05, jnp.bfloat16),   # (K, N) bf16
        "heads_b": nrm(keys[3], (1, heads_out), 0.01),
    }

    layers = {
        "sa_wqkv": nrm(keys[4], (L, D, 3 * D), 0.05, jnp.bfloat16),
        "sa_wo":   nrm(keys[5], (L, D, D), 0.05, jnp.bfloat16),
        "ca_wq":   nrm(keys[6], (L, D, D), 0.05, jnp.bfloat16),
        "ca_wkv":  nrm(keys[7], (L, D, 2 * D), 0.05, jnp.bfloat16),
        "ca_wo":   nrm(keys[8], (L, D, D), 0.05, jnp.bfloat16),
        "ff1_w":   nrm(keys[9], (L, D, F), 0.05, jnp.bfloat16),
        "ff2_w":   nrm(keys[10], (L, F, D), 0.05, jnp.bfloat16),
        "ff1_b":   nrm(keys[11], (L, 1, F), 0.01),
    }
    # packed small per-layer params, see row layout above
    small = jnp.zeros((L, 16, D), jnp.float32)
    small = small.at[:, 0:9, :].set(nrm(keys[12], (L, 9, D), 0.01))  # biases
    small = small.at[:, 9:15:2, :].set(1.0)                          # LN weights (rows 9,11,13)
    layers["small"] = small
    params["layers"] = layers
    return params


# ----------------------------- demo -----------------------------

if __name__ == "__main__":
    landuse_dim = 12
    seq_length = 8
    model_dim = 64
    head_num = 8
    layer_num = 2        # keep compile small; module default is 6
    ffn_dim = 2048       # PyTorch TransformerDecoderLayer default dim_feedforward
    bsz = 2
    clen = 8

    key = jax.random.PRNGKey(0)
    kp, kx, k1, k2, k3, kpp, kc = jax.random.split(key, 7)

    params = init_params(kp, landuse_dim=landuse_dim, seq_length=seq_length,
                         model_dim=model_dim, head_num=head_num,
                         layer_num=layer_num, ffn_dim=ffn_dim)

    x = jax.random.randint(kx, (bsz, seq_length), 0, landuse_dim, dtype=jnp.int32)
    d1 = jax.random.uniform(k1, (bsz, seq_length), jnp.float32)
    d2 = jax.random.uniform(k2, (bsz, seq_length), jnp.float32)
    d3 = jax.random.uniform(k3, (bsz, seq_length), jnp.float32)
    pp = jax.nn.softmax(jax.random.normal(kpp, (bsz, seq_length, landuse_dim)), axis=-1)
    comp_h = jax.random.normal(kc, (clen, bsz, model_dim), jnp.float32)

    fwd = jax.jit(functools.partial(plan_spatial_causal_decoder_forward,
                                    head_num=head_num, bos_value=0))
    out = fwd(params, x, d1, d2, d3, pp, comp_h)
    out = jax.block_until_ready(out)

    assert len(out) == 5
    assert all(bool(jnp.isfinite(o)) for o in out)
    print("KERNEL_OK")
</pallas_src>

<mosaic_0001>
module attributes {stable_mosaic.version = 11 : i64} {
  func.func @_fused_kernel(%arg0: i32, %arg1: memref<16x64xf32, #tpu.memory_space<vmem>>, %arg2: memref<16x64xf32, #tpu.memory_space<vmem>>, %arg3: memref<64x64xf32, #tpu.memory_space<vmem>>, %arg4: memref<64x64xf32, #tpu.memory_space<vmem>>, %arg5: memref<8x64xf32, #tpu.memory_space<vmem>>, %arg6: memref<64x64xf32, #tpu.memory_space<vmem>>, %arg7: memref<64x64xf32, #tpu.memory_space<vmem>>, %arg8: memref<1x64x192xbf16, #tpu.memory_space<vmem>>, %arg9: memref<1x64x64xbf16, #tpu.memory_space<vmem>>, %arg10: memref<1x64x64xbf16, #tpu.memory_space<vmem>>, %arg11: memref<1x64x128xbf16, #tpu.memory_space<vmem>>, %arg12: memref<1x64x64xbf16, #tpu.memory_space<vmem>>, %arg13: memref<1x64x2048xbf16, #tpu.memory_space<vmem>>, %arg14: memref<1x2048x64xbf16, #tpu.memory_space<vmem>>, %arg15: memref<1x16x64xf32, #tpu.memory_space<vmem>>, %arg16: memref<1x1x2048xf32, #tpu.memory_space<vmem>>, %arg17: memref<16x1xi32, #tpu.memory_space<vmem>>, %arg18: memref<16x3xf32, #tpu.memory_space<vmem>>, %arg19: memref<16x12xf32, #tpu.memory_space<vmem>>, %arg20: memref<64x27xbf16, #tpu.memory_space<vmem>>, %arg21: memref<1x27xf32, #tpu.memory_space<vmem>>, %arg22: memref<5xf32, #tpu.memory_space<smem>>, %arg23: memref<16x64xf32, #tpu.memory_space<vmem>>) attributes {dimension_semantics = [#tpu.dimension_semantics<arbitrary>], iteration_bounds = array<i64: 2>, scalar_prefetch = 0 : i64, scratch_operands = 1 : i64, tpu.core_type = #tpu.core_type<tc>, window_params = [{pipeline_mode = #tpu.pipeline_mode<synchronous>, transform_indices = @transform_0, window_bounds = array<i64: 16, 64>}, {pipeline_mode = #tpu.pipeline_mode<synchronous>, transform_indices = @transform_1, window_bounds = array<i64: 16, 64>}, {pipeline_mode = #tpu.pipeline_mode<synchronous>, transform_indices = @transform_2, window_bounds = array<i64: 64, 64>}, {pipeline_mode = #tpu.pipeline_mode<synchronous>, transform_indices = @transform_3, window_bounds = array<i64: 64, 64>}, {pipeline_mode = #tpu.pipeline_mode<synchronous>, transform_indices = @transform_4, window_bounds = array<i64: 8, 64>}, {pipeline_mode = #tpu.pipeline_mode<synchronous>, transform_indices = @transform_5, window_bounds = array<i64: 64, 64>}, {pipeline_mode = #tpu.pipeline_mode<synchronous>, transform_indices = @transform_6, window_bounds = array<i64: 64, 64>}, {transform_indices = @transform_7, window_bounds = array<i64: 1, 64, 192>}, {transform_indices = @transform_8, window_bounds = array<i64: 1, 64, 64>}, {transform_indices = @transform_9, window_bounds = array<i64: 1, 64, 64>}, {transform_indices = @transform_10, window_bounds = array<i64: 1, 64, 128>}, {transform_indices = @transform_11, window_bounds = array<i64: 1, 64, 64>}, {transform_indices = @transform_12, window_bounds = array<i64: 1, 64, 2048>}, {transform_indices = @transform_13, window_bounds = array<i64: 1, 2048, 64>}, {transform_indices = @transform_14, window_bounds = array<i64: 1, 16, 64>}, {transform_indices = @transform_15, window_bounds = array<i64: 1, 1, 2048>}, {pipeline_mode = #tpu.pipeline_mode<synchronous>, transform_indices = @transform_16, window_bounds = array<i64: 16, 1>}, {pipeline_mode = #tpu.pipeline_mode<synchronous>, transform_indices = @transform_17, window_bounds = array<i64: 16, 3>}, {pipeline_mode = #tpu.pipeline_mode<synchronous>, transform_indices = @transform_18, window_bounds = array<i64: 16, 12>}, {pipeline_mode = #tpu.pipeline_mode<synchronous>, transform_indices = @transform_19, window_bounds = array<i64: 64, 27>}, {pipeline_mode = #tpu.pipeline_mode<synchronous>, transform_indices = @transform_20, window_bounds = array<i64: 1, 27>}, {transform_indices = @transform_21, window_bounds = array<i64: 5>}]} {
    %c0_i32 = arith.constant 0 : i32
    %0 = arith.cmpi eq, %arg0, %c0_i32 : i32
    %1 = arith.extui %0 : i1 to i32
    %c0_i32_0 = arith.constant 0 : i32
    %2 = arith.cmpi ne, %1, %c0_i32_0 : i32
    scf.if %2 {
      %c0_78 = arith.constant 0 : index
      %c0_79 = arith.constant 0 : index
      %224 = vector.load %arg1[%c0_78, %c0_79] : memref<16x64xf32, #tpu.memory_space<vmem>>, vector<16x64xf32>
      %c0_80 = arith.constant 0 : index
      %c0_81 = arith.constant 0 : index
      %225 = vector.load %arg23[%c0_80, %c0_81] : memref<16x64xf32, #tpu.memory_space<vmem>>, vector<16x64xf32>
      tpu.vector_store %arg23[%c0_80, %c0_81], %224 {strides = array<i32>} : memref<16x64xf32, #tpu.memory_space<vmem>>, vector<16x64xf32>,
    } else {
    }
    %c0 = arith.constant 0 : index
    %c0_1 = arith.constant 0 : index
    %3 = vector.load %arg23[%c0, %c0_1] : memref<16x64xf32, #tpu.memory_space<vmem>>, vector<16x64xf32>
    %c0_2 = arith.constant 0 : index
    %c0_3 = arith.constant 0 : index
    %4 = vector.load %arg2[%c0_2, %c0_3] : memref<16x64xf32, #tpu.memory_space<vmem>>, vector<16x64xf32>
    %c0_4 = arith.constant 0 : index
    %c0_5 = arith.constant 0 : index
    %c0_6 = arith.constant 0 : index
    %5 = vector.load %arg15[%c0_4, %c0_5, %c0_6] : memref<1x16x64xf32, #tpu.memory_space<vmem>>, vector<1x16x64xf32>
    %6 = vector.shape_cast %5 : vector<1x16x64xf32> to vector<16x64xf32>
    %7 = vector.extract_strided_slice %6 {offsets = [0, 0], sizes = [1, 64], strides = [1, 1]} : vector<16x64xf32> to vector<1x64xf32>
    %8 = vector.extract_strided_slice %6 {offsets = [1, 0], sizes = [1, 64], strides = [1, 1]} : vector<16x64xf32> to vector<1x64xf32>
    %9 = vector.extract_strided_slice %6 {offsets = [2, 0], sizes = [1, 64], strides = [1, 1]} : vector<16x64xf32> to vector<1x64xf32>
    %10 = vector.extract_strided_slice %6 {offsets = [3, 0], sizes = [1, 64], strides = [1, 1]} : vector<16x64xf32> to vector<1x64xf32>
    %11 = vector.extract_strided_slice %6 {offsets = [4, 0], sizes = [1, 64], strides = [1, 1]} : vector<16x64xf32> to vector<1x64xf32>
    %12 = vector.extract_strided_slice %6 {offsets = [5, 0], sizes = [1, 64], strides = [1, 1]} : vector<16x64xf32> to vector<1x64xf32>
    %13 = vector.extract_strided_slice %6 {offsets = [6, 0], sizes = [1, 64], strides = [1, 1]} : vector<16x64xf32> to vector<1x64xf32>
    %14 = vector.extract_strided_slice %6 {offsets = [7, 0], sizes = [1, 64], strides = [1, 1]} : vector<16x64xf32> to vector<1x64xf32>
    %15 = vector.extract_strided_slice %6 {offsets = [8, 0], sizes = [1, 64], strides = [1, 1]} : vector<16x64xf32> to vector<1x64xf32>
    %16 = vector.extract_strided_slice %6 {offsets = [9, 0], sizes = [1, 64], strides = [1, 1]} : vector<16x64xf32> to vector<1x64xf32>
    %17 = vector.extract_strided_slice %6 {offsets = [10, 0], sizes = [1, 64], strides = [1, 1]} : vector<16x64xf32> to vector<1x64xf32>
    %18 = vector.extract_strided_slice %6 {offsets = [11, 0], sizes = [1, 64], strides = [1, 1]} : vector<16x64xf32> to vector<1x64xf32>
    %19 = vector.extract_strided_slice %6 {offsets = [12, 0], sizes = [1, 64], strides = [1, 1]} : vector<16x64xf32> to vector<1x64xf32>
    %20 = vector.extract_strided_slice %6 {offsets = [13, 0], sizes = [1, 64], strides = [1, 1]} : vector<16x64xf32> to vector<1x64xf32>
    %21 = vector.extract_strided_slice %6 {offsets = [14, 0], sizes = [1, 64], strides = [1, 1]} : vector<16x64xf32> to vector<1x64xf32>
    %22 = arith.truncf %3 : vector<16x64xf32> to vector<16x64xbf16>
    %c0_7 = arith.constant 0 : index
    %c0_8 = arith.constant 0 : index
    %c0_9 = arith.constant 0 : index
    %23 = vector.load %arg8[%c0_7, %c0_8, %c0_9] : memref<1x64x192xbf16, #tpu.memory_space<vmem>>, vector<1x64x192xbf16>
    %24 = vector.shape_cast %23 : vector<1x64x192xbf16> to vector<64x192xbf16>
    %cst = arith.constant dense<0.000000e+00> : vector<16x192xf32>
    %25 = tpu.matmul %22, %24, %cst {dimension_numbers = #tpu.dot_dimension_numbers<[1], [0], [0], [1], [0, 0, 1, 1], [], []>} : vector<16x64xbf16>, vector<64x192xbf16>, vector<16x192xf32> -> vector<16x192xf32>
    %26 = vector.extract_strided_slice %25 {offsets = [0, 0], sizes = [16, 64], strides = [1, 1]} : vector<16x192xf32> to vector<16x64xf32>
    %27 = vector.broadcast %7 : vector<1x64xf32> to vector<16x64xf32>
    %28 = arith.addf %26, %27 : vector<16x64xf32>
    %29 = vector.extract_strided_slice %25 {offsets = [0, 64], sizes = [16, 64], strides = [1, 1]} : vector<16x192xf32> to vector<16x64xf32>
    %30 = vector.broadcast %8 : vector<1x64xf32> to vector<16x64xf32>
    %31 = arith.addf %29, %30 : vector<16x64xf32>
    %32 = vector.extract_strided_slice %25 {offsets = [0, 128], sizes = [16, 64], strides = [1, 1]} : vector<16x192xf32> to vector<16x64xf32>
    %33 = vector.broadcast %9 : vector<1x64xf32> to vector<16x64xf32>
    %34 = arith.addf %32, %33 : vector<16x64xf32>
    %c0_10 = arith.constant 0 : index
    %c0_11 = arith.constant 0 : index
    %35 = vector.load %arg3[%c0_10, %c0_11] : memref<64x64xf32, #tpu.memory_space<vmem>>, vector<64x64xf32>
    %c0_12 = arith.constant 0 : index
    %c0_13 = arith.constant 0 : index
    %36 = vector.load %arg6[%c0_12, %c0_13] : memref<64x64xf32, #tpu.memory_space<vmem>>, vector<64x64xf32>
    %c0_14 = arith.constant 0 : index
    %c0_15 = arith.constant 0 : index
    %37 = vector.load %arg5[%c0_14, %c0_15] : memref<8x64xf32, #tpu.memory_space<vmem>>, vector<8x64xf32>
    %38 = vector.shape_cast %28 : vector<16x64xf32> to vector<2x8x64xf32>
    %39 = arith.truncf %38 : vector<2x8x64xf32> to vector<2x8x64xbf16>
    %40 = vector.shape_cast %31 : vector<16x64xf32> to vector<2x8x64xf32>
    %41 = vector.shape_cast %34 : vector<16x64xf32> to vector<2x8x64xf32>
    %42 = tpu.concatenate %40, %40, %40, %40, %40, %40, %40, %40 in 1 : vector<2x8x64xf32>, vector<2x8x64xf32>, vector<2x8x64xf32>, vector<2x8x64xf32>, vector<2x8x64xf32>, vector<2x8x64xf32>, vector<2x8x64xf32>, vector<2x8x64xf32> -> vector<2x64x64xf32>
    %43 = tpu.concatenate %41, %41, %41, %41, %41, %41, %41, %41 in 1 : vector<2x8x64xf32>, vector<2x8x64xf32>, vector<2x8x64xf32>, vector<2x8x64xf32>, vector<2x8x64xf32>, vector<2x8x64xf32>, vector<2x8x64xf32>, vector<2x8x64xf32> -> vector<2x64x64xf32>
    %44 = vector.shape_cast %35 : vector<64x64xf32> to vector<1x64x64xf32>
    %45 = vector.broadcast %44 : vector<1x64x64xf32> to vector<2x64x64xf32>
    %46 = arith.mulf %42, %45 : vector<2x64x64xf32>
    %47 = arith.truncf %46 : vector<2x64x64xf32> to vector<2x64x64xbf16>
    %48 = vector.shape_cast %35 : vector<64x64xf32> to vector<1x64x64xf32>
    %49 = vector.broadcast %48 : vector<1x64x64xf32> to vector<2x64x64xf32>
    %50 = arith.mulf %43, %49 : vector<2x64x64xf32>
    %51 = arith.truncf %50 : vector<2x64x64xf32> to vector<2x64x64xbf16>
    "tpu.trace_start"() <{level = 10 : i32, message = "bqd,bcd->bqc"}> : () -> ()
    %cst_16 = arith.constant dense<0.000000e+00> : vector<2x8x64xf32>
    %52 = tpu.matmul %39, %47, %cst_16 {dimension_numbers = #tpu.dot_dimension_numbers<[2], [2], [1], [1], [0, 0, 0, 1, 1, 1], [0], [0]>} : vector<2x8x64xbf16>, vector<2x64x64xbf16>, vector<2x8x64xf32> -> vector<2x8x64xf32>
    "tpu.trace_stop"() : () -> ()
    %cst_17 = arith.constant 0.353553385 : f32
    %53 = vector.broadcast %cst_17 : f32 to vector<2x8x64xf32>
    %54 = arith.mulf %52, %53 : vector<2x8x64xf32>
    %55 = vector.shape_cast %37 : vector<8x64xf32> to vector<1x8x64xf32>
    %56 = vector.broadcast %55 : vector<1x8x64xf32> to vector<2x8x64xf32>
    %57 = arith.addf %54, %56 : vector<2x8x64xf32>
    %cst_18 = arith.constant dense<0xFF800000> : vector<2x8xf32>
    %58 = vector.multi_reduction <maximumf>, %57, %cst_18 [2] : vector<2x8x64xf32> to vector<2x8xf32>
    %59 = vector.shape_cast %58 : vector<2x8xf32> to vector<2x8x1xf32>
    %60 = vector.broadcast %59 : vector<2x8x1xf32> to vector<2x8x64xf32>
    %61 = arith.subf %57, %60 : vector<2x8x64xf32>
    %62 = math.exp %61 : vector<2x8x64xf32>
    %63 = vector.shape_cast %62 : vector<2x8x64xf32> to vector<16x64xf32>
    %cst_19 = arith.constant dense<0.000000e+00> : vector<16x64xf32>
    %64 = tpu.matmul %63, %36, %cst_19 {dimension_numbers = #tpu.dot_dimension_numbers<[1], [0], [0], [1], [0, 0, 1, 1], [], []>} : vector<16x64xf32>, vector<64x64xf32>, vector<16x64xf32> -> vector<16x64xf32>
    %cst_20 = arith.constant 1.000000e-30 : f32
    %65 = vector.broadcast %cst_20 : f32 to vector<16x64xf32>
    %66 = arith.maximumf %64, %65 : vector<16x64xf32>
    %67 = tpu.reciprocal %66 {approx = true} : vector<16x64xf32> -> vector<16x64xf32>
    %68 = arith.mulf %63, %67 : vector<16x64xf32>
    %69 = vector.shape_cast %68 : vector<16x64xf32> to vector<2x8x64xf32>
    %70 = arith.truncf %69 : vector<2x8x64xf32> to vector<2x8x64xbf16>
    "tpu.trace_start"() <{level = 10 : i32, message = "bqc,bcd->bqd"}> : () -> ()
    %cst_21 = arith.constant dense<0.000000e+00> : vector<2x8x64xf32>
    %71 = tpu.matmul %70, %51, %cst_21 {dimension_numbers = #tpu.dot_dimension_numbers<[2], [1], [1], [2], [0, 0, 0, 1, 1, 2], [0], [0]>} : vector<2x8x64xbf16>, vector<2x64x64xbf16>, vector<2x8x64xf32> -> vector<2x8x64xf32>
    "tpu.trace_stop"() : () -> ()
    %72 = vector.shape_cast %71 : vector<2x8x64xf32> to vector<16x64xf32>
    %73 = arith.truncf %72 : vector<16x64xf32> to vector<16x64xbf16>
    %c0_22 = arith.constant 0 : index
    %c0_23 = arith.constant 0 : index
    %c0_24 = arith.constant 0 : index
    %74 = vector.load %arg9[%c0_22, %c0_23, %c0_24] : memref<1x64x64xbf16, #tpu.memory_space<vmem>>, vector<1x64x64xbf16>
    %75 = vector.shape_cast %74 : vector<1x64x64xbf16> to vector<64x64xbf16>
    %cst_25 = arith.constant dense<0.000000e+00> : vector<16x64xf32>
    %76 = tpu.matmul %73, %75, %cst_25 {dimension_numbers = #tpu.dot_dimension_numbers<[1], [0], [0], [1], [0, 0, 1, 1], [], []>} : vector<16x64xbf16>, vector<64x64xbf16>, vector<16x64xf32> -> vector<16x64xf32>
    %77 = vector.broadcast %10 : vector<1x64xf32> to vector<16x64xf32>
    %78 = arith.addf %76, %77 : vector<16x64xf32>
    %79 = arith.addf %3, %78 : vector<16x64xf32>
    %cst_26 = arith.constant dense<0.000000e+00> : vector<16xf32>
    %80 = vector.multi_reduction <add>, %79, %cst_26 [1] : vector<16x64xf32> to vector<16xf32>
    %81 = vector.shape_cast %80 : vector<16xf32> to vector<16x1xf32>
    %cst_27 = arith.constant 6.400000e+01 : f32
    %82 = vector.broadcast %cst_27 : f32 to vector<16x1xf32>
    %83 = arith.divf %81, %82 : vector<16x1xf32>
    %84 = vector.broadcast %83 : vector<16x1xf32> to vector<16x64xf32>
    %85 = arith.subf %79, %84 : vector<16x64xf32>
    %86 = arith.mulf %85, %85 : vector<16x64xf32>
    %cst_28 = arith.constant dense<0.000000e+00> : vector<16xf32>
    %87 = vector.multi_reduction <add>, %86, %cst_28 [1] : vector<16x64xf32> to vector<16xf32>
    %88 = vector.shape_cast %87 : vector<16xf32> to vector<16x1xf32>
    %cst_29 = arith.constant 6.400000e+01 : f32
    %89 = vector.broadcast %cst_29 : f32 to vector<16x1xf32>
    %90 = arith.divf %88, %89 : vector<16x1xf32>
    %91 = vector.broadcast %83 : vector<16x1xf32> to vector<16x64xf32>
    %92 = arith.subf %79, %91 : vector<16x64xf32>
    %cst_30 = arith.constant 9.99999974E-6 : f32
    %93 = vector.broadcast %cst_30 : f32 to vector<16x1xf32>
    %94 = arith.addf %90, %93 : vector<16x1xf32>
    %95 = math.rsqrt %94 : vector<16x1xf32>
    %96 = vector.broadcast %95 : vector<16x1xf32> to vector<16x64xf32>
    %97 = arith.mulf %92, %96 : vector<16x64xf32>
    %98 = vector.broadcast %16 : vector<1x64xf32> to vector<16x64xf32>
    %99 = arith.mulf %97, %98 : vector<16x64xf32>
    %100 = vector.broadcast %17 : vector<1x64xf32> to vector<16x64xf32>
    %101 = arith.addf %99, %100 : vector<16x64xf32>
    %102 = arith.truncf %101 : vector<16x64xf32> to vector<16x64xbf16>
    %c0_31 = arith.constant 0 : index
    %c0_32 = arith.constant 0 : index
    %c0_33 = arith.constant 0 : index
    %103 = vector.load %arg10[%c0_31, %c0_32, %c0_33] : memref<1x64x64xbf16, #tpu.memory_space<vmem>>, vector<1x64x64xbf16>
    %104 = vector.shape_cast %103 : vector<1x64x64xbf16> to vector<64x64xbf16>
    %cst_34 = arith.constant dense<0.000000e+00> : vector<16x64xf32>
    %105 = tpu.matmul %102, %104, %cst_34 {dimension_numbers = #tpu.dot_dimension_numbers<[1], [0], [0], [1], [0, 0, 1, 1], [], []>} : vector<16x64xbf16>, vector<64x64xbf16>, vector<16x64xf32> -> vector<16x64xf32>
    %106 = vector.broadcast %11 : vector<1x64xf32> to vector<16x64xf32>
    %107 = arith.addf %105, %106 : vector<16x64xf32>
    %108 = arith.truncf %4 : vector<16x64xf32> to vector<16x64xbf16>
    %c0_35 = arith.constant 0 : index
    %c0_36 = arith.constant 0 : index
    %c0_37 = arith.constant 0 : index
    %109 = vector.load %arg11[%c0_35, %c0_36, %c0_37] : memref<1x64x128xbf16, #tpu.memory_space<vmem>>, vector<1x64x128xbf16>
    %110 = vector.shape_cast %109 : vector<1x64x128xbf16> to vector<64x128xbf16>
    %cst_38 = arith.constant dense<0.000000e+00> : vector<16x128xf32>
    %111 = tpu.matmul %108, %110, %cst_38 {dimension_numbers = #tpu.dot_dimension_numbers<[1], [0], [0], [1], [0, 0, 1, 1], [], []>} : vector<16x64xbf16>, vector<64x128xbf16>, vector<16x128xf32> -> vector<16x128xf32>
    %112 = vector.extract_strided_slice %111 {offsets = [0, 0], sizes = [16, 64], strides = [1, 1]} : vector<16x128xf32> to vector<16x64xf32>
    %113 = vector.broadcast %12 : vector<1x64xf32> to vector<16x64xf32>
    %114 = arith.addf %112, %113 : vector<16x64xf32>
    %115 = vector.extract_strided_slice %111 {offsets = [0, 64], sizes = [16, 64], strides = [1, 1]} : vector<16x128xf32> to vector<16x64xf32>
    %116 = vector.broadcast %13 : vector<1x64xf32> to vector<16x64xf32>
    %117 = arith.addf %115, %116 : vector<16x64xf32>
    %c0_39 = arith.constant 0 : index
    %c0_40 = arith.constant 0 : index
    %118 = vector.load %arg4[%c0_39, %c0_40] : memref<64x64xf32, #tpu.memory_space<vmem>>, vector<64x64xf32>
    %c0_41 = arith.constant 0 : index
    %c0_42 = arith.constant 0 : index
    %119 = vector.load %arg7[%c0_41, %c0_42] : memref<64x64xf32, #tpu.memory_space<vmem>>, vector<64x64xf32>
    %120 = vector.shape_cast %107 : vector<16x64xf32> to vector<2x8x64xf32>
    %121 = arith.truncf %120 : vector<2x8x64xf32> to vector<2x8x64xbf16>
    %122 = vector.shape_cast %114 : vector<16x64xf32> to vector<2x8x64xf32>
    %123 = vector.shape_cast %117 : vector<16x64xf32> to vector<2x8x64xf32>
    %124 = tpu.concatenate %122, %122, %122, %122, %122, %122, %122, %122 in 1 : vector<2x8x64xf32>, vector<2x8x64xf32>, vector<2x8x64xf32>, vector<2x8x64xf32>, vector<2x8x64xf32>, vector<2x8x64xf32>, vector<2x8x64xf32>, vector<2x8x64xf32> -> vector<2x64x64xf32>
    %125 = tpu.concatenate %123, %123, %123, %123, %123, %123, %123, %123 in 1 : vector<2x8x64xf32>, vector<2x8x64xf32>, vector<2x8x64xf32>, vector<2x8x64xf32>, vector<2x8x64xf32>, vector<2x8x64xf32>, vector<2x8x64xf32>, vector<2x8x64xf32> -> vector<2x64x64xf32>
    %126 = vector.shape_cast %118 : vector<64x64xf32> to vector<1x64x64xf32>
    %127 = vector.broadcast %126 : vector<1x64x64xf32> to vector<2x64x64xf32>
    %128 = arith.mulf %124, %127 : vector<2x64x64xf32>
    %129 = arith.truncf %128 : vector<2x64x64xf32> to vector<2x64x64xbf16>
    %130 = vector.shape_cast %118 : vector<64x64xf32> to vector<1x64x64xf32>
    %131 = vector.broadcast %130 : vector<1x64x64xf32> to vector<2x64x64xf32>
    %132 = arith.mulf %125, %131 : vector<2x64x64xf32>
    %133 = arith.truncf %132 : vector<2x64x64xf32> to vector<2x64x64xbf16>
    "tpu.trace_start"() <{level = 10 : i32, message = "bqd,bcd->bqc"}> : () -> ()
    %cst_43 = arith.constant dense<0.000000e+00> : vector<2x8x64xf32>
    %134 = tpu.matmul %121, %129, %cst_43 {dimension_numbers = #tpu.dot_dimension_numbers<[2], [2], [1], [1], [0, 0, 0, 1, 1, 1], [0], [0]>} : vector<2x8x64xbf16>, vector<2x64x64xbf16>, vector<2x8x64xf32> -> vector<2x8x64xf32>
    "tpu.trace_stop"() : () -> ()
    %cst_44 = arith.constant 0.353553385 : f32
    %135 = vector.broadcast %cst_44 : f32 to vector<2x8x64xf32>
    %136 = arith.mulf %134, %135 : vector<2x8x64xf32>
    %cst_45 = arith.constant dense<0xFF800000> : vector<2x8xf32>
    %137 = vector.multi_reduction <maximumf>, %136, %cst_45 [2] : vector<2x8x64xf32> to vector<2x8xf32>
    %138 = vector.shape_cast %137 : vector<2x8xf32> to vector<2x8x1xf32>
    %139 = vector.broadcast %138 : vector<2x8x1xf32> to vector<2x8x64xf32>
    %140 = arith.subf %136, %139 : vector<2x8x64xf32>
    %141 = math.exp %140 : vector<2x8x64xf32>
    %142 = vector.shape_cast %141 : vector<2x8x64xf32> to vector<16x64xf32>
    %cst_46 = arith.constant dense<0.000000e+00> : vector<16x64xf32>
    %143 = tpu.matmul %142, %119, %cst_46 {dimension_numbers = #tpu.dot_dimension_numbers<[1], [0], [0], [1], [0, 0, 1, 1], [], []>} : vector<16x64xf32>, vector<64x64xf32>, vector<16x64xf32> -> vector<16x64xf32>
    %cst_47 = arith.constant 1.000000e-30 : f32
    %144 = vector.broadcast %cst_47 : f32 to vector<16x64xf32>
    %145 = arith.maximumf %143, %144 : vector<16x64xf32>
    %146 = tpu.reciprocal %145 {approx = true} : vector<16x64xf32> -> vector<16x64xf32>
    %147 = arith.mulf %142, %146 : vector<16x64xf32>
    %148 = vector.shape_cast %147 : vector<16x64xf32> to vector<2x8x64xf32>
    %149 = arith.truncf %148 : vector<2x8x64xf32> to vector<2x8x64xbf16>
    "tpu.trace_start"() <{level = 10 : i32, message = "bqc,bcd->bqd"}> : () -> ()
    %cst_48 = arith.constant dense<0.000000e+00> : vector<2x8x64xf32>
    %150 = tpu.matmul %149, %133, %cst_48 {dimension_numbers = #tpu.dot_dimension_numbers<[2], [1], [1], [2], [0, 0, 0, 1, 1, 2], [0], [0]>} : vector<2x8x64xbf16>, vector<2x64x64xbf16>, vector<2x8x64xf32> -> vector<2x8x64xf32>
    "tpu.trace_stop"() : () -> ()
    %151 = vector.shape_cast %150 : vector<2x8x64xf32> to vector<16x64xf32>
    %152 = arith.truncf %151 : vector<16x64xf32> to vector<16x64xbf16>
    %c0_49 = arith.constant 0 : index
    %c0_50 = arith.constant 0 : index
    %c0_51 = arith.constant 0 : index
    %153 = vector.load %arg12[%c0_49, %c0_50, %c0_51] : memref<1x64x64xbf16, #tpu.memory_space<vmem>>, vector<1x64x64xbf16>
    %154 = vector.shape_cast %153 : vector<1x64x64xbf16> to vector<64x64xbf16>
    %cst_52 = arith.constant dense<0.000000e+00> : vector<16x64xf32>
    %155 = tpu.matmul %152, %154, %cst_52 {dimension_numbers = #tpu.dot_dimension_numbers<[1], [0], [0], [1], [0, 0, 1, 1], [], []>} : vector<16x64xbf16>, vector<64x64xbf16>, vector<16x64xf32> -> vector<16x64xf32>
    %156 = vector.broadcast %14 : vector<1x64xf32> to vector<16x64xf32>
    %157 = arith.addf %155, %156 : vector<16x64xf32>
    %158 = arith.addf %101, %157 : vector<16x64xf32>
    %cst_53 = arith.constant dense<0.000000e+00> : vector<16xf32>
    %159 = vector.multi_reduction <add>, %158, %cst_53 [1] : vector<16x64xf32> to vector<16xf32>
    %160 = vector.shape_cast %159 : vector<16xf32> to vector<16x1xf32>
    %cst_54 = arith.constant 6.400000e+01 : f32
    %161 = vector.broadcast %cst_54 : f32 to vector<16x1xf32>
    %162 = arith.divf %160, %161 : vector<16x1xf32>
    %163 = vector.broadcast %162 : vector<16x1xf32> to vector<16x64xf32>
    %164 = arith.subf %158, %163 : vector<16x64xf32>
    %165 = arith.mulf %164, %164 : vector<16x64xf32>
    %cst_55 = arith.constant dense<0.000000e+00> : vector<16xf32>
    %166 = vector.multi_reduction <add>, %165, %cst_55 [1] : vector<16x64xf32> to vector<16xf32>
    %167 = vector.shape_cast %166 : vector<16xf32> to vector<16x1xf32>
    %cst_56 = arith.constant 6.400000e+01 : f32
    %168 = vector.broadcast %cst_56 : f32 to vector<16x1xf32>
    %169 = arith.divf %167, %168 : vector<16x1xf32>
    %170 = vector.broadcast %162 : vector<16x1xf32> to vector<16x64xf32>
    %171 = arith.subf %158, %170 : vector<16x64xf32>
    %cst_57 = arith.constant 9.99999974E-6 : f32
    %172 = vector.broadcast %cst_57 : f32 to vector<16x1xf32>
    %173 = arith.addf %169, %172 : vector<16x1xf32>
    %174 = math.rsqrt %173 : vector<16x1xf32>
    %175 = vector.broadcast %174 : vector<16x1xf32> to vector<16x64xf32>
    %176 = arith.mulf %171, %175 : vector<16x64xf32>
    %177 = vector.broadcast %18 : vector<1x64xf32> to vector<16x64xf32>
    %178 = arith.mulf %176, %177 : vector<16x64xf32>
    %179 = vector.broadcast %19 : vector<1x64xf32> to vector<16x64xf32>
    %180 = arith.addf %178, %179 : vector<16x64xf32>
    %181 = arith.truncf %180 : vector<16x64xf32> to vector<16x64xbf16>
    %c0_58 = arith.constant 0 : index
    %c0_59 = arith.constant 0 : index
    %c0_60 = arith.constant 0 : index
    %182 = vector.load %arg13[%c0_58, %c0_59, %c0_60] : memref<1x64x2048xbf16, #tpu.memory_space<vmem>>, vector<1x64x2048xbf16>
    %183 = vector.shape_cast %182 : vector<1x64x2048xbf16> to vector<64x2048xbf16>
    %cst_61 = arith.constant dense<0.000000e+00> : vector<16x2048xf32>
    %184 = tpu.matmul %181, %183, %cst_61 {dimension_numbers = #tpu.dot_dimension_numbers<[1], [0], [0], [1], [0, 0, 1, 1], [], []>} : vector<16x64xbf16>, vector<64x2048xbf16>, vector<16x2048xf32> -> vector<16x2048xf32>
    %c0_62 = arith.constant 0 : index
    %c0_63 = arith.constant 0 : index
    %c0_64 = arith.constant 0 : index
    %185 = vector.load %arg16[%c0_62, %c0_63, %c0_64] : memref<1x1x2048xf32, #tpu.memory_space<vmem>>, vector<1x1x2048xf32>
    %186 = vector.shape_cast %185 : vector<1x1x2048xf32> to vector<1x2048xf32>
    %187 = vector.broadcast %186 : vector<1x2048xf32> to vector<16x2048xf32>
    %188 = arith.addf %184, %187 : vector<16x2048xf32>
    %cst_65 = arith.constant 0.000000e+00 : f32
    %189 = vector.broadcast %cst_65 : f32 to vector<16x2048xf32>
    %190 = arith.maximumf %188, %189 : vector<16x2048xf32>
    %191 = arith.truncf %190 : vector<16x2048xf32> to vector<16x2048xbf16>
    %c0_66 = arith.constant 0 : index
    %c0_67 = arith.constant 0 : index
    %c0_68 = arith.constant 0 : index
    %192 = vector.load %arg14[%c0_66, %c0_67, %c0_68] : memref<1x2048x64xbf16, #tpu.memory_space<vmem>>, vector<1x2048x64xbf16>
    %193 = vector.shape_cast %192 : vector<1x2048x64xbf16> to vector<2048x64xbf16>
    %cst_69 = arith.constant dense<0.000000e+00> : vector<16x64xf32>
    %194 = tpu.matmul %191, %193, %cst_69 {dimension_numbers = #tpu.dot_dimension_numbers<[1], [0], [0], [1], [0, 0, 1, 1], [], []>} : vector<16x2048xbf16>, vector<2048x64xbf16>, vector<16x64xf32> -> vector<16x64xf32>
    %195 = vector.broadcast %15 : vector<1x64xf32> to vector<16x64xf32>
    %196 = arith.addf %194, %195 : vector<16x64xf32>
    %197 = arith.addf %180, %196 : vector<16x64xf32>
    %cst_70 = arith.constant dense<0.000000e+00> : vector<16xf32>
    %198 = vector.multi_reduction <add>, %197, %cst_70 [1] : vector<16x64xf32> to vector<16xf32>
    %199 = vector.shape_cast %198 : vector<16xf32> to vector<16x1xf32>
    %cst_71 = arith.constant 6.400000e+01 : f32
    %200 = vector.broadcast %cst_71 : f32 to vector<16x1xf32>
    %201 = arith.divf %199, %200 : vector<16x1xf32>
    %202 = vector.broadcast %201 : vector<16x1xf32> to vector<16x64xf32>
    %203 = arith.subf %197, %202 : vector<16x64xf32>
    %204 = arith.mulf %203, %203 : vector<16x64xf32>
    %cst_72 = arith.constant dense<0.000000e+00> : vector<16xf32>
    %205 = vector.multi_reduction <add>, %204, %cst_72 [1] : vector<16x64xf32> to vector<16xf32>
    %206 = vector.shape_cast %205 : vector<16xf32> to vector<16x1xf32>
    %cst_73 = arith.constant 6.400000e+01 : f32
    %207 = vector.broadcast %cst_73 : f32 to vector<16x1xf32>
    %208 = arith.divf %206, %207 : vector<16x1xf32>
    %209 = vector.broadcast %201 : vector<16x1xf32> to vector<16x64xf32>
    %210 = arith.subf %197, %209 : vector<16x64xf32>
    %cst_74 = arith.constant 9.99999974E-6 : f32
    %211 = vector.broadcast %cst_74 : f32 to vector<16x1xf32>
    %212 = arith.addf %208, %211 : vector<16x1xf32>
    %213 = math.rsqrt %212 : vector<16x1xf32>
    %214 = vector.broadcast %213 : vector<16x1xf32> to vector<16x64xf32>
    %215 = arith.mulf %210, %214 : vector<16x64xf32>
    %216 = vector.broadcast %20 : vector<1x64xf32> to vector<16x64xf32>
    %217 = arith.mulf %215, %216 : vector<16x64xf32>
    %218 = vector.broadcast %21 : vector<1x64xf32> to vector<16x64xf32>
    %219 = arith.addf %217, %218 : vector<16x64xf32>
    %c0_75 = arith.constant 0 : index
    %c0_76 = arith.constant 0 : index
    %220 = vector.load %arg23[%c0_75, %c0_76] : memref<16x64xf32, #tpu.memory_space<vmem>>, vector<16x64xf32>
    tpu.vector_store %arg23[%c0_75, %c0_76], %219 {strides = array<i32>} : memref<16x64xf32, #tpu.memory_space<vmem>>, vector<16x64xf32>,
    %c1_i32 = arith.constant 1 : i32
    %221 = arith.cmpi eq, %arg0, %c1_i32 : i32
    %222 = arith.extui %221 : i1 to i32
    %c0_i32_77 = arith.constant 0 : i32
    %223 = arith.cmpi ne, %222, %c0_i32_77 : i32
    scf.if %223 {
      %224 = arith.truncf %219 : vector<16x64xf32> to vector<16x64xbf16>
      %c0_78 = arith.constant 0 : index
      %c0_79 = arith.constant 0 : index
      %225 = vector.load %arg20[%c0_78, %c0_79] : memref<64x27xbf16, #tpu.memory_space<vmem>>, vector<64x27xbf16>
      %cst_80 = arith.constant dense<0.000000e+00> : vector<16x27xf32>
      %226 = tpu.matmul %224, %225, %cst_80 {dimension_numbers = #tpu.dot_dimension_numbers<[1], [0], [0], [1], [0, 0, 1, 1], [], []>} : vector<16x64xbf16>, vector<64x27xbf16>, vector<16x27xf32> -> vector<16x27xf32>
      %c0_81 = arith.constant 0 : index
      %c0_82 = arith.constant 0 : index
      %227 = vector.load %arg21[%c0_81, %c0_82] : memref<1x27xf32, #tpu.memory_space<vmem>>, vector<1x27xf32>
      %228 = vector.broadcast %227 : vector<1x27xf32> to vector<16x27xf32>
      %229 = arith.addf %226, %228 : vector<16x27xf32>
      %230 = vector.extract_strided_slice %229 {offsets = [0, 0], sizes = [16, 12], strides = [1, 1]} : vector<16x27xf32> to vector<16x12xf32>
      %231 = vector.extract_strided_slice %229 {offsets = [0, 12], sizes = [16, 12], strides = [1, 1]} : vector<16x27xf32> to vector<16x12xf32>
      %232 = vector.extract_strided_slice %229 {offsets = [0, 24], sizes = [16, 3], strides = [1, 1]} : vector<16x27xf32> to vector<16x3xf32>
      %c0_83 = arith.constant 0 : index
      %c0_84 = arith.constant 0 : index
      %233 = vector.load %arg17[%c0_83, %c0_84] : memref<16x1xi32, #tpu.memory_space<vmem>>, vector<16x1xi32>
      %234 = tpu.iota {dimensions = array<i32: 1>} : vector<16x12xi32>
      %235 = vector.broadcast %233 : vector<16x1xi32> to vector<16x12xi32>
      %236 = arith.cmpi eq, %234, %235 : vector<16x12xi32>
      %cst_85 = arith.constant dense<0xFF800000> : vector<16xf32>
      %237 = vector.multi_reduction <maximumf>, %230, %cst_85 [1] : vector<16x12xf32> to vector<16xf32>
      %238 = vector.shape_cast %237 : vector<16xf32> to vector<16x1xf32>
      %239 = vector.broadcast %238 : vector<16x1xf32> to vector<16x12xf32>
      %240 = arith.subf %230, %239 : vector<16x12xf32>
      %241 = math.exp %240 : vector<16x12xf32>
      %cst_86 = arith.constant dense<0.000000e+00> : vector<16xf32>
      %242 = vector.multi_reduction <add>, %241, %cst_86 [1] : vector<16x12xf32> to vector<16xf32>
      %243 = vector.shape_cast %242 : vector<16xf32> to vector<16x1xf32>
      %244 = math.log %243 : vector<16x1xf32>
      %245 = arith.addf %238, %244 : vector<16x1xf32>
      %cst_87 = arith.constant 0.000000e+00 : f32
      %246 = vector.broadcast %cst_87 : f32 to vector<16x12xf32>
      %247 = arith.select %236, %230, %246 : vector<16x12xi1>, vector<16x12xf32>
      %cst_88 = arith.constant dense<0.000000e+00> : vector<16xf32>
      %248 = vector.multi_reduction <add>, %247, %cst_88 [1] : vector<16x12xf32> to vector<16xf32>
      %249 = vector.shape_cast %248 : vector<16xf32> to vector<16x1xf32>
      %250 = arith.subf %245, %249 : vector<16x1xf32>
      %251 = vector.shape_cast %250 : vector<16x1xf32> to vector<1x16x1xf32>
      %cst_89 = arith.constant dense<0.000000e+00> : vector<1xf32>
      %252 = vector.multi_reduction <add>, %251, %cst_89 [1, 2] : vector<1x16x1xf32> to vector<1xf32>
      %253 = vector.shape_cast %252 : vector<1xf32> to vector<1x1x1xf32>
      %254 = vector.extract %253[0, 0, 0] : f32 from vector<1x1x1xf32>
      %cst_90 = arith.constant 1.600000e+01 : f32
      %255 = arith.divf %254, %cst_90 : f32
      %cst_91 = arith.constant 0.000000e+00 : f32
      %256 = vector.broadcast %cst_91 : f32 to vector<16x3xf32>
      %257 = arith.subf %256, %232 : vector<16x3xf32>
      %258 = math.exp %257 : vector<16x3xf32>
      %cst_92 = arith.constant 1.000000e+00 : f32
      %259 = vector.broadcast %cst_92 : f32 to vector<16x3xf32>
      %260 = arith.addf %259, %258 : vector<16x3xf32>
      %cst_93 = arith.constant 1.000000e+00 : f32
      %261 = vector.broadcast %cst_93 : f32 to vector<16x3xf32>
      %262 = arith.divf %261, %260 : vector<16x3xf32>
      %c0_94 = arith.constant 0 : index
      %c0_95 = arith.constant 0 : index
      %263 = vector.load %arg18[%c0_94, %c0_95] : memref<16x3xf32, #tpu.memory_space<vmem>>, vector<16x3xf32>
      %264 = arith.subf %262, %263 : vector<16x3xf32>
      %265 = math.absf %264 : vector<16x3xf32>
      %266 = vector.extract_strided_slice %265 {offsets = [0, 0], sizes = [16, 1], strides = [1, 1]} : vector<16x3xf32> to vector<16x1xf32>
      %267 = vector.shape_cast %266 : vector<16x1xf32> to vector<1x16x1xf32>
      %cst_96 = arith.constant dense<0.000000e+00> : vector<1xf32>
      %268 = vector.multi_reduction <add>, %267, %cst_96 [1, 2] : vector<1x16x1xf32> to vector<1xf32>
      %269 = vector.shape_cast %268 : vector<1xf32> to vector<1x1x1xf32>
      %270 = vector.extract %269[0, 0, 0] : f32 from vector<1x1x1xf32>
      %cst_97 = arith.constant 1.600000e+01 : f32
      %271 = arith.divf %270, %cst_97 : f32
      %272 = vector.extract_strided_slice %265 {offsets = [0, 1], sizes = [16, 1], strides = [1, 1]} : vector<16x3xf32> to vector<16x1xf32>
      %273 = vector.shape_cast %272 : vector<16x1xf32> to vector<1x16x1xf32>
      %cst_98 = arith.constant dense<0.000000e+00> : vector<1xf32>
      %274 = vector.multi_reduction <add>, %273, %cst_98 [1, 2] : vector<1x16x1xf32> to vector<1xf32>
      %275 = vector.shape_cast %274 : vector<1xf32> to vector<1x1x1xf32>
      %276 = vector.extract %275[0, 0, 0] : f32 from vector<1x1x1xf32>
      %cst_99 = arith.constant 1.600000e+01 : f32
      %277 = arith.divf %276, %cst_99 : f32
      %278 = vector.extract_strided_slice %265 {offsets = [0, 2], sizes = [16, 1], strides = [1, 1]} : vector<16x3xf32> to vector<16x1xf32>
      %279 = vector.shape_cast %278 : vector<16x1xf32> to vector<1x16x1xf32>
      %cst_100 = arith.constant dense<0.000000e+00> : vector<1xf32>
      %280 = vector.multi_reduction <add>, %279, %cst_100 [1, 2] : vector<1x16x1xf32> to vector<1xf32>
      %281 = vector.shape_cast %280 : vector<1xf32> to vector<1x1x1xf32>
      %282 = vector.extract %281[0, 0, 0] : f32 from vector<1x1x1xf32>
      %cst_101 = arith.constant 1.600000e+01 : f32
      %283 = arith.divf %282, %cst_101 : f32
      %cst_102 = arith.constant 0.000000e+00 : f32
      %284 = vector.broadcast %cst_102 : f32 to vector<16x12xf32>
      %285 = arith.subf %284, %231 : vector<16x12xf32>
      %286 = math.exp %285 : vector<16x12xf32>
      %cst_103 = arith.constant 1.000000e+00 : f32
      %287 = vector.broadcast %cst_103 : f32 to vector<16x12xf32>
      %288 = arith.addf %287, %286 : vector<16x12xf32>
      %cst_104 = arith.constant 1.000000e+00 : f32
      %289 = vector.broadcast %cst_104 : f32 to vector<16x12xf32>
      %290 = arith.divf %289, %288 : vector<16x12xf32>
      %cst_105 = arith.constant dense<0.000000e+00> : vector<16xf32>
      %291 = vector.multi_reduction <add>, %290, %cst_105 [1] : vector<16x12xf32> to vector<16xf32>
      %292 = vector.shape_cast %291 : vector<16xf32> to vector<16x1xf32>
      %293 = vector.broadcast %292 : vector<16x1xf32> to vector<16x12xf32>
      %294 = arith.divf %290, %293 : vector<16x12xf32>
      %c0_106 = arith.constant 0 : index
      %c0_107 = arith.constant 0 : index
      %295 = vector.load %arg19[%c0_106, %c0_107] : memref<16x12xf32, #tpu.memory_space<vmem>>, vector<16x12xf32>
      %cst_108 = arith.constant 1.000000e-30 : f32
      %296 = vector.broadcast %cst_108 : f32 to vector<16x12xf32>
      %297 = arith.maximumf %295, %296 : vector<16x12xf32>
      %cst_109 = arith.constant 0.000000e+00 : f32
      %298 = vector.broadcast %cst_109 : f32 to vector<16x12xf32>
      %299 = arith.cmpf ogt, %295, %298 : vector<16x12xf32>
      %300 = math.log %297 : vector<16x12xf32>
      %cst_110 = arith.constant 9.99999982E-15 : f32
      %301 = vector.broadcast %cst_110 : f32 to vector<16x12xf32>
      %302 = arith.addf %294, %301 : vector<16x12xf32>
      %303 = math.log %302 : vector<16x12xf32>
      %304 = arith.subf %300, %303 : vector<16x12xf32>
      %305 = arith.mulf %295, %304 : vector<16x12xf32>
      %cst_111 = arith.constant 0.000000e+00 : f32
      %306 = vector.broadcast %cst_111 : f32 to vector<16x12xf32>
      %307 = arith.select %299, %305, %306 : vector<16x12xi1>, vector<16x12xf32>
      %308 = vector.shape_cast %307 : vector<16x12xf32> to vector<1x16x12xf32>
      %cst_112 = arith.constant dense<0.000000e+00> : vector<1xf32>
      %309 = vector.multi_reduction <add>, %308, %cst_112 [1, 2] : vector<1x16x12xf32> to vector<1xf32>
      %310 = vector.shape_cast %309 : vector<1xf32> to vector<1x1x1xf32>
      %311 = vector.extract %310[0, 0, 0] : f32 from vector<1x1x1xf32>
      %cst_113 = arith.constant 1.920000e+02 : f32
      %312 = arith.divf %311, %cst_113 : f32
      %c0_114 = arith.constant 0 : index
      %313 = memref.load %arg22[%c0_114] : memref<5xf32, #tpu.memory_space<smem>>
      memref.store %255, %arg22[%c0_114] : memref<5xf32, #tpu.memory_space<smem>>
      %c1 = arith.constant 1 : index
      %314 = memref.load %arg22[%c1] : memref<5xf32, #tpu.memory_space<smem>>
      memref.store %271, %arg22[%c1] : memref<5xf32, #tpu.memory_space<smem>>
      %c2 = arith.constant 2 : index
      %315 = memref.load %arg22[%c2] : memref<5xf32, #tpu.memory_space<smem>>
      memref.store %277, %arg22[%c2] : memref<5xf32, #tpu.memory_space<smem>>
      %c3 = arith.constant 3 : index
      %316 = memref.load %arg22[%c3] : memref<5xf32, #tpu.memory_space<smem>>
      memref.store %283, %arg22[%c3] : memref<5xf32, #tpu.memory_space<smem>>
      %c4 = arith.constant 4 : index
      %317 = memref.load %arg22[%c4] : memref<5xf32, #tpu.memory_space<smem>>
      memref.store %312, %arg22[%c4] : memref<5xf32, #tpu.memory_space<smem>>
    } else {
    }
    return
  }
  func.func @transform_0(%arg0: i32) -> (i32, i32) {
    %c0_i32 = arith.constant 0 : i32
    %c0_i32_0 = arith.constant 0 : i32
    %c0_i32_1 = arith.constant 0 : i32
    return %c0_i32, %c0_i32_0 : i32, i32
  }
  func.func @transform_1(%arg0: i32) -> (i32, i32) {
    %c0_i32 = arith.constant 0 : i32
    %c0_i32_0 = arith.constant 0 : i32
    %c0_i32_1 = arith.constant 0 : i32
    return %c0_i32, %c0_i32_0 : i32, i32
  }
  func.func @transform_2(%arg0: i32) -> (i32, i32) {
    %c0_i32 = arith.constant 0 : i32
    %c0_i32_0 = arith.constant 0 : i32
    %c0_i32_1 = arith.constant 0 : i32
    return %c0_i32, %c0_i32_0 : i32, i32
  }
  func.func @transform_3(%arg0: i32) -> (i32, i32) {
    %c0_i32 = arith.constant 0 : i32
    %c0_i32_0 = arith.constant 0 : i32
    %c0_i32_1 = arith.constant 0 : i32
    return %c0_i32, %c0_i32_0 : i32, i32
  }
  func.func @transform_4(%arg0: i32) -> (i32, i32) {
    %c0_i32 = arith.constant 0 : i32
    %c0_i32_0 = arith.constant 0 : i32
    %c0_i32_1 = arith.constant 0 : i32
    return %c0_i32, %c0_i32_0 : i32, i32
  }
  func.func @transform_5(%arg0: i32) -> (i32, i32) {
    %c0_i32 = arith.constant 0 : i32
    %c0_i32_0 = arith.constant 0 : i32
    %c0_i32_1 = arith.constant 0 : i32
    return %c0_i32, %c0_i32_0 : i32, i32
  }
  func.func @transform_6(%arg0: i32) -> (i32, i32) {
    %c0_i32 = arith.constant 0 : i32
    %c0_i32_0 = arith.constant 0 : i32
    %c0_i32_1 = arith.constant 0 : i32
    return %c0_i32, %c0_i32_0 : i32, i32
  }
  func.func @transform_7(%arg0: i32) -> (i32, i32, i32) {
    %c0_i32 = arith.constant 0 : i32
    %c0_i32_0 = arith.constant 0 : i32
    %c0_i32_1 = arith.constant 0 : i32
    return %arg0, %c0_i32, %c0_i32_0 : i32, i32, i32
  }
  func.func @transform_8(%arg0: i32) -> (i32, i32, i32) {
    %c0_i32 = arith.constant 0 : i32
    %c0_i32_0 = arith.constant 0 : i32
    %c0_i32_1 = arith.constant 0 : i32
    return %arg0, %c0_i32, %c0_i32_0 : i32, i32, i32
  }
  func.func @transform_9(%arg0: i32) -> (i32, i32, i32) {
    %c0_i32 = arith.constant 0 : i32
    %c0_i32_0 = arith.constant 0 : i32
    %c0_i32_1 = arith.constant 0 : i32
    return %arg0, %c0_i32, %c0_i32_0 : i32, i32, i32
  }
  func.func @transform_10(%arg0: i32) -> (i32, i32, i32) {
    %c0_i32 = arith.constant 0 : i32
    %c0_i32_0 = arith.constant 0 : i32
    %c0_i32_1 = arith.constant 0 : i32
    return %arg0, %c0_i32, %c0_i32_0 : i32, i32, i32
  }
  func.func @transform_11(%arg0: i32) -> (i32, i32, i32) {
    %c0_i32 = arith.constant 0 : i32
    %c0_i32_0 = arith.constant 0 : i32
    %c0_i32_1 = arith.constant 0 : i32
    return %arg0, %c0_i32, %c0_i32_0 : i32, i32, i32
  }
  func.func @transform_12(%arg0: i32) -> (i32, i32, i32) {
    %c0_i32 = arith.constant 0 : i32
    %c0_i32_0 = arith.constant 0 : i32
    %c0_i32_1 = arith.constant 0 : i32
    return %arg0, %c0_i32, %c0_i32_0 : i32, i32, i32
  }
  func.func @transform_13(%arg0: i32) -> (i32, i32, i32) {
    %c0_i32 = arith.constant 0 : i32
    %c0_i32_0 = arith.constant 0 : i32
    %c0_i32_1 = arith.constant 0 : i32
    return %arg0, %c0_i32, %c0_i32_0 : i32, i32, i32
  }
  func.func @transform_14(%arg0: i32) -> (i32, i32, i32) {
    %c0_i32 = arith.constant 0 : i32
    %c0_i32_0 = arith.constant 0 : i32
    %c0_i32_1 = arith.constant 0 : i32
    return %arg0, %c0_i32, %c0_i32_0 : i32, i32, i32
  }
  func.func @transform_15(%arg0: i32) -> (i32, i32, i32) {
    %c0_i32 = arith.constant 0 : i32
    %c0_i32_0 = arith.constant 0 : i32
    %c0_i32_1 = arith.constant 0 : i32
    return %arg0, %c0_i32, %c0_i32_0 : i32, i32, i32
  }
  func.func @transform_16(%arg0: i32) -> (i32, i32) {
    %c0_i32 = arith.constant 0 : i32
    %c0_i32_0 = arith.constant 0 : i32
    %c0_i32_1 = arith.constant 0 : i32
    return %c0_i32, %c0_i32_0 : i32, i32
  }
  func.func @transform_17(%arg0: i32) -> (i32, i32) {
    %c0_i32 = arith.constant 0 : i32
    %c0_i32_0 = arith.constant 0 : i32
    %c0_i32_1 = arith.constant 0 : i32
    return %c0_i32, %c0_i32_0 : i32, i32
  }
  func.func @transform_18(%arg0: i32) -> (i32, i32) {
    %c0_i32 = arith.constant 0 : i32
    %c0_i32_0 = arith.constant 0 : i32
    %c0_i32_1 = arith.constant 0 : i32
    return %c0_i32, %c0_i32_0 : i32, i32
  }
  func.func @transform_19(%arg0: i32) -> (i32, i32) {
    %c0_i32 = arith.constant 0 : i32
    %c0_i32_0 = arith.constant 0 : i32
    %c0_i32_1 = arith.constant 0 : i32
    return %c0_i32, %c0_i32_0 : i32, i32
  }
  func.func @transform_20(%arg0: i32) -> (i32, i32) {
    %c0_i32 = arith.constant 0 : i32
    %c0_i32_0 = arith.constant 0 : i32
    %c0_i32_1 = arith.constant 0 : i32
    return %c0_i32, %c0_i32_0 : i32, i32
  }
  func.func @transform_21(%arg0: i32) -> i32 {
    %c0_i32 = arith.constant 0 : i32
    %c0_i32_0 = arith.constant 0 : i32
    return %c0_i32 : i32
  }
}

</mosaic_0001>

<bundles_post_ra>
// kernel: tile.9
= control target key start
LH: loop header
LB: loop body
LE: loop exit
PB: predicated region body
PF: predicated region fallthrough
CT: control target
= control target key end

     0   :  { %vm4_vm0 = vcmask 1047556   ;;  %s99_s14 = smov 56   ;;  %s100_s19 = smov 40   ;;  %vm6_vm1 = vcmask 64512   ;;  %vm16_vm2 = vcmask 523712   ;;  %vm26_vm3 = vcmask 458112   ;;  %s196_s0 = inlined_call_operand.vmem [shape: f32[8,8,8], index: 0, kind: input, shape index: {}]   ;;  %s197_s1 = inlined_call_operand.vmem [shape: f32[8,64], index: 1, kind: output, shape index: {}]  }
   0x1   :  { %v78_v0 = vld [vmem:[%s196_s0 + $0x7] ss:$8 sm:$0xf]   ;;  %v82_v3 = vld [vmem:[%s196_s0 + $0x5] ss:$8 sm:$0xf]  }
   0x2   :  { %v79_v1 = vld [vmem:[%s196_s0 + $0x7] ss:$8 sm:$0xf0]   ;;  %v83_v4 = vld [vmem:[%s196_s0 + $0x5] ss:$8 sm:$0xf0]  }
   0x3   :  { %v13_v2 = vsel %vm4_vm0, %v79_v1, %v78_v0  ;;  %v33_v5 = vsel %vm4_vm0, %v83_v4, %v82_v3  ;;  %v80_v6 = vld [vmem:[%s196_s0 + $0x6] ss:$8 sm:$0xf]   ;;  %v84_v9 = vld [vmem:[%s196_s0 + $0x4] ss:$8 sm:$0xf]  }
   0x4   :  { %14 = vrot.lane.b32.xlu0 %v13_v2, %s99_s14  ;;  %v81_v7 = vld [vmem:[%s196_s0 + $0x6] ss:$8 sm:$0xf0]   ;;  %34 = vrot.lane.b32.xlu1 %v33_v5, %s100_s19  ;;  %v85_v10 = vld [vmem:[%s196_s0 + $0x4] ss:$8 sm:$0xf0]  }
   0x5   :  { %v23_v8 = vsel %vm4_vm0, %v81_v7, %v80_v6  ;;  %v86_v11 = vld [vmem:[%s196_s0 + $0x3] ss:$8 sm:$0xf]   ;;  %v43_v12 = vsel %vm4_vm0, %v85_v10, %v84_v9  ;;  %s101_s28 = smov 48   ;;  %s102_s4 = smov 32   ;;  %vm36_vm4 = vcmask 392512  }
   0x6   :  { %v87_v13 = vld [vmem:[%s196_s0 + $0x3] ss:$8 sm:$0xf0]   ;;  %v88_v14 = vld [vmem:[%s196_s0 + $0x2] ss:$8 sm:$0xf]  }
   0x7   :  { %v89_v15 = vld [vmem:[%s196_s0 + $0x2] ss:$8 sm:$0xf0]   ;;  %v53_v16 = vsel %vm4_vm0, %v87_v13, %v86_v11  ;;  %v90_v17 = vld [vmem:[%s196_s0 + $0x1] ss:$8 sm:$0xf]  }
   0x8   :  { %24 = vrot.lane.b32.xlu0 %v23_v8, %s101_s28  ;;  %44 = vrot.lane.b32.xlu1 %v43_v12, %s102_s4  ;;  %v63_v18 = vsel %vm4_vm0, %v89_v15, %v88_v14  ;;  %v91_v19 = vld [vmem:[%s196_s0 + $0x1] ss:$8 sm:$0xf0]   ;;  %v2_v20 = vld [vmem:[%s196_s0] ss:$8 sm:$0xf]  }
   0x9   :  { %v3_v21 = vld [vmem:[%s196_s0] ss:$8 sm:$0xf0]   ;;  %s103_s0 = smov 24   ;;  %s104_s13 = smov 16   ;;  %v73_v23 = vsel %vm4_vm0, %v91_v19, %v90_v17  ;;  %vm46_vm5 = vcmask 326912  }
   0xa   :  { %v5_v22 = vsel %vm4_vm0, %v3_v21, %v2_v20  ;;  %s105_s16 = smov 8   ;;  %vm56_vm6 = vcmask 261312   ;;  %vm66_vm7 = vcmask 195712   ;;  %vm76_vm8 = vcmask 130112  }
   0xb   :  { %7 = vst.msk [vmem:[%s197_s1] sm:$0xff] %vm6_vm1, %v5_v22  }
   0xc   :  { %54 = vrot.lane.b32.xlu0 %v53_v16, %s103_s0  ;;  %64 = vrot.lane.b32.xlu1 %v63_v18, %s104_s13 }
  0x10   :  { %74 = vrot.lane.b32.xlu0 %v73_v23, %s105_s16 }
  0x76   :  { %v15_v24 = vpop.permute.xlu0 %14   ;;  %v35_v25 = vpop.permute.xlu1 %34  }
  0x77   :  { %17 = vst.msk [vmem:[%s197_s1] sm:$0xff] %vm16_vm2, %v15_v24  }
  0x7a   :  { %v25_v26 = vpop.permute.xlu0 %24   ;;  %v45_v27 = vpop.permute.xlu1 %44  }
  0x7b   :  { %27 = vst.msk [vmem:[%s197_s1] sm:$0xff] %vm26_vm3, %v25_v26  }
  0x7c   :  { %37 = vst.msk [vmem:[%s197_s1] sm:$0xff] %vm36_vm4, %v35_v25  }
  0x7d   :  { %47 = vst.msk [vmem:[%s197_s1] sm:$0xff] %vm46_vm5, %v45_v27  }
  0x7e   :  { %v55_v28 = vpop.permute.xlu0 %54   ;;  %v65_v29 = vpop.permute.xlu1 %64  }
  0x7f   :  { %57 = vst.msk [vmem:[%s197_s1] sm:$0xff] %vm56_vm6, %v55_v28  }
  0x80   :  { %67 = vst.msk [vmem:[%s197_s1] sm:$0xff] %vm66_vm7, %v65_v29  }
  0x82   :  { %v75_v30 = vpop.permute.xlu0 %74  }
  0x83   :  { %77 = vst.msk [vmem:[%s197_s1] sm:$0xff] %vm76_vm8, %v75_v30  }

// kernel: plan_spatial_causal_decoder_forward.1
= control target key start
LH: loop header
LB: loop body
LE: loop exit
PB: predicated region body
PF: predicated region fallthrough
CT: control target
= control target key end

     0   :  { %s7025_s0 = inlined_call_operand.vmem [shape: f32[16,64], index: 0, kind: input, shape index: {}]   ;;  %s7026_s1 = inlined_call_operand.vmem [shape: f32[16,64], index: 1, kind: input, shape index: {}]   ;;  %s7027_s2 = inlined_call_operand.vmem [shape: f32[64,64], index: 2, kind: input, shape index: {}, may-alias: {2,3,5,6}]   ;;  %s7028_s3 = inlined_call_operand.vmem [shape: f32[64,64], index: 3, kind: input, shape index: {}, may-alias: {2,3,5,6}]   ;;  %s7029_s4 = inlined_call_operand.vmem [shape: f32[8,64], index: 4, kind: input, shape index: {}]   ;;  %s7030_s5 = inlined_call_operand.vmem [shape: f32[64,64], index: 5, kind: input, shape index: {}, may-alias: {2,3,5,6}]   ;;  %s7031_s6 = inlined_call_operand.vmem [shape: f32[64,64], index: 6, kind: input, shape index: {}, may-alias: {2,3,5,6}]   ;;  %s7032_s7 = inlined_call_operand.vmem [shape: bf16[2,64,192], index: 7, kind: input, shape index: {}]   ;;  %s7033_s8 = inlined_call_operand.vmem [shape: bf16[2,64,64], index: 8, kind: input, shape index: {}]   ;;  %s7034_s9 = inlined_call_operand.vmem [shape: bf16[2,64,64], index: 9, kind: input, shape index: {}]   ;;  %s7035_s10 = inlined_call_operand.vmem [shape: bf16[2,64,128], index: 10, kind: input, shape index: {}]   ;;  %s7036_s11 = inlined_call_operand.vmem [shape: bf16[2,64,64], index: 11, kind: input, shape index: {}]   ;;  %s7037_s12 = inlined_call_operand.vmem [shape: bf16[2,64,2048], index: 12, kind: input, shape index: {}]   ;;  %s7038_s13 = inlined_call_operand.vmem [shape: bf16[2,2048,64], index: 13, kind: input, shape index: {}]   ;;  %s7039_s14 = inlined_call_operand.vmem [shape: f32[2,16,64], index: 14, kind: input, shape index: {}]   ;;  %s7040_s15 = inlined_call_operand.vmem [shape: f32[2,1,2048], index: 15, kind: input, shape index: {}]   ;;  %s7041_s16 = inlined_call_operand.vmem [shape: s32[16,1], index: 16, kind: input, shape index: {}]   ;;  %s7042_s17 = inlined_call_operand.vmem [shape: f32[16,3], index: 17, kind: input, shape index: {}]   ;;  %s7043_s18 = inlined_call_operand.vmem [shape: f32[16,12], index: 18, kind: input, shape index: {}]   ;;  %s7044_s19 = inlined_call_operand.vmem [shape: bf16[64,27], index: 19, kind: input, shape index: {}]   ;;  %s7045_s20 = inlined_call_operand.vmem [shape: f32[1,27], index: 20, kind: input, shape index: {}]   ;;  %s7046_s21 = inlined_call_operand.vmem [shape: f32[5], index: 21, kind: output, shape index: {}]  }
   0x1   :  { %7057 = sst [smem:[#allocation7_spill]] %s7025_s0 }
   0x2   :  { %7058 = sst [smem:[#allocation8_spill]] %s7026_s1 }
   0x3   :  { %7059 = sst [smem:[#allocation9_spill]] %s7027_s2 }
   0x4   :  { %7060 = sst [smem:[#allocation10_spill]] %s7028_s3 }
   0x5   :  { %7061 = sst [smem:[#allocation11_spill]] %s7029_s4 }
   0x6   :  { %7062 = sst [smem:[#allocation12_spill]] %s7030_s5 }
   0x7   :  { %7063 = sst [smem:[#allocation13_spill]] %s7032_s7 }
   0x8   :  { %7064 = sst [smem:[#allocation14_spill]] %s7033_s8 }
   0x9   :  { %7065 = sst [smem:[#allocation15_spill]] %s7034_s9 }
   0xa   :  { %7066 = sst [smem:[#allocation16_spill]] %s7035_s10 }
   0xb   :  { %7067 = sst [smem:[#allocation17_spill]] %s7042_s17 }
   0xc   :  { %7068 = sst [smem:[#allocation18_spill]] %s7043_s18 }
   0xd   :  { %7069 = sst [smem:[#allocation19_spill]] %s7046_s21 }
   0xe   :  { %26 = vsyncpa [#allocation4], 0  ;;  %s6101_s2 = smov 0  }
   0xf LB: > { %7070 = sst [smem:[#allocation6_spill]] %s5976_s2  ;;  %s6107_s25 = sadd.s32 4294967295, %s5976_s2   ;;  %s5976_s2 = sphi %s6101_s2, %s32_s2  }
  0x10   : > { %p4927_p0 = scmp.ge.s32.totalorder %s5976_s2, 1  ;;  %p662_p1 = scmp.lt.s32.totalorder %s5976_s2, 3 }
  0x12   : > { %p663_p2 = pnand %p4927_p0, %p662_p1 }
  0x13   : > { %p756_p3 = scmp.lt.s32.totalorder (!%p663_p2), %s6107_s25, 1  ;;  %s7071_s7 = sld [smem:[#allocation13_spill]] (!%p663_p2) }
  0x14   : > { %666 = sbr.rel (%p663_p2) target bundleno = 5166 (0x142e), region = 104  ;;  %s7072_s8 = sld [smem:[#allocation14_spill]] (!%p663_p2) }
  0x15   : > { %s7073_s9 = sld [smem:[#allocation15_spill]] (!%p663_p2)  ;;  %s7074_s10 = sld [smem:[#allocation16_spill]] (!%p663_p2) }
  0x16   : > { %p4945_p4 = scmp.ne.s32.totalorder (!%p663_p2), %s6107_s25, 0 }
  0x1b   : > { %s757_s26 = scalar_select %p756_p3, %s6107_s25, 1 }
  0x1c   : > { %s7075_s4 = sld [smem:[#allocation7_spill]] (!%p4945_p4)  ;;  %vm807_vm0 = vcmask (!%p4945_p4), 523264  }
  0x1d   : > { %s5198_s27 = sshll.u32 %s757_s26, 6  ;;  %s5199_s3 = sshll.u32 %s757_s26, 5 }
  0x1e   : > { %s6116_s0 = scalar_lea.vmem %s7071_s7, %s5198_s27  ;;  %s6121_s5 = scalar_lea.vmem %s7072_s8, %s5199_s3 }
  0x1f   : > { %s6126_s1 = scalar_lea.vmem %s7073_s9, %s5199_s3  ;;  %s6131_s21 = scalar_lea.vmem %s7074_s10, %s5199_s3 }
  0x20   : > { %s6136_s27 = scalar_lea.vmem %s7036_s11, %s5199_s3  ;;  %s5203_s28 = sshll.u32 %s757_s26, 9 }
  0x21   : > { %s6141_s30 = scalar_lea.vmem %s7037_s12, %s5203_s28  ;;  %s5204_s7 = sshll.u32 %s757_s26, 10 }
  0x22   : > { %s6146_s8 = scalar_lea.vmem %s7038_s13, %s5204_s7  ;;  %s5205_s2 = sshll.u32 %s757_s26, 4  ;;  %v805_v0 = vld [vmem:[%s7075_s4] sm:$0xff] (!%p4945_p4)  ;;  %v806_v1 = vld [vmem:[%s7075_s4 + $0x8] sm:$0xff] (!%p4945_p4) }
  0x23   : > { %s6151_s10 = scalar_lea.vmem %s7039_s14, %s5205_s2  ;;  %s6156_s3 = scalar_lea.vmem %s7040_s15, %s5205_s2  ;;  %808 = vst.msk [vmem:[#allocation2] sm:$0xff] (!%p4945_p4), %vm807_vm0, %v805_v0  ;;  %809 = vst.msk [vmem:[#allocation2 + $0x8] sm:$0xff] (!%p4945_p4), %vm807_vm0, %v806_v1 }
  0x24   : > { %804 = sbr.rel (%p4945_p4) target bundleno = 43 (0x2b), region = 108 }
  0x2b PF: > { %v5730_v2 = vld [vmem:[%s6116_s0 + $0x4] ss:$8 sps:$4 sm:$0xff]   ;;  %v912_v3 = vlaneseq  ;;  %v5732_v4 = vld [vmem:[%s6116_s0] ss:$8 sps:$4 sm:$0xff]   ;;  %v5978_v5 = vmov 0   ;;  %s7076_s23 = sld [smem:[#allocation9_spill]] }
  0x2c   : > { %901 = vmatprep.mubr.bf16.mxu0 %v5978_v5  ;;  %869 = vmatprep.subr.bf16.mxu0 %v5730_v2  ;;  %v5733_v6 = vld [vmem:[%s6116_s0 + $0x14] ss:$8 sps:$4 sm:$0xff]   ;;  %v5735_v8 = vld [vmem:[%s6116_s0 + $0x10] ss:$8 sps:$4 sm:$0xff]   ;;  %v5736_v9 = vld [vmem:[%s6116_s0 + $0x24] ss:$8 sps:$4 sm:$0xff]  }
  0x2d   : > { %v6170_v7 = vshrl.u32 %v912_v3, 7  ;;  %870 = vmatpush1.bf16.msra.mxu0 %v5732_v4  ;;  %v6178_v11 = vld [vmem:[%s6151_s10] sm:$0xff]  ;;  %s7055_s2 = smov 64   ;;  %v5739_v15 = vld [vmem:[%s6116_s0 + $0x34] ss:$8 sps:$4 sm:$0xff]   ;;  %vm865_vm1 = vcmask 523264  }
  0x2e   : > { %871 = vmatprep.subr.bf16.mxu0 %v5733_v6  ;;  %v5738_v13 = vld [vmem:[%s6116_s0 + $0x20] ss:$8 sps:$4 sm:$0xff]   ;;  %v5741_v18 = vld [vmem:[%s6116_s0 + $0x30] ss:$8 sps:$4 sm:$0xff]   ;;  %v5980_v30 = vmov 0.0   ;;  %vm5981_vm2 = vmmov 0  }
  0x2f   : > { %v6175_v10 = vsub.s32 1, %v6170_v7  ;;  %v810_v19 = vld [vmem:[#allocation2] sm:$0xff]  ;;  %v811_v20 = vld [vmem:[#allocation2 + $0x8] sm:$0xff]  ;;  %5467 = vmatprep.subr.bf16.mxu1 %v5980_v30  ;;  %v6246_v31 = vsub.s32 2, %v6170_v7  ;;  %5475 = vmatprep.mubr.msk.bf16.mxu1 %vm5981_vm2, %v5980_v30  ;;  %s7077_s26 = sld [smem:[#allocation11_spill]]  ;;  %s7078_s22 = sld [smem:[#allocation12_spill]] }
  0x30   : > { %v816_v23 = vpack.c.bf16 %v811_v20, %v810_v19  ;;  %s7079_s29 = sld [smem:[#allocation8_spill]]  ;;  %s7080_s0 = sld [smem:[#allocation10_spill]] }
  0x31   : > { %v6183_v12 = vld [vmem:[%s7076_s23 + $0x8] sm:$0xff]  ;;  %872 = vmatpush1.bf16.msra.mxu0 %v5735_v8  ;;  %v921_v14 = vrot.slane %v6178_v11, %v6175_v10  ;;  %v6194_v16 = vld [vmem:[%s7076_s23] sm:$0xff]  ;;  %v6199_v17 = vld [vmem:[%s7076_s23 + $0x10] sm:$0xff]  ;;  %v6255_v37 = vrot.slane %v6178_v11, %v6246_v31  ;;  %s7081_s7 = smov 64   ;;  %p5187_p5 = scmp.ne.s32.totalorder %s6107_s25, 1 }
  0x32   : > { %963 = vrot.lane.b32.xlu1 %v6183_v12, %s7055_s2  ;;  %873 = vmatprep.subr.bf16.mxu0 %v5736_v9  ;;  %v6206_v21 = vld [vmem:[%s7076_s23 + $0x20] sm:$0xff]  ;;  %v6213_v22 = vld [vmem:[%s7076_s23 + $0x18] sm:$0xff]  ;;  %v6220_v24 = vld [vmem:[%s7076_s23 + $0x30] sm:$0xff]  ;;  %vm5983_vm3 = vmmov (!%p5187_p5), 0   ;;  %vm4566_vm4 = vcmask (!%p5187_p5), 97280   ;;  %s5988_s9 = smov (!%p5187_p5), 103  }
  0x33   : > { %923 = vrot.lane.b32.xlu0 %v921_v14, %s7055_s2  ;;  %v6227_v25 = vld [vmem:[%s7076_s23 + $0x28] sm:$0xff]  ;;  %v6237_v26 = vld [vmem:[%s7076_s23 + $0x38] sm:$0xff]  ;;  %vm4601_vm7 = vcmask (!%p5187_p5), 7168   ;;  %s7083_s18 = sld [smem:[#allocation18_spill]] (!%p5187_p5) }
  0x35   : > { %874 = vmatpush1.bf16.msra.mxu0 %v5738_v13 }
  0x36   : > { %965 = vrot.lane.b32.xlu1 %v6199_v17, %s7055_s2  ;;  %875 = vmatprep.subr.bf16.mxu0 %v5739_v15 }
  0x37   : > { %961 = vrot.lane.b32.xlu0 %v6194_v16, %s7055_s2 }
  0x39   : > { %876 = vmatpush1.bf16.msra.mxu0 %v5741_v18 }
  0x3a   : > { %969 = vrot.lane.b32.xlu1 %v6206_v21, %s7055_s2  ;;  %5479 = vmatprep.subr.bf16.mxu0 %v5980_v30 }
  0x3b   : > { %967 = vrot.lane.b32.xlu0 %v6213_v22, %s7055_s2 }
  0x3c   : > { %4954 = vmatmul.mubr.msk.bf16.vlgmr.msra.gmra.mrb[0].mxu0 %vm865_vm1, %v816_v23 }
  0x3d   : > { %5487 = vmatprep.mubr.msk.bf16.mxu0 %vm5981_vm2, %v5980_v30 }
  0x3e   : > { %973 = vrot.lane.b32.xlu1 %v6220_v24, %s7055_s2 }
  0x3f   : > { %971 = vrot.lane.b32.xlu0 %v6227_v25, %s7055_s2 }
  0x43   : > { %975 = vrot.lane.b32.xlu0 %v6237_v26, %s7055_s2 }
  0xa4   : > { %v964_v28 = vpop.permute.xlu1 %963 }
  0xa5   : > { %v924_v27 = vpop.permute.xlu0 %923 }
  0xa8   : > { %v966_v32 = vpop.permute.xlu1 %965 }
  0xa9   : > { %v962_v29 = vpop.permute.xlu0 %961 }
  0xac   : > { %v970_v44 = vpop.permute.xlu1 %969 }
  0xad   : > { %v968_v33 = vpop.permute.xlu0 %967 }
  0xb0   : > { %v974_v57 = vpop.permute.xlu1 %973 }
  0xb1   : > { %v972_v45 = vpop.permute.xlu0 %971 }
  0xb5   : > { %v976_v58 = vpop.permute.xlu0 %975 }
 0x10f   : > { %v6248_v34 = vpop.f32.mrb[0].mxu0 }
 0x110   : > { %v926_v35 = vadd.f32 %v924_v27, %v6248_v34  ;;  %v6251_v36 = vpop.f32.mrb[1].mxu0 }
 0x111   : > { %v6257_v38 = vpop.f32.mrb[2].mxu0 }
 0x112   : > { %v909_v39 = vpop.f32.mrb[3].mxu0  ;;  %v927_v40 = vadd.f32 %v924_v27, %v6257_v38  ;;  %v985_v42 = vmul.f32 %v962_v29, %v926_v35  ;;  %v986_v43 = vmul.f32 %v964_v28, %v926_v35  ;;  %v987_v46 = vmul.f32 %v966_v32, %v926_v35 }
 0x113   : > { %v6261_v41 = vadd.f32 %v6255_v37, %v909_v39  ;;  %v988_v50 = vmul.f32 %v968_v33, %v926_v35  ;;  %v989_v55 = vmul.f32 %v970_v44, %v926_v35  ;;  %v990_v56 = vmul.f32 %v972_v45, %v926_v35 }
 0x114   : > { %v1001_v47 = vpack.c.bf16 %v986_v43, %v985_v42  ;;  %v993_v48 = vmul.f32 %v962_v29, %v927_v40  ;;  %v994_v49 = vmul.f32 %v964_v28, %v927_v40  ;;  %v995_v52 = vmul.f32 %v966_v32, %v927_v40 }
 0x115   : > { %v996_v53 = vmul.f32 %v968_v33, %v927_v40  ;;  %v1002_v54 = vpack.c.bf16 %v988_v50, %v987_v46  ;;  %v997_v60 = vmul.f32 %v970_v44, %v927_v40  ;;  %v998_v61 = vmul.f32 %v972_v45, %v927_v40 }
 0x116   : > { %1037 = vrot.lane.b32.xlu1 %v1001_v47, %s7055_s2  ;;  %v1005_v51 = vpack.c.bf16 %v994_v49, %v993_v48  ;;  %v991_v62 = vmul.f32 %v974_v57, %v926_v35  ;;  %v992_v63 = vmul.f32 %v976_v58, %v926_v35  ;;  %v1003_v0 = vpack.c.bf16 %v990_v56, %v989_v55 }
 0x117   : > { %v1006_v59 = vpack.c.bf16 %v996_v53, %v995_v52  ;;  %v1007_v1 = vpack.c.bf16 %v998_v61, %v997_v60  ;;  %v999_v2 = vmul.f32 %v974_v57, %v927_v40  ;;  %v1000_v4 = vmul.f32 %v976_v58, %v927_v40  ;;  %v950_v57 = vld [vmem:[%s7077_s26] sm:$0xff] }
 0x118   : > { %1104 = vrot.lane.b32.xlu0 %v1005_v51, %s7055_s2  ;;  %v1004_v6 = vpack.c.bf16 %v992_v63, %v991_v62  ;;  %v6285_v32 = vsub.s32 0, %v6170_v7  ;;  %v932_v43 = vadd.f32 %v6255_v37, %v6251_v36 }
 0x119   : > { %v1008_v8 = vpack.c.bf16 %v1000_v4, %v999_v2 }
 0x11a   : > { %1039 = vrot.lane.b32.xlu1 %v1002_v54, %s7055_s2  ;;  %v915_v39 = vrot.slane %v6178_v11, %v6285_v32  ;;  %v1009_v47 = vmul.f32 %v6194_v16, %v932_v43  ;;  %v1010_v11 = vmul.f32 %v6183_v12, %v932_v43  ;;  %v1011_v36 = vmul.f32 %v6199_v17, %v932_v43 }
 0x11b   : > { %v1014_v51 = vmul.f32 %v6227_v25, %v932_v43  ;;  %v1015_v53 = vmul.f32 %v6220_v24, %v932_v43  ;;  %v1016_v54 = vmul.f32 %v6237_v26, %v932_v43 }
 0x11c   : > { %1106 = vrot.lane.b32.xlu0 %v1006_v59, %s7055_s2  ;;  %v916_v44 = vadd.f32 %v915_v39, %v6248_v34  ;;  %v917_v46 = vadd.f32 %v915_v39, %v6257_v38  ;;  %v1025_v50 = vpack.c.bf16 %v1010_v11, %v1009_v47  ;;  %v1012_v34 = vmul.f32 %v6213_v22, %v932_v43 }
 0x11d   : > { %v1013_v38 = vmul.f32 %v6206_v21, %v932_v43  ;;  %v1028_v55 = vpack.c.bf16 %v1016_v54, %v1015_v53  ;;  %v1018_v47 = vmul.f32 %v6183_v12, %v6261_v41 }
 0x11e   : > { %1041 = vrot.lane.b32.xlu1 %v1003_v0, %s7055_s2  ;;  %v951_v48 = vpack.c.bf16 %v916_v44, %v916_v44  ;;  %v952_v49 = vpack.c.bf16 %v917_v46, %v917_v46  ;;  %v1026_v37 = vpack.c.bf16 %v1012_v34, %v1011_v36  ;;  %v1017_v46 = vmul.f32 %v6194_v16, %v6261_v41 }
 0x11f   : > { %v1027_v52 = vpack.c.bf16 %v1014_v51, %v1013_v38  ;;  %v1020_v36 = vmul.f32 %v6213_v22, %v6261_v41  ;;  %v1021_v16 = vmul.f32 %v6206_v21, %v6261_v41  ;;  %v1022_v34 = vmul.f32 %v6227_v25, %v6261_v41 }
 0x120   : > { %1108 = vrot.lane.b32.xlu0 %v1007_v1, %s7055_s2  ;;  %v1023_v22 = vmul.f32 %v6220_v24, %v6261_v41 }
 0x122   : > { %1043 = vrot.lane.b32.xlu1 %v1004_v6, %s7055_s2 }
 0x124   : > { %1110 = vrot.lane.b32.xlu0 %v1008_v8, %s7055_s2 }
 0x188   : > { %v1038_v9 = vpop.permute.xlu1 %1037 }
 0x189   : > { %v1049_v13 = vsel %vm865_vm1, %v1038_v9, 0 }
 0x18a   : > { %5468 = vmatpush3.bf16.xpose.msra.mxu1 %v1049_v13  ;;  %v1105_v14 = vpop.permute.xlu0 %1104  ;;  %v942_v13 = vld [vmem:[%s7078_s22] sm:$0xff] }
 0x18b   : > { %v1116_v15 = vsel %vm865_vm1, %v1105_v14, 0  ;;  %5469 = vmatprep.subr.bf16.mxu1 %v5980_v30  ;;  %v943_v14 = vld [vmem:[%s7078_s22 + $0x8] sm:$0xff] }
 0x18c   : > { %5480 = vmatpush3.bf16.xpose.msra.mxu0 %v1116_v15  ;;  %v1040_v18 = vpop.permute.xlu1 %1039  ;;  %v5661_v15 = vpack.c.bf16 %v943_v14, %v942_v13 }
 0x18d   : > { %5481 = vmatprep.subr.bf16.mxu0 %v5980_v30  ;;  %v1052_v20 = vsel %vm865_vm1, %v1040_v18, 0  ;;  %v944_v18 = vld [vmem:[%s7078_s22 + $0x10] sm:$0xff] }
 0x18e   : > { %v1107_v19 = vpop.permute.xlu0 %1106 }
 0x18f   : > { %v1119_v23 = vsel %vm865_vm1, %v1107_v19, 0  ;;  %v945_v19 = vld [vmem:[%s7078_s22 + $0x18] sm:$0xff] }
 0x190   : > { %v1042_v27 = vpop.permute.xlu1 %1041 }
 0x191   : > { %v1055_v29 = vsel %vm865_vm1, %v1042_v27, 0  ;;  %v947_v27 = vld [vmem:[%s7078_s22 + $0x28] sm:$0xff] }
 0x192   : > { %5470 = vmatpush3.bf16.xpose.msra.mxu1 %v1052_v20  ;;  %v1109_v28 = vpop.permute.xlu0 %1108  ;;  %v946_v20 = vld [vmem:[%s7078_s22 + $0x20] sm:$0xff] }
 0x193   : > { %5471 = vmatprep.subr.bf16.mxu1 %v5980_v30  ;;  %v1122_v33 = vsel %vm865_vm1, %v1109_v28, 0  ;;  %v5669_v28 = vpack.c.bf16 %v947_v27, %v946_v20  ;;  %v5915_v27 = vld [vmem:[#allocation2] sm:$0xff] }
 0x194   : > { %5482 = vmatpush3.bf16.xpose.msra.mxu0 %v1119_v23  ;;  %v1044_v35 = vpop.permute.xlu1 %1043  ;;  %v5665_v23 = vpack.c.bf16 %v945_v19, %v944_v18 }
 0x195   : > { %5483 = vmatprep.subr.bf16.mxu0 %v5980_v30  ;;  %v1058_v42 = vsel %vm865_vm1, %v1044_v35, 0 }
 0x196   : > { %v1111_v40 = vpop.permute.xlu0 %1110 }
 0x197   : > { %v1125_v45 = vsel %vm865_vm1, %v1111_v40, 0 }
 0x19a   : > { %5472 = vmatpush3.bf16.xpose.msra.mxu1 %v1055_v29  ;;  %v948_v29 = vld [vmem:[%s7078_s22 + $0x30] sm:$0xff] }
 0x19b   : > { %5473 = vmatprep.subr.bf16.mxu1 %v5980_v30 }
 0x19c   : > { %5484 = vmatpush3.bf16.xpose.msra.mxu0 %v1122_v33  ;;  %v949_v33 = vld [vmem:[%s7078_s22 + $0x38] sm:$0xff] }
 0x19d   : > { %5485 = vmatprep.subr.bf16.mxu0 %v5980_v30  ;;  %v5673_v35 = vpack.c.bf16 %v949_v33, %v948_v29  ;;  %v5916_v33 = vld [vmem:[#allocation2 + $0x8] sm:$0xff] }
 0x1a2   : > { %5474 = vmatpush3.bf16.xpose.msra.mxu1 %v1058_v42 }
 0x1a3   : > { %5662 = vmatprep.subr.bf16.mxu1 %v5661_v15 }
 0x1a4   : > { %5486 = vmatpush3.bf16.xpose.msra.mxu0 %v1125_v45 }
 0x1a5   : > { %5510 = vmatprep.subr.bf16.mxu0 %v5980_v30 }
 0x1a9   : > { %5476 = vmatmul.mubr.msk.bf16.vlgmr.msra.gmra.mrb[0].mxu1 %vm865_vm1, %v951_v48 }
 0x1aa   : > { %5664 = vmatpush3.bf16.msra.mxu1 %v5661_v15 }
 0x1ab   : > { %5488 = vmatmul.mubr.msk.bf16.vlgmr.msra.gmra.mrb[4].mxu0 %vm865_vm1, %v952_v49  ;;  %5666 = vmatprep.subr.bf16.mxu1 %v5665_v23  ;;  %v1029_v49 = vpack.c.bf16 %v1018_v47, %v1017_v46  ;;  %v813_v46 = vld [vmem:[%s7079_s29 + $0x8] sm:$0xff] }
 0x1ac   : > { %5511 = vmatpush3.bf16.msra.mxu0 %v1025_v50  ;;  %5518 = vmatprep.mubr.msk.bf16.mxu0 %vm5981_vm2, %v5980_v30  ;;  %v1019_v50 = vmul.f32 %v6199_v17, %v6261_v41  ;;  %v1031_v17 = vpack.c.bf16 %v1022_v34, %v1021_v16 }
 0x1ad   : > { %5512 = vmatprep.subr.bf16.mxu0 %v5980_v30 }
 0x1ae   : > { %5668 = vmatpush3.bf16.msra.mxu1 %v5665_v23  ;;  %v1030_v12 = vpack.c.bf16 %v1020_v36, %v1019_v50 }
 0x1af   : > { %5670 = vmatprep.subr.bf16.mxu1 %v5669_v28 }
 0x1b0   : > { %5513 = vmatpush3.bf16.msra.mxu0 %v1026_v37  ;;  %v1024_v37 = vmul.f32 %v6237_v26, %v6261_v41 }
 0x1b1   : > { %5514 = vmatprep.subr.bf16.mxu0 %v5980_v30 }
 0x1b2   : > { %5672 = vmatpush3.bf16.msra.mxu1 %v5669_v28  ;;  %v1032_v38 = vpack.c.bf16 %v1024_v37, %v1023_v22  ;;  %v5750_v37 = vld [vmem:[%s6126_s1] sm:$0xff]  }
 0x1b3   : > { %5674 = vmatprep.subr.bf16.mxu1 %v5673_v35 }
 0x1b4   : > { %5515 = vmatpush3.bf16.msra.mxu0 %v1027_v52 }
 0x1b5   : > { %5516 = vmatprep.subr.bf16.mxu0 %v5980_v30 }
 0x1b6   : > { %5676 = vmatpush3.bf16.msra.mxu1 %v5673_v35 }
 0x1b7   : > { %5522 = vmatprep.subr.bf16.mxu1 %v5980_v30 }
 0x1b8   : > { %5517 = vmatpush3.bf16.msra.mxu0 %v1028_v55  ;;  %v5742_v55 = vld [vmem:[%s6121_s5] sm:$0xff]  }
 0x1b9   : > { %5534 = vmatprep.subr.bf16.mxu0 %v5980_v30 }
 0x27c   : > { %v1094_v56 = vpop.f32.mrb[0].mxu1 }
 0x27d   : > { %v1167_v58 = vmul.f32 0.35355338, %v1094_v56  ;;  %v5477_v59 = vpop.f32.mrb[1].mxu1 }
 0x27e   : > { %v1097_v60 = vpop.f32.mrb[2].mxu1  ;;  %v1161_v61 = vpop.f32.mrb[4].mxu0  ;;  %v5745_v59 = vld [vmem:[%s6121_s5 + $0x18] sm:$0xff]  }
 0x27f   : > { %v1168_v62 = vmul.f32 0.35355338, %v1161_v61  ;;  %v5478_v63 = vpop.f32.mrb[3].mxu1  ;;  %v5489_v0 = vpop.f32.mrb[5].mxu0  ;;  %v1169_v1 = vadd.f32 %v1167_v58, %v950_v57  ;;  %v5744_v58 = vld [vmem:[%s6121_s5 + $0x10] sm:$0xff]  }
 0x280   : > { %v1164_v2 = vpop.f32.mrb[6].mxu0 }
 0x281   : > { %v5490_v4 = vpop.f32.mrb[7].mxu0  ;;  %v1171_v6 = vsel %vm865_vm1, %v1169_v1, -inf  ;;  %v1170_v8 = vadd.f32 %v1168_v62, %v950_v57  ;;  %v5743_v57 = vld [vmem:[%s6121_s5 + $0x8] sm:$0xff]   ;;  %s5985_s5 = smov (!%p5187_p5), 116  }
 0x282   : > { %1172 = vmax.xlane.f32.xlu1 %v1171_v6 }
 0x283   : > { %v1174_v9 = vsel %vm865_vm1, %v1170_v8, -inf }
 0x284   : > { %1175 = vmax.xlane.f32.xlu0 %v1174_v9  ;;  %v6390_v9 = vld [vmem:[%s6151_s10] sm:$0xff] }
 0x30f   : > { %v1173_v39 = vpop.xlane.xlu1 %1172 }
 0x310   : > { %v1177_v40 = vsub.f32 %v1169_v1, %v1173_v39 }
 0x311   : > { %v1176_v42 = vpop.xlane.xlu0 %1175 }
 0x312   : > { %v1179_v43 = vmul.f32 1.442695, %v1177_v40  ;;  %v1178_v44 = vsub.f32 %v1170_v8, %v1176_v42  ;;  %v6387_v8 = vsub.s32 3, %v6170_v7  ;;  %v5746_v40 = vld [vmem:[%s6131_s21] sm:$0xff]   ;;  %v5747_v42 = vld [vmem:[%s6131_s21 + $0x8] sm:$0xff]  }
 0x314   : > { %5886 = vpow2.f32 %v1179_v43  ;;  %v1181_v45 = vmul.f32 1.442695, %v1178_v44  ;;  %v1370_v13 = vrot.slane %v6390_v9, %v6387_v8  ;;  %v5748_v43 = vld [vmem:[%s6131_s21 + $0x10] sm:$0xff]   ;;  %v5749_v44 = vld [vmem:[%s6131_s21 + $0x18] sm:$0xff]  }
 0x316   : > { %5888 = vpow2.f32 %v1181_v45  ;;  %v812_v45 = vld [vmem:[%s7079_s29] sm:$0xff] }
 0x317   : > { %v1561_v47 = vpack.c.bf16 %v813_v46, %v812_v45 }
 0x31e   : > { %v5887_v11 = vpop.eup %5886 }
 0x31f   : > { %5507 = vmatprep.mubr.msk.f32.mxu1 %vm865_vm1, %v5887_v11 }
 0x320   : > { %v5889_v48 = vpop.eup %5888 }
 0x321   : > { %5508 = vmatmul.mubr.msk.f32.vlgmr.msra.gmra.mrb[4].mxu1 %vm865_vm1, %v5889_v48 }
 0x322   : > { %5523 = vmatpush3.bf16.msra.mxu1 %v1029_v49  ;;  %5530 = vmatprep.mubr.msk.bf16.mxu1 %vm5981_vm2, %v5980_v30 }
 0x323   : > { %5524 = vmatprep.subr.bf16.mxu1 %v5980_v30 }
 0x326   : > { %5525 = vmatpush3.bf16.msra.mxu1 %v1030_v12 }
 0x327   : > { %5526 = vmatprep.subr.bf16.mxu1 %v5980_v30 }
 0x32a   : > { %5527 = vmatpush3.bf16.msra.mxu1 %v1031_v17 }
 0x32b   : > { %5528 = vmatprep.subr.bf16.mxu1 %v5980_v30 }
 0x32e   : > { %5529 = vmatpush3.bf16.msra.mxu1 %v1032_v38  ;;  %v5751_v38 = vld [vmem:[%s6126_s1 + $0x8] sm:$0xff]  }
 0x32f   : > { %5546 = vmatprep.subr.bf16.mxu1 %v5980_v30 }
 0x3f4   : > { %v5509_v21 = vpop.f32.mrb[4].mxu1 }
 0x3f5   : > { %v1265_v25 = vmax.f32 %v5509_v21, 1e-30  ;;  %v1255_v51 = vpop.f32.mrb[5].mxu1  ;;  %v5752_v21 = vld [vmem:[%s6126_s1 + $0x10] sm:$0xff]  }
 0x3f6   : > { %v1264_v52 = vmax.f32 %v1255_v51, 1e-30  ;;  %v6432_v51 = vsub.s32 5, %v6170_v7 }
 0x3f7   : > { %5890 = vrcp.f32 %v1265_v25  ;;  %v5753_v25 = vld [vmem:[%s6126_s1 + $0x18] sm:$0xff]   ;;  %s5989_s1 = smov (!%p5187_p5), 102  }
 0x3f8   : > { %5892 = vrcp.f32 %v1264_v52  ;;  %v1641_v52 = vrot.slane %v6390_v9, %v6432_v51 }
 0x401   : > { %v5891_v24 = vpop.eup %5890 }
 0x402   : > { %v5893_v53 = vpop.eup %5892  ;;  %v1269_v54 = vmul.f32 %v5891_v24, %v5889_v48 }
 0x403   : > { %v1268_v26 = vmul.f32 %v5893_v53, %v5887_v11 }
 0x404   : > { %v1271_v41 = vpack.c.bf16 %v1269_v54, %v1269_v54 }
 0x405   : > { %v1270_v56 = vpack.c.bf16 %v1268_v26, %v1268_v26  ;;  %v6443_v26 = vld [vmem:[%s7080_s0] sm:$0xff] }
 0x406   : > { %5531 = vmatmul.mubr.msk.bf16.vlgmr.msra.gmra.mrb[8].mxu1 %vm865_vm1, %v1271_v41  ;;  %v6448_v41 = vld [vmem:[%s7080_s0 + $0x8] sm:$0xff] }
 0x407   : > { %5519 = vmatmul.mubr.msk.bf16.vlgmr.msra.gmra.mrb[8].mxu0 %vm865_vm1, %v1270_v56  ;;  %5554 = vmatprep.mubr.msk.bf16.mxu1 %vm5981_vm2, %v5980_v30 }
 0x408   : > { %5535 = vmatpush3.bf16.msra.mxu0 %v5742_v55  ;;  %5542 = vmatprep.mubr.msk.bf16.mxu0 %vm5981_vm2, %v5980_v30 }
 0x409   : > { %5536 = vmatprep.subr.bf16.mxu0 %v5980_v30  ;;  %5547 = vmatpush3.bf16.msra.mxu1 %v5750_v37 }
 0x40a   : > { %5548 = vmatprep.subr.bf16.mxu1 %v5980_v30 }
 0x40c   : > { %5537 = vmatpush3.bf16.msra.mxu0 %v5743_v57  ;;  %v6454_v57 = vld [vmem:[%s7080_s0 + $0x10] sm:$0xff] }
 0x40d   : > { %5538 = vmatprep.subr.bf16.mxu0 %v5980_v30  ;;  %5549 = vmatpush3.bf16.msra.mxu1 %v5751_v38 }
 0x40e   : > { %5550 = vmatprep.subr.bf16.mxu1 %v5980_v30 }
 0x410   : > { %5539 = vmatpush3.bf16.msra.mxu0 %v5744_v58  ;;  %v6459_v58 = vld [vmem:[%s7080_s0 + $0x18] sm:$0xff] }
 0x411   : > { %5540 = vmatprep.subr.bf16.mxu0 %v5980_v30  ;;  %5551 = vmatpush3.bf16.msra.mxu1 %v5752_v21 }
 0x412   : > { %5552 = vmatprep.subr.bf16.mxu1 %v5980_v30 }
 0x414   : > { %5541 = vmatpush3.bf16.msra.mxu0 %v5745_v59 }
 0x415   : > { %5558 = vmatprep.subr.bf16.mxu0 %v5980_v30  ;;  %5553 = vmatpush3.bf16.msra.mxu1 %v5753_v25 }
 0x416   : > { %5570 = vmatprep.subr.bf16.mxu1 %v5980_v30 }
 0x4d9   : > { %v1352_v60 = vpop.f32.mrb[8].mxu1 }
 0x4da   : > { %v1309_v61 = vpop.f32.mrb[8].mxu0  ;;  %v5532_v62 = vpop.f32.mrb[9].mxu1 }
 0x4db   : > { %v1358_v63 = vpack.c.bf16 %v1352_v60, %v1309_v61  ;;  %v5520_v0 = vpop.f32.mrb[9].mxu0  ;;  %v1355_v1 = vpop.f32.mrb[10].mxu1 }
 0x4dc   : > { %v1312_v2 = vpop.f32.mrb[10].mxu0  ;;  %v5533_v4 = vpop.f32.mrb[11].mxu1 }
 0x4dd   : > { %v5521_v6 = vpop.f32.mrb[11].mxu0  ;;  %5543 = vmatmul.mubr.msk.bf16.vlgmr.msra.gmra.mrb[12].mxu0 %vm865_vm1, %v1358_v63  ;;  %v6470_v2 = vld [vmem:[%s7080_s0 + $0x20] sm:$0xff]  ;;  %v6475_v4 = vld [vmem:[%s7080_s0 + $0x28] sm:$0xff] }
 0x4de   : > { %5566 = vmatprep.mubr.msk.bf16.mxu0 %vm5981_vm2, %v5980_v30  ;;  %5559 = vmatpush3.bf16.msra.mxu0 %v5746_v40 }
 0x4df   : > { %5560 = vmatprep.subr.bf16.mxu0 %v5980_v30 }
 0x4e2   : > { %5561 = vmatpush3.bf16.msra.mxu0 %v5747_v42 }
 0x4e3   : > { %5562 = vmatprep.subr.bf16.mxu0 %v5980_v30 }
 0x4e6   : > { %5563 = vmatpush3.bf16.msra.mxu0 %v5748_v43 }
 0x4e7   : > { %5564 = vmatprep.subr.bf16.mxu0 %v5980_v30 }
 0x4ea   : > { %5565 = vmatpush3.bf16.msra.mxu0 %v5749_v44  ;;  %v6498_v44 = vld [vmem:[%s6151_s10 + $0x8] sm:$0xff] }
 0x4eb   : > { %5582 = vmatprep.subr.bf16.mxu0 %v5980_v30  ;;  %v1471_v46 = vrot.slane %v6498_v44, %v6175_v10 }
 0x4ed   : > { %5567 = vmatmul.mubr.msk.bf16.vlgmr.msra.gmra.mrb[16].mxu0 %vm865_vm1, %v1561_v47 }
 0x4ee   : > { %5590 = vmatprep.mubr.msk.bf16.mxu0 %vm5981_vm2, %v5980_v30 }
 0x5b0   : > { %v1432_v14 = vpop.f32.mrb[12].mxu0 }
 0x5b1   : > { %v1433_v15 = vadd.f32 %v1432_v14, %v1370_v13  ;;  %v5544_v18 = vpop.f32.mrb[13].mxu0 }
 0x5b2   : > { %v1435_v19 = vpop.f32.mrb[14].mxu0  ;;  %v6484_v18 = vld [vmem:[%s7080_s0 + $0x30] sm:$0xff] }
 0x5b3   : > { %v1436_v20 = vadd.f32 %v1435_v19, %v1370_v13  ;;  %v5545_v23 = vpop.f32.mrb[15].mxu0  ;;  %v1439_v28 = vadd.f32 %v5915_v27, %v1433_v15  ;;  %v6489_v19 = vld [vmem:[%s7080_s0 + $0x38] sm:$0xff] }
 0x5b5   : > { %v1441_v29 = vsel %vm865_vm1, %v1439_v28, 0.0  ;;  %v1440_v35 = vadd.f32 %v5916_v33, %v1436_v20 }
 0x5b6   : > { %1442 = vadd.xlane.f32.xlu0 %v1441_v29 }
 0x5b7   : > { %v1444_v39 = vsel %vm865_vm1, %v1440_v35, 0.0 }
 0x5b8   : > { %1445 = vadd.xlane.f32.xlu1 %v1444_v39 }
 0x5c0   : > { %v6436_v24 = vpop.f32.mrb[16].mxu0 }
 0x5c1   : > { %v5568_v53 = vpop.f32.mrb[17].mxu0  ;;  %v1642_v45 = vadd.f32 %v1641_v52, %v6436_v24 }
 0x5c2   : > { %v6438_v54 = vpop.f32.mrb[18].mxu0 }
 0x5c3   : > { %v1643_v55 = vadd.f32 %v1641_v52, %v6438_v54  ;;  %v5569_v56 = vpop.f32.mrb[19].mxu0  ;;  %v1674_v52 = vmul.f32 %v6454_v57, %v1642_v45  ;;  %v1675_v53 = vmul.f32 %v6459_v58, %v1642_v45 }
 0x5c4   : > { %v1676_v56 = vmul.f32 %v6470_v2, %v1642_v45 }
 0x5c5   : > { %v1680_v59 = vmul.f32 %v6443_v26, %v1643_v55  ;;  %v1681_v60 = vmul.f32 %v6448_v41, %v1643_v55  ;;  %v1682_v62 = vmul.f32 %v6454_v57, %v1643_v55  ;;  %v1683_v63 = vmul.f32 %v6459_v58, %v1643_v55 }
 0x5c6   : > { %v1684_v13 = vmul.f32 %v6470_v2, %v1643_v55  ;;  %v1685_v14 = vmul.f32 %v6475_v4, %v1643_v55  ;;  %v1686_v23 = vmul.f32 %v6484_v18, %v1643_v55  ;;  %v1687_v27 = vmul.f32 %v6489_v19, %v1643_v55 }
 0x5c7   : > { %v1692_v61 = vpack.c.bf16 %v1681_v60, %v1680_v59  ;;  %v1693_v1 = vpack.c.bf16 %v1683_v63, %v1682_v62  ;;  %v1677_v59 = vmul.f32 %v6475_v4, %v1642_v45  ;;  %v1678_v62 = vmul.f32 %v6484_v18, %v1642_v45 }
 0x5c8   : > { %v1694_v15 = vpack.c.bf16 %v1685_v14, %v1684_v13  ;;  %v1679_v63 = vmul.f32 %v6489_v19, %v1642_v45 }
 0x5c9   : > { %v1811_v0 = vsel %vm865_vm1, %v1692_v61, 0  ;;  %v1814_v6 = vsel %vm865_vm1, %v1693_v1, 0  ;;  %v1690_v60 = vpack.c.bf16 %v1677_v59, %v1676_v56  ;;  %v1669_v56 = vld [vmem:[%s7031_s6 + $0x38] sm:$0xff] }
 0x5ca   : > { %5583 = vmatpush3.bf16.xpose.msra.mxu0 %v1811_v0  ;;  %v1817_v20 = vsel %vm865_vm1, %v1694_v15, 0  ;;  %v1691_v0 = vpack.c.bf16 %v1679_v63, %v1678_v62 }
 0x5cb   : > { %5584 = vmatprep.subr.bf16.mxu0 %v5980_v30  ;;  %v1762_v61 = vsel %vm865_vm1, %v1690_v60, 0 }
 0x5cc   : > { %v1765_v1 = vsel %vm865_vm1, %v1691_v0, 0 }
 0x5d2   : > { %5585 = vmatpush3.bf16.xpose.msra.mxu0 %v1814_v6  ;;  %v6532_v6 = vsub.s32 4, %v6170_v7 }
 0x5d3   : > { %5586 = vmatprep.subr.bf16.mxu0 %v5980_v30 }
 0x5d4   : > { %v1492_v13 = vrot.slane %v6390_v9, %v6532_v6 }
 0x5da   : > { %5587 = vmatpush3.bf16.xpose.msra.mxu0 %v1817_v20 }
 0x5db   : > { %5588 = vmatprep.subr.bf16.mxu0 %v5980_v30 }
 0x643   : > { %v1443_v11 = vpop.xlane.xlu0 %1442 }
 0x644   : > { %v1448_v48 = vmul.f32 0.015625, %v1443_v11 }
 0x645   : > { %v1446_v49 = vpop.xlane.xlu1 %1445 }
 0x646   : > { %v6413_v50 = vsub.f32 %v1439_v28, %v1448_v48  ;;  %v1449_v36 = vmul.f32 0.015625, %v1446_v49  ;;  %v1695_v28 = vpack.c.bf16 %v1687_v27, %v1686_v23  ;;  %v1672_v48 = vmul.f32 %v6443_v26, %v1642_v45 }
 0x647   : > { %v1673_v49 = vmul.f32 %v6448_v41, %v1642_v45 }
 0x648   : > { %v6415_v12 = vsub.f32 %v1440_v35, %v1449_v36  ;;  %v1452_v16 = vmul.f32 %v6413_v50, %v6413_v50  ;;  %v1820_v29 = vsel %vm865_vm1, %v1695_v28, 0 }
 0x649   : > { %5589 = vmatpush3.bf16.xpose.msra.mxu0 %v1820_v29  ;;  %v1688_v37 = vpack.c.bf16 %v1673_v49, %v1672_v48 }
 0x64a   : > { %v1454_v34 = vsel %vm865_vm1, %v1452_v16, 0.0  ;;  %v1453_v17 = vmul.f32 %v6415_v12, %v6415_v12  ;;  %5613 = vmatprep.subr.bf16.mxu0 %v5980_v30 }
 0x64b   : > { %1455 = vadd.xlane.f32.xlu0 %v1454_v34  ;;  %v1756_v25 = vsel %vm865_vm1, %v1688_v37, 0 }
 0x64c   : > { %v1457_v22 = vsel %vm865_vm1, %v1453_v17, 0.0  ;;  %v1477_v17 = vrot.slane %v6498_v44, %v6246_v31 }
 0x64d   : > { %1458 = vadd.xlane.f32.xlu1 %v1457_v22 }
 0x6d8   : > { %v1456_v33 = vpop.xlane.xlu0 %1455 }
 0x6d9   : > { %v1460_v35 = vmul.f32 0.015625, %v1456_v33 }
 0x6da   : > { %v1459_v39 = vpop.xlane.xlu1 %1458 }
 0x6db   : > { %v1462_v40 = vadd.f32 1e-05, %v1460_v35  ;;  %v1461_v42 = vmul.f32 0.015625, %v1459_v39 }
 0x6dd   : > { %5894 = vrsqrt.f32 %v1462_v40  ;;  %v1463_v43 = vadd.f32 1e-05, %v1461_v42 }
 0x6df   : > { %5896 = vrsqrt.f32 %v1463_v43 }
 0x6e7   : > { %v5895_v47 = vpop.eup %5894 }
 0x6e8   : > { %v1466_v11 = vmul.f32 %v5895_v47, %v6413_v50 }
 0x6e9   : > { %v5897_v36 = vpop.eup %5896 }
 0x6ea   : > { %v1472_v16 = vmul.f32 %v1471_v46, %v1466_v11  ;;  %v1467_v34 = vmul.f32 %v5897_v36, %v6415_v12  ;;  %v1689_v12 = vpack.c.bf16 %v1675_v53, %v1674_v52  ;;  %v1666_v53 = vld [vmem:[%s7031_s6 + $0x20] sm:$0xff] }
 0x6ec   : > { %v1473_v22 = vmul.f32 %v1471_v46, %v1467_v34  ;;  %v6509_v38 = vadd.f32 %v1477_v17, %v1472_v16  ;;  %v1759_v55 = vsel %vm865_vm1, %v1689_v12, 0  ;;  %v6543_v16 = vsub.s32 6, %v6170_v7 }
 0x6ee   : > { %v6511_v21 = vadd.f32 %v1477_v17, %v1473_v22  ;;  %v1647_v34 = vrot.slane %v6390_v9, %v6543_v16  ;;  %v1662_v17 = vld [vmem:[%s7031_s6] sm:$0xff]  ;;  %v1663_v22 = vld [vmem:[%s7031_s6 + $0x8] sm:$0xff] }
 0x6ef   : > { %v5677_v37 = vpack.c.bf16 %v1663_v22, %v1662_v17 }
 0x6f0   : > { %v1480_v50 = vpack.c.bf16 %v6511_v21, %v6509_v38 }
 0x6f2   : > { %5555 = vmatmul.mubr.msk.bf16.vlgmr.msra.gmra.mrb[12].mxu1 %vm865_vm1, %v1480_v50  ;;  %v1664_v50 = vld [vmem:[%s7031_s6 + $0x10] sm:$0xff] }
 0x6f3   : > { %5571 = vmatpush3.bf16.xpose.msra.mxu1 %v1756_v25  ;;  %5578 = vmatprep.mubr.msk.bf16.mxu1 %vm5981_vm2, %v5980_v30  ;;  %v1665_v25 = vld [vmem:[%s7031_s6 + $0x18] sm:$0xff] }
 0x6f4   : > { %5572 = vmatprep.subr.bf16.mxu1 %v5980_v30  ;;  %v5681_v52 = vpack.c.bf16 %v1665_v25, %v1664_v50 }
 0x6fb   : > { %5573 = vmatpush3.bf16.xpose.msra.mxu1 %v1759_v55  ;;  %v1668_v55 = vld [vmem:[%s7031_s6 + $0x30] sm:$0xff] }
 0x6fc   : > { %5574 = vmatprep.subr.bf16.mxu1 %v5980_v30  ;;  %v5689_v59 = vpack.c.bf16 %v1669_v56, %v1668_v55 }
 0x703   : > { %5575 = vmatpush3.bf16.xpose.msra.mxu1 %v1762_v61 }
 0x704   : > { %5576 = vmatprep.subr.bf16.mxu1 %v5980_v30 }
 0x70b   : > { %5577 = vmatpush3.bf16.xpose.msra.mxu1 %v1765_v1 }
 0x70c   : > { %5678 = vmatprep.subr.bf16.mxu1 %v5677_v37 }
 0x7c5   : > { %v1554_v14 = vpop.f32.mrb[12].mxu1 }
 0x7c6   : > { %v1555_v15 = vadd.f32 %v1554_v14, %v1492_v13  ;;  %v5556_v20 = vpop.f32.mrb[13].mxu1 }
 0x7c7   : > { %v1557_v23 = vpop.f32.mrb[14].mxu1 }
 0x7c8   : > { %v1670_v27 = vpack.c.bf16 %v1555_v15, %v1555_v15  ;;  %v1558_v28 = vadd.f32 %v1557_v23, %v1492_v13  ;;  %v5557_v29 = vpop.f32.mrb[15].mxu1 }
 0x7ca   : > { %v1671_v33 = vpack.c.bf16 %v1558_v28, %v1558_v28  ;;  %5579 = vmatmul.mubr.msk.bf16.vlgmr.msra.gmra.mrb[16].mxu1 %vm865_vm1, %v1670_v27 }
 0x7cb   : > { %5680 = vmatpush3.bf16.msra.mxu1 %v5677_v37 }
 0x7cc   : > { %5591 = vmatmul.mubr.msk.bf16.vlgmr.msra.gmra.mrb[20].mxu0 %vm865_vm1, %v1671_v33  ;;  %5682 = vmatprep.subr.bf16.mxu1 %v5681_v52 }
 0x7cd   : > { %5621 = vmatprep.mubr.msk.bf16.mxu0 %vm5981_vm2, %v5980_v30 }
 0x7cf   : > { %5684 = vmatpush3.bf16.msra.mxu1 %v5681_v52 }
 0x89d   : > { %v1801_v35 = vpop.f32.mrb[16].mxu1 }
 0x89e   : > { %v1862_v39 = vmul.f32 0.35355338, %v1801_v35  ;;  %v5580_v40 = vpop.f32.mrb[17].mxu1 }
 0x89f   : > { %v1804_v42 = vpop.f32.mrb[18].mxu1  ;;  %v1856_v43 = vpop.f32.mrb[20].mxu0 }
 0x8a0   : > { %v1863_v45 = vmul.f32 0.35355338, %v1856_v43  ;;  %v5581_v46 = vpop.f32.mrb[19].mxu1  ;;  %v5592_v47 = vpop.f32.mrb[21].mxu0  ;;  %v1864_v11 = vsel %vm865_vm1, %v1862_v39, -inf }
 0x8a1   : > { %v1859_v48 = vpop.f32.mrb[22].mxu0  ;;  %1865 = vmax.xlane.f32.xlu0 %v1864_v11 }
 0x8a2   : > { %v5593_v49 = vpop.f32.mrb[23].mxu0  ;;  %v1867_v36 = vsel %vm865_vm1, %v1863_v45, -inf }
 0x8a3   : > { %1868 = vmax.xlane.f32.xlu1 %v1867_v36 }
 0x8b4   : > { %1704 = vrot.lane.b32.xlu1 %v6443_v26, %s7081_s7  ;;  %v1667_v26 = vld [vmem:[%s7031_s6 + $0x28] sm:$0xff] }
 0x8b5   : > { %v5685_v12 = vpack.c.bf16 %v1667_v26, %v1666_v53 }
 0x8b7   : > { %1649 = vrot.lane.b32.xlu0 %v1647_v34, %s7081_s7  ;;  %5686 = vmatprep.subr.bf16.mxu1 %v5685_v12 }
 0x8b8   : > { %1706 = vrot.lane.b32.xlu1 %v6448_v41, %s7081_s7  ;;  %5688 = vmatpush3.bf16.msra.mxu1 %v5685_v12 }
 0x8b9   : > { %5690 = vmatprep.subr.bf16.mxu1 %v5689_v59 }
 0x8bb   : > { %1708 = vrot.lane.b32.xlu0 %v6454_v57, %s7081_s7 }
 0x8bc   : > { %1710 = vrot.lane.b32.xlu1 %v6459_v58, %s7081_s7  ;;  %5692 = vmatpush3.bf16.msra.mxu1 %v5689_v59 }
 0x8bd   : > { %5625 = vmatprep.subr.bf16.mxu1 %v5980_v30 }
 0x8bf   : > { %1712 = vrot.lane.b32.xlu0 %v6470_v2, %s7081_s7 }
 0x8c0   : > { %1714 = vrot.lane.b32.xlu1 %v6475_v4, %s7081_s7 }
 0x8c3   : > { %1716 = vrot.lane.b32.xlu0 %v6484_v18, %s7081_s7 }
 0x8c4   : > { %1718 = vrot.lane.b32.xlu1 %v6489_v19, %s7081_s7 }
 0x92e   : > { %v1866_v41 = vpop.xlane.xlu0 %1865 }
 0x92f   : > { %v1870_v57 = vsub.f32 %v1862_v39, %v1866_v41 }
 0x930   : > { %v1869_v58 = vpop.xlane.xlu1 %1868 }
 0x931   : > { %v1872_v60 = vmul.f32 1.442695, %v1870_v57  ;;  %v1871_v61 = vsub.f32 %v1863_v45, %v1869_v58 }
 0x932   : > { %v1650_v2 = vpop.permute.xlu0 %1649 }
 0x933   : > { %5898 = vpow2.f32 %v1872_v60  ;;  %v1874_v62 = vmul.f32 1.442695, %v1871_v61  ;;  %v1652_v4 = vadd.f32 %v1650_v2, %v6436_v24  ;;  %v1653_v18 = vadd.f32 %v1650_v2, %v6438_v54 }
 0x934   : > { %v1705_v63 = vpop.permute.xlu1 %1704 }
 0x935   : > { %5900 = vpow2.f32 %v1874_v62  ;;  %v1728_v13 = vmul.f32 %v1705_v63, %v1652_v4  ;;  %v1736_v19 = vmul.f32 %v1705_v63, %v1653_v18 }
 0x936   : > { %v1709_v0 = vpop.permute.xlu0 %1708 }
 0x937   : > { %v1730_v28 = vmul.f32 %v1709_v0, %v1652_v4  ;;  %v1738_v35 = vmul.f32 %v1709_v0, %v1653_v18 }
 0x938   : > { %v1707_v1 = vpop.permute.xlu1 %1706 }
 0x939   : > { %v1729_v14 = vmul.f32 %v1707_v1, %v1652_v4  ;;  %v1737_v15 = vmul.f32 %v1707_v1, %v1653_v18  ;;  %v5754_v1 = vld [vmem:[%s6136_s27] sm:$0xff]  }
 0x93a   : > { %v1713_v27 = vpop.permute.xlu0 %1712 }
 0x93b   : > { %v1744_v20 = vpack.c.bf16 %v1729_v14, %v1728_v13  ;;  %v1748_v23 = vpack.c.bf16 %v1737_v15, %v1736_v19  ;;  %v1732_v43 = vmul.f32 %v1713_v27, %v1652_v4  ;;  %v1740_v46 = vmul.f32 %v1713_v27, %v1653_v18  ;;  %v5755_v19 = vld [vmem:[%s6136_s27 + $0x8] sm:$0xff]   ;;  %v5756_v14 = vld [vmem:[%s6136_s27 + $0x10] sm:$0xff]   ;;  %v5757_v15 = vld [vmem:[%s6136_s27 + $0x18] sm:$0xff]   ;;  %s5986_s27 = smov (!%p5187_p5), 24  }
 0x93c   : > { %v1711_v29 = vpop.permute.xlu1 %1710 }
 0x93d   : > { %v6591_v33 = vpop.eup %5898  ;;  %v1731_v39 = vmul.f32 %v1711_v29, %v1652_v4  ;;  %v1739_v40 = vmul.f32 %v1711_v29, %v1653_v18  ;;  %2028 = vrot.lane.b32.xlu1 %v1748_v23, %s7081_s7  ;;  %1969 = vrot.lane.b32.xlu0 %v1744_v20, %s7081_s7 }
 0x93e   : > { %5610 = vmatprep.mubr.msk.f32.mxu1 %vm865_vm1, %v6591_v33  ;;  %v1717_v47 = vpop.permute.xlu0 %1716 }
 0x93f   : > { %v5901_v24 = vpop.eup %5900  ;;  %v1745_v54 = vpack.c.bf16 %v1731_v39, %v1730_v28  ;;  %v1749_v42 = vpack.c.bf16 %v1739_v40, %v1738_v35  ;;  %v1734_v34 = vmul.f32 %v1717_v47, %v1652_v4  ;;  %v1742_v22 = vmul.f32 %v1717_v47, %v1653_v18 }
 0x940   : > { %v1715_v45 = vpop.permute.xlu1 %1714  ;;  %5611 = vmatmul.mubr.msk.f32.vlgmr.msra.gmra.mrb[6].mxu1 %vm865_vm1, %v5901_v24 }
 0x941   : > { %v1733_v11 = vmul.f32 %v1715_v45, %v1652_v4  ;;  %v1741_v48 = vmul.f32 %v1715_v45, %v1653_v18  ;;  %2030 = vrot.lane.b32.xlu1 %v1749_v42, %s7081_s7  ;;  %1971 = vrot.lane.b32.xlu0 %v1745_v54, %s7081_s7 }
 0x942   : > { %5633 = vmatprep.mubr.msk.bf16.mxu1 %vm5981_vm2, %v5980_v30 }
 0x943   : > { %v1746_v49 = vpack.c.bf16 %v1733_v11, %v1732_v43  ;;  %v1750_v36 = vpack.c.bf16 %v1741_v48, %v1740_v46 }
 0x944   : > { %v1719_v17 = vpop.permute.xlu1 %1718 }
 0x945   : > { %v1735_v37 = vmul.f32 %v1719_v17, %v1652_v4  ;;  %v1743_v50 = vmul.f32 %v1719_v17, %v1653_v18  ;;  %2032 = vrot.lane.b32.xlu1 %v1750_v36, %s7081_s7  ;;  %1973 = vrot.lane.b32.xlu0 %v1746_v49, %s7081_s7 }
 0x947   : > { %v1747_v25 = vpack.c.bf16 %v1735_v37, %v1734_v34  ;;  %v1751_v52 = vpack.c.bf16 %v1743_v50, %v1742_v22 }
 0x949   : > { %2034 = vrot.lane.b32.xlu1 %v1751_v52, %s7081_s7  ;;  %1975 = vrot.lane.b32.xlu0 %v1747_v25, %s7081_s7  ;;  %v2205_v52 = vld [vmem:[%s6141_s30] sm:$0xff]  ;;  %s5987_s7 = smov (!%p5187_p5), 104  }
 0x9af   : > { %v2029_v53 = vpop.permute.xlu1 %2028  ;;  %v1970_v26 = vpop.permute.xlu0 %1969 }
 0x9b0   : > { %5614 = vmatpush3.bf16.msra.mxu0 %v1970_v26  ;;  %5626 = vmatpush3.bf16.msra.mxu1 %v2029_v53  ;;  %v2213_v53 = vld [vmem:[%s6141_s30 + $0x40] sm:$0xff]  ;;  %v2206_v26 = vld [vmem:[%s6141_s30 + $0x8] sm:$0xff] }
 0x9b1   : > { %5627 = vmatprep.subr.bf16.mxu1 %v5980_v30  ;;  %5615 = vmatprep.subr.bf16.mxu0 %v5980_v30 }
 0x9b3   : > { %v2031_v12 = vpop.permute.xlu1 %2030  ;;  %v1972_v55 = vpop.permute.xlu0 %1971 }
 0x9b4   : > { %5616 = vmatpush3.bf16.msra.mxu0 %v1972_v55  ;;  %5628 = vmatpush3.bf16.msra.mxu1 %v2031_v12  ;;  %v4988_v12 = vcombine.high %v2205_v52, %v2213_v53  ;;  %v2214_v55 = vld [vmem:[%s6141_s30 + $0x48] sm:$0xff] }
 0x9b5   : > { %5629 = vmatprep.subr.bf16.mxu1 %v5980_v30  ;;  %5617 = vmatprep.subr.bf16.mxu0 %v5980_v30 }
 0x9b7   : > { %v2033_v56 = vpop.permute.xlu1 %2032  ;;  %v1974_v59 = vpop.permute.xlu0 %1973 }
 0x9b8   : > { %5618 = vmatpush3.bf16.msra.mxu0 %v1974_v59  ;;  %5630 = vmatpush3.bf16.msra.mxu1 %v2033_v56  ;;  %v4987_v56 = vcombine.low %v2205_v52, %v2213_v53  ;;  %v4989_v59 = vcombine.low %v2206_v26, %v2214_v55 }
 0x9b9   : > { %5631 = vmatprep.subr.bf16.mxu1 %v5980_v30  ;;  %5619 = vmatprep.subr.bf16.mxu0 %v5980_v30 }
 0x9bb   : > { %v2035_v41 = vpop.permute.xlu1 %2034  ;;  %v1976_v57 = vpop.permute.xlu0 %1975 }
 0x9bc   : > { %5620 = vmatpush3.bf16.msra.mxu0 %v1976_v57  ;;  %5632 = vmatpush3.bf16.msra.mxu1 %v2035_v41  ;;  %v4990_v41 = vcombine.high %v2206_v26, %v2214_v55  ;;  %v2221_v57 = vld [vmem:[%s6141_s30 + $0x80] sm:$0xff]  ;;  %v2231_v55 = vld [vmem:[%s6141_s30 + $0xd0] sm:$0xff] }
 0x9bd   : > { %5637 = vmatprep.subr.bf16.mxu0 %v5980_v30  ;;  %2676 = vmatprep.subr.bf16.mxu1 %v4988_v12  ;;  %v2223_v12 = vld [vmem:[%s6141_s30 + $0x90] sm:$0xff] }
 0xa13   : > { %v5612_v58 = vpop.f32.mrb[6].mxu1 }
 0xa14   : > { %v1958_v60 = vmax.f32 %v5612_v58, 1e-30  ;;  %v1948_v61 = vpop.f32.mrb[7].mxu1  ;;  %v2229_v58 = vld [vmem:[%s6141_s30 + $0xc0] sm:$0xff] }
 0xa15   : > { %v1957_v2 = vmax.f32 %v1948_v61, 1e-30  ;;  %v5004_v61 = vcombine.high %v2221_v57, %v2229_v58 }
 0xa16   : > { %5902 = vrcp.f32 %v1958_v60  ;;  %v2222_v60 = vld [vmem:[%s6141_s30 + $0x88] sm:$0xff] }
 0xa17   : > { %5904 = vrcp.f32 %v1957_v2  ;;  %v2230_v2 = vld [vmem:[%s6141_s30 + $0xc8] sm:$0xff] }
 0xa20   : > { %v5903_v62 = vpop.eup %5902 }
 0xa21   : > { %v5905_v63 = vpop.eup %5904  ;;  %v1962_v4 = vmul.f32 %v5903_v62, %v5901_v24  ;;  %v6629_v24 = vsub.s32 7, %v6170_v7  ;;  %v5003_v62 = vcombine.low %v2221_v57, %v2229_v58  ;;  %v5008_v58 = vcombine.high %v2223_v12, %v2231_v55 }
 0xa22   : > { %v1961_v18 = vmul.f32 %v5905_v63, %v6591_v33  ;;  %v5005_v63 = vcombine.low %v2222_v60, %v2230_v2 }
 0xa23   : > { %v1964_v0 = vpack.c.bf16 %v1962_v4, %v1962_v4  ;;  %v5006_v4 = vcombine.high %v2222_v60, %v2230_v2  ;;  %v2239_v60 = vld [vmem:[%s6141_s30 + $0x110] sm:$0xff]  ;;  %v2248_v2 = vld [vmem:[%s6141_s30 + $0x158] sm:$0xff] }
 0xa24   : > { %v1963_v13 = vpack.c.bf16 %v1961_v18, %v1961_v18  ;;  %v2237_v18 = vld [vmem:[%s6141_s30 + $0x100] sm:$0xff] }
 0xa25   : > { %5634 = vmatmul.mubr.msk.bf16.vlgmr.msra.gmra.mrb[20].mxu1 %vm865_vm1, %v1964_v0  ;;  %v2245_v0 = vld [vmem:[%s6141_s30 + $0x140] sm:$0xff] }
 0xa26   : > { %5622 = vmatmul.mubr.msk.bf16.vlgmr.msra.gmra.mrb[24].mxu0 %vm865_vm1, %v1963_v13  ;;  %2708 = vmatprep.mubr.bf16.mxu1 %v5978_v5  ;;  %v5020_v13 = vcombine.high %v2237_v18, %v2245_v0 }
 0xa27   : > { %5638 = vmatpush3.bf16.msra.mxu0 %v5754_v1  ;;  %5645 = vmatprep.mubr.msk.bf16.mxu0 %vm5981_vm2, %v5980_v30  ;;  %v2238_v1 = vld [vmem:[%s6141_s30 + $0x108] sm:$0xff] }
 0xa28   : > { %5639 = vmatprep.subr.bf16.mxu0 %v5980_v30  ;;  %2677 = vmatpush1.bf16.msra.mxu1 %v4987_v56  ;;  %v2224_v56 = vld [vmem:[%s6141_s30 + $0x98] sm:$0xff] }
 0xa29   : > { %2678 = vmatprep.subr.bf16.mxu1 %v5004_v61  ;;  %v2240_v61 = vld [vmem:[%s6141_s30 + $0x118] sm:$0xff] }
 0xa2b   : > { %5640 = vmatpush3.bf16.msra.mxu0 %v5755_v19  ;;  %v2246_v19 = vld [vmem:[%s6141_s30 + $0x148] sm:$0xff] }
 0xa2c   : > { %5641 = vmatprep.subr.bf16.mxu0 %v5980_v30  ;;  %2679 = vmatpush1.bf16.msra.mxu1 %v5003_v62  ;;  %v5007_v62 = vcombine.low %v2223_v12, %v2231_v55 }
 0xa2d   : > { %2680 = vmatprep.subr.bf16.mxu1 %v5020_v13  ;;  %v2256_v13 = vld [vmem:[%s6141_s30 + $0x198] sm:$0xff] }
 0xa2f   : > { %5642 = vmatpush3.bf16.msra.mxu0 %v5756_v14  ;;  %v5019_v14 = vcombine.low %v2237_v18, %v2245_v0  ;;  %v5026_v18 = vcombine.high %v2240_v61, %v2248_v2  ;;  %v2255_v0 = vld [vmem:[%s6141_s30 + $0x190] sm:$0xff] }
 0xa30   : > { %5643 = vmatprep.subr.bf16.mxu0 %v5980_v30  ;;  %v2095_v30 = vrot.slane %v6390_v9, %v6629_v24 }
 0xa31   : > { %2681 = vmatpush1.bf16.msra.mxu1 %v5019_v14 }
 0xa33   : > { %5644 = vmatpush3.bf16.msra.mxu0 %v5757_v15  ;;  %v5021_v15 = vcombine.low %v2238_v1, %v2246_v19 }
 0xa34   : > { %2719 = vmatprep.subr.bf16.mxu0 %v4990_v41 }
 0xaf8   : > { %v2077_v20 = vpop.f32.mrb[20].mxu1 }
 0xaf9   : > { %v2018_v23 = vpop.f32.mrb[24].mxu0  ;;  %v5635_v27 = vpop.f32.mrb[21].mxu1 }
 0xafa   : > { %v2083_v28 = vpack.c.bf16 %v2077_v20, %v2018_v23  ;;  %v5623_v29 = vpop.f32.mrb[25].mxu0  ;;  %v2080_v33 = vpop.f32.mrb[22].mxu1  ;;  %v5022_v20 = vcombine.high %v2238_v1, %v2246_v19  ;;  %v2253_v23 = vld [vmem:[%s6141_s30 + $0x180] sm:$0xff]  ;;  %v2263_v1 = vld [vmem:[%s6141_s30 + $0x1d0] sm:$0xff]  ;;  %v2264_v19 = vld [vmem:[%s6141_s30 + $0x1d8] sm:$0xff] }
 0xafb   : > { %v2021_v35 = vpop.f32.mrb[26].mxu0  ;;  %v5636_v39 = vpop.f32.mrb[23].mxu1  ;;  %v2261_v27 = vld [vmem:[%s6141_s30 + $0x1c0] sm:$0xff]  ;;  %v2262_v33 = vld [vmem:[%s6141_s30 + $0x1c8] sm:$0xff] }
 0xafc   : > { %v5624_v40 = vpop.f32.mrb[27].mxu0  ;;  %5646 = vmatmul.mubr.msk.bf16.vlgmr.msra.gmra.mrb[28].mxu0 %vm865_vm1, %v2083_v28  ;;  %v2254_v28 = vld [vmem:[%s6141_s30 + $0x188] sm:$0xff]  ;;  %v5036_v29 = vcombine.high %v2253_v23, %v2261_v27  ;;  %v2207_v35 = vld [vmem:[%s6141_s30 + $0x10] sm:$0xff] }
 0xafd   : > { %2751 = vmatprep.mubr.bf16.mxu0 %v5978_v5  ;;  %2720 = vmatpush1.bf16.msra.mxu0 %v4989_v59  ;;  %v2215_v39 = vld [vmem:[%s6141_s30 + $0x50] sm:$0xff]  ;;  %v5035_v40 = vcombine.low %v2253_v23, %v2261_v27  ;;  %v2232_v59 = vld [vmem:[%s6141_s30 + $0xd8] sm:$0xff]  ;;  %v5042_v23 = vcombine.high %v2256_v13, %v2264_v19  ;;  %v2209_v27 = vld [vmem:[%s6141_s30 + $0x20] sm:$0xff] }
 0xafe   : > { %2721 = vmatprep.subr.bf16.mxu0 %v5006_v4  ;;  %2682 = vmatprep.subr.bf16.mxu1 %v5036_v29  ;;  %v2210_v29 = vld [vmem:[%s6141_s30 + $0x28] sm:$0xff] }
 0xaff   : > { %2683 = vmatpush1.bf16.msra.mxu1 %v5035_v40 }
 0xb01   : > { %2722 = vmatpush1.bf16.msra.mxu0 %v5005_v63  ;;  %v5009_v63 = vcombine.low %v2224_v56, %v2232_v59 }
 0xb02   : > { %2723 = vmatprep.subr.bf16.mxu0 %v5022_v20  ;;  %v5040_v20 = vcombine.high %v2255_v0, %v2263_v1 }
 0xb05   : > { %2724 = vmatpush1.bf16.msra.mxu0 %v5021_v15  ;;  %v5025_v15 = vcombine.low %v2240_v61, %v2248_v2 }
 0xbcf   : > { %v2157_v54 = vpop.f32.mrb[28].mxu0 }
 0xbd0   : > { %v2158_v42 = vadd.f32 %v2157_v54, %v2095_v30  ;;  %v5647_v43 = vpop.f32.mrb[29].mxu0  ;;  %v4991_v54 = vcombine.low %v2207_v35, %v2215_v39 }
 0xbd1   : > { %v2160_v45 = vpop.f32.mrb[30].mxu0  ;;  %v2216_v43 = vld [vmem:[%s6141_s30 + $0x58] sm:$0xff] }
 0xbd2   : > { %v2161_v46 = vadd.f32 %v2160_v45, %v2095_v30  ;;  %v5648_v47 = vpop.f32.mrb[31].mxu0  ;;  %v2164_v11 = vadd.f32 %v2158_v42, %v6509_v38  ;;  %v5038_v30 = vcombine.high %v2254_v28, %v2262_v33  ;;  %v2208_v42 = vld [vmem:[%s6141_s30 + $0x18] sm:$0xff]  ;;  %v5037_v45 = vcombine.low %v2254_v28, %v2262_v33  ;;  %v2217_v28 = vld [vmem:[%s6141_s30 + $0x60] sm:$0xff]  ;;  %v2218_v33 = vld [vmem:[%s6141_s30 + $0x68] sm:$0xff] }
 0xbd3   : > { %v4993_v47 = vcombine.low %v2208_v42, %v2216_v43  ;;  %v4996_v40 = vcombine.high %v2209_v27, %v2217_v28 }
 0xbd4   : > { %v2166_v48 = vsel %vm865_vm1, %v2164_v11, 0.0  ;;  %v2165_v49 = vadd.f32 %v2161_v46, %v6511_v21  ;;  %v4992_v46 = vcombine.high %v2207_v35, %v2215_v39  ;;  %2725 = vmatprep.subr.bf16.mxu0 %v5038_v30  ;;  %v5039_v35 = vcombine.low %v2255_v0, %v2263_v1  ;;  %v2236_v0 = vld [vmem:[%s6141_s30 + $0xf8] sm:$0xff] }
 0xbd5   : > { %2167 = vadd.xlane.f32.xlu0 %v2166_v48  ;;  %2726 = vmatpush1.bf16.msra.mxu0 %v5037_v45  ;;  %v5041_v39 = vcombine.low %v2256_v13, %v2264_v19  ;;  %v4998_v30 = vcombine.high %v2210_v29, %v2218_v33  ;;  %v2234_v45 = vld [vmem:[%s6141_s30 + $0xe8] sm:$0xff] }
 0xbd6   : > { %v2169_v7 = vsel %vm865_vm1, %v2165_v49, 0.0  ;;  %2762 = vmatprep.subr.bf16.mxu1 %v4992_v46  ;;  %v4995_v46 = vcombine.low %v2209_v27, %v2217_v28  ;;  %v2252_v27 = vld [vmem:[%s6141_s30 + $0x178] sm:$0xff] }
 0xbd7   : > { %2170 = vadd.xlane.f32.xlu1 %v2169_v7 }
 0xc62   : > { %v2168_v9 = vpop.xlane.xlu0 %2167 }
 0xc63   : > { %v2172_v36 = vmul.f32 0.015625, %v2168_v9 }
 0xc64   : > { %v2171_v34 = vpop.xlane.xlu1 %2170 }
 0xc65   : > { %v6637_v17 = vsub.f32 %v2164_v11, %v2172_v36  ;;  %v2173_v22 = vmul.f32 0.015625, %v2171_v34  ;;  %v4994_v11 = vcombine.high %v2208_v42, %v2216_v43  ;;  %v2233_v42 = vld [vmem:[%s6141_s30 + $0xe0] sm:$0xff]  ;;  %v2226_v43 = vld [vmem:[%s6141_s30 + $0xa8] sm:$0xff] }
 0xc67   : > { %v6639_v37 = vsub.f32 %v2165_v49, %v2173_v22  ;;  %v2176_v38 = vmul.f32 %v6637_v17, %v6637_v17  ;;  %2805 = vmatprep.subr.bf16.mxu0 %v4994_v11 }
 0xc69   : > { %v2178_v21 = vsel %vm865_vm1, %v2176_v38, 0.0  ;;  %v2177_v50 = vmul.f32 %v6639_v37, %v6639_v37  ;;  %v2195_v38 = vrot.slane %v6498_v44, %v6387_v8 }
 0xc6a   : > { %2179 = vadd.xlane.f32.xlu0 %v2178_v21 }
 0xc6b   : > { %v2181_v25 = vsel %vm865_vm1, %v2177_v50, 0.0 }
 0xc6e   : > { %2182 = vadd.xlane.f32.xlu0 %v2181_v25  ;;  %v2201_v25 = vrot.slane %v6498_v44, %v6532_v6  ;;  %v5010_v44 = vcombine.high %v2224_v56, %v2232_v59  ;;  %v2211_v59 = vld [vmem:[%s6141_s30 + $0x30] sm:$0xff] }
 0xcf7   : > { %v2180_v48 = vpop.xlane.xlu0 %2179 }
 0xcf8   : > { %v2184_v49 = vmul.f32 0.015625, %v2180_v48  ;;  %v5014_v48 = vcombine.high %v2226_v43, %v2234_v45 }
 0xcfa   : > { %v2186_v7 = vadd.f32 1e-05, %v2184_v49  ;;  %v2241_v49 = vld [vmem:[%s6141_s30 + $0x120] sm:$0xff] }
 0xcfb   : > { %v2183_v9 = vpop.xlane.xlu0 %2182 }
 0xcfc   : > { %5906 = vrsqrt.f32 %v2186_v7  ;;  %v2185_v36 = vmul.f32 0.015625, %v2183_v9  ;;  %v2249_v7 = vld [vmem:[%s6141_s30 + $0x160] sm:$0xff]  ;;  %v2242_v9 = vld [vmem:[%s6141_s30 + $0x128] sm:$0xff] }
 0xcfe   : > { %v2187_v34 = vadd.f32 1e-05, %v2185_v36  ;;  %v2250_v36 = vld [vmem:[%s6141_s30 + $0x168] sm:$0xff] }
 0xcff   : > { %v5029_v12 = vcombine.low %v2242_v9, %v2250_v36 }
 0xd00   : > { %5908 = vrsqrt.f32 %v2187_v34 }
 0xd06   : > { %v5907_v22 = vpop.eup %5906 }
 0xd07   : > { %v2190_v21 = vmul.f32 %v5907_v22, %v6637_v17  ;;  %v5013_v22 = vcombine.low %v2226_v43, %v2234_v45 }
 0xd09   : > { %v2196_v52 = vmul.f32 %v2195_v38, %v2190_v21  ;;  %v5030_v21 = vcombine.high %v2242_v9, %v2250_v36  ;;  %v5762_v9 = vld [vmem:[%s6146_s8 + $0x48] sm:$0xff]  }
 0xd0a   : > { %v5909_v50 = vpop.eup %5908  ;;  %v5763_v36 = vld [vmem:[%s6146_s8 + $0xc8] sm:$0xff]  }
 0xd0b   : > { %v2191_v53 = vmul.f32 %v5909_v50, %v6639_v37  ;;  %v6677_v41 = vadd.f32 %v2201_v25, %v2196_v52  ;;  %v2247_v37 = vld [vmem:[%s6141_s30 + $0x150] sm:$0xff]  ;;  %v2257_v50 = vld [vmem:[%s6141_s30 + $0x1a0] sm:$0xff]  ;;  %v2258_v52 = vld [vmem:[%s6141_s30 + $0x1a8] sm:$0xff] }
 0xd0c   : > { %v5024_v4 = vcombine.high %v2239_v60, %v2247_v37  ;;  %v5023_v14 = vcombine.low %v2239_v60, %v2247_v37  ;;  %v2220_v60 = vld [vmem:[%s6141_s30 + $0x78] sm:$0xff] }
 0xd0d   : > { %v2197_v26 = vmul.f32 %v2195_v38, %v2191_v53  ;;  %v5028_v38 = vcombine.high %v2241_v49, %v2249_v7  ;;  %v2266_v53 = vld [vmem:[%s6141_s30 + $0x1e8] sm:$0xff] }
 0xd0e   : > { %v5046_v56 = vcombine.high %v2258_v52, %v2266_v53  ;;  %v5045_v61 = vcombine.low %v2258_v52, %v2266_v53  ;;  %v5771_v52 = vld [vmem:[%s6146_s8 + $0xd8] sm:$0xff]  }
 0xd0f   : > { %v6679_v57 = vadd.f32 %v2201_v25, %v2197_v26  ;;  %v2265_v25 = vld [vmem:[%s6141_s30 + $0x1e0] sm:$0xff]  ;;  %v5027_v26 = vcombine.low %v2241_v49, %v2249_v7  ;;  %v5772_v53 = vld [vmem:[%s6146_s8 + $0x18] sm:$0xff]  }
 0xd10   : > { %v5044_v55 = vcombine.high %v2257_v50, %v2265_v25  ;;  %v5043_v37 = vcombine.low %v2257_v50, %v2265_v25  ;;  %v5760_v49 = vld [vmem:[%s6146_s8] sm:$0xff]   ;;  %v5768_v50 = vld [vmem:[%s6146_s8 + $0x10] sm:$0xff]  }
 0xd11   : > { %v6683_v17 = vpack.c.bf16 %v6679_v57, %v6677_v41  ;;  %v5761_v7 = vld [vmem:[%s6146_s8 + $0x80] sm:$0xff]   ;;  %v5769_v25 = vld [vmem:[%s6146_s8 + $0x90] sm:$0xff]  }
 0xd13   : > { %5051 = vmatmul.mubr.msk.bf16.vlgmr.msra.gmra.mrb[24].mxu1 %vm865_vm1, %v6683_v17  ;;  %5052 = vmatmul.mubr.msk.bf16.vlgmr.msra.gmra.mrb[32].mxu0 %vm865_vm1, %v6683_v17 }
 0xd14   : > { %2763 = vmatpush1.bf16.msra.mxu1 %v4991_v54  ;;  %2806 = vmatpush1.bf16.msra.mxu0 %v4993_v47  ;;  %v2225_v54 = vld [vmem:[%s6141_s30 + $0xa0] sm:$0xff]  ;;  %v4997_v47 = vcombine.low %v2210_v29, %v2218_v33 }
 0xd15   : > { %2764 = vmatprep.subr.bf16.mxu1 %v5008_v58  ;;  %2807 = vmatprep.subr.bf16.mxu0 %v5010_v44  ;;  %v5012_v11 = vcombine.high %v2225_v54, %v2233_v42  ;;  %v5011_v34 = vcombine.low %v2225_v54, %v2233_v42  ;;  %v2219_v58 = vld [vmem:[%s6141_s30 + $0x70] sm:$0xff]  ;;  %v2212_v44 = vld [vmem:[%s6141_s30 + $0x38] sm:$0xff] }
 0xd16   : > { %2794 = vmatprep.mubr.bf16.mxu1 %v5978_v5  ;;  %2837 = vmatprep.mubr.bf16.mxu0 %v5978_v5  ;;  %v5000_v2 = vcombine.high %v2211_v59, %v2219_v58  ;;  %v4999_v1 = vcombine.low %v2211_v59, %v2219_v58  ;;  %v5001_v13 = vcombine.low %v2212_v44, %v2220_v60  ;;  %v2268_v54 = vld [vmem:[%s6141_s30 + $0x1f8] sm:$0xff]  ;;  %v5777_v59 = vld [vmem:[%s6146_s8 + $0xa0] sm:$0xff]   ;;  %v5778_v58 = vld [vmem:[%s6146_s8 + $0x68] sm:$0xff]  }
 0xd18   : > { %2765 = vmatpush1.bf16.msra.mxu1 %v5007_v62  ;;  %2808 = vmatpush1.bf16.msra.mxu0 %v5009_v63  ;;  %v5002_v62 = vcombine.high %v2212_v44, %v2220_v60  ;;  %v2227_v63 = vld [vmem:[%s6141_s30 + $0xb0] sm:$0xff]  ;;  %v5779_v44 = vld [vmem:[%s6146_s8 + $0xe8] sm:$0xff]  }
 0xd19   : > { %2766 = vmatprep.subr.bf16.mxu1 %v5024_v4  ;;  %2809 = vmatprep.subr.bf16.mxu0 %v5026_v18  ;;  %v2235_v4 = vld [vmem:[%s6141_s30 + $0xf0] sm:$0xff]  ;;  %v2228_v18 = vld [vmem:[%s6141_s30 + $0xb8] sm:$0xff]  ;;  %v5780_v60 = vld [vmem:[%s6146_s8 + $0x28] sm:$0xff]  }
 0xd1a   : > { %v5016_v19 = vcombine.high %v2227_v63, %v2235_v4  ;;  %v5015_v28 = vcombine.low %v2227_v63, %v2235_v4  ;;  %v5017_v29 = vcombine.low %v2228_v18, %v2236_v0  ;;  %v5785_v63 = vld [vmem:[%s6146_s8 + $0xb0] sm:$0xff]   ;;  %v5786_v4 = vld [vmem:[%s6146_s8 + $0x78] sm:$0xff]  }
 0xd1c   : > { %2767 = vmatpush1.bf16.msra.mxu1 %v5023_v14  ;;  %2810 = vmatpush1.bf16.msra.mxu0 %v5025_v15  ;;  %v5018_v14 = vcombine.high %v2228_v18, %v2236_v0  ;;  %v2243_v15 = vld [vmem:[%s6141_s30 + $0x130] sm:$0xff]  ;;  %v5787_v18 = vld [vmem:[%s6146_s8 + $0xf8] sm:$0xff]  }
 0xd1d   : > { %2768 = vmatprep.subr.bf16.mxu1 %v5040_v20  ;;  %2811 = vmatprep.subr.bf16.mxu0 %v5042_v23  ;;  %v2251_v20 = vld [vmem:[%s6141_s30 + $0x170] sm:$0xff]  ;;  %v2244_v23 = vld [vmem:[%s6141_s30 + $0x138] sm:$0xff] }
 0xd1e   : > { %v5032_v33 = vcombine.high %v2243_v15, %v2251_v20  ;;  %v5031_v42 = vcombine.low %v2243_v15, %v2251_v20  ;;  %v5033_v43 = vcombine.low %v2244_v23, %v2252_v27  ;;  %v5788_v0 = vld [vmem:[%s6146_s8 + $0x38] sm:$0xff]  }
 0xd20   : > { %2769 = vmatpush1.bf16.msra.mxu1 %v5039_v35  ;;  %2812 = vmatpush1.bf16.msra.mxu0 %v5041_v39  ;;  %v5034_v35 = vcombine.high %v2244_v23, %v2252_v27  ;;  %v2259_v39 = vld [vmem:[%s6141_s30 + $0x1b0] sm:$0xff] }
 0xd21   : > { %2848 = vmatprep.subr.bf16.mxu1 %v4996_v40  ;;  %2891 = vmatprep.subr.bf16.mxu0 %v4998_v30  ;;  %v2267_v40 = vld [vmem:[%s6141_s30 + $0x1f0] sm:$0xff]  ;;  %v2260_v30 = vld [vmem:[%s6141_s30 + $0x1b8] sm:$0xff] }
 0xd22   : > { %v5048_v45 = vcombine.high %v2259_v39, %v2267_v40 }
 0xd23   : > { %5053 = vmatmul.mubr.msk.bf16.vlgmr.msra.gmra.mrb[28].mxu1 %vm865_vm1, %v6683_v17  ;;  %5054 = vmatmul.mubr.msk.bf16.vlgmr.msra.gmra.mrb[36].mxu0 %vm865_vm1, %v6683_v17 }
 0xd24   : > { %2849 = vmatpush1.bf16.msra.mxu1 %v4995_v46  ;;  %2892 = vmatpush1.bf16.msra.mxu0 %v4997_v47  ;;  %v5050_v46 = vcombine.high %v2260_v30, %v2268_v54  ;;  %v5047_v47 = vcombine.low %v2259_v39, %v2267_v40 }
 0xd25   : > { %2850 = vmatprep.subr.bf16.mxu1 %v5012_v11  ;;  %2893 = vmatprep.subr.bf16.mxu0 %v5014_v48  ;;  %v5049_v11 = vcombine.low %v2260_v30, %v2268_v54  ;;  %v5759_v48 = vld [vmem:[%s6146_s8 + $0xc0] sm:$0xff]  }
 0xd26   : > { %2880 = vmatprep.mubr.bf16.mxu1 %v5978_v5  ;;  %2923 = vmatprep.mubr.bf16.mxu0 %v5978_v5 }
 0xd28   : > { %2851 = vmatpush1.bf16.msra.mxu1 %v5011_v34  ;;  %2894 = vmatpush1.bf16.msra.mxu0 %v5013_v22  ;;  %v5764_v34 = vld [vmem:[%s6146_s8 + $0x8] sm:$0xff]  }
 0xd29   : > { %2852 = vmatprep.subr.bf16.mxu1 %v5028_v38  ;;  %2895 = vmatprep.subr.bf16.mxu0 %v5030_v21  ;;  %v5765_v22 = vld [vmem:[%s6146_s8 + $0x88] sm:$0xff]   ;;  %v5766_v38 = vld [vmem:[%s6146_s8 + $0x50] sm:$0xff]  }
 0xd2a   : > { %v5767_v21 = vld [vmem:[%s6146_s8 + $0xd0] sm:$0xff]  }
 0xd2c   : > { %2853 = vmatpush1.bf16.msra.mxu1 %v5027_v26  ;;  %2896 = vmatpush1.bf16.msra.mxu0 %v5029_v12  ;;  %v5773_v26 = vld [vmem:[%s6146_s8 + $0x98] sm:$0xff]   ;;  %v5774_v12 = vld [vmem:[%s6146_s8 + $0x60] sm:$0xff]  }
 0xd2d   : > { %2854 = vmatprep.subr.bf16.mxu1 %v5044_v55  ;;  %2897 = vmatprep.subr.bf16.mxu0 %v5046_v56  ;;  %v5775_v55 = vld [vmem:[%s6146_s8 + $0xe0] sm:$0xff]  }
 0xd2e   : > { %v5776_v56 = vld [vmem:[%s6146_s8 + $0x20] sm:$0xff]  }
 0xd30   : > { %2855 = vmatpush1.bf16.msra.mxu1 %v5043_v37  ;;  %2898 = vmatpush1.bf16.msra.mxu0 %v5045_v61  ;;  %v5781_v37 = vld [vmem:[%s6146_s8 + $0xa8] sm:$0xff]   ;;  %v5782_v61 = vld [vmem:[%s6146_s8 + $0x70] sm:$0xff]  }
 0xd31   : > { %2934 = vmatprep.subr.bf16.mxu1 %v5000_v2  ;;  %2977 = vmatprep.subr.bf16.mxu0 %v5002_v62  ;;  %v5783_v2 = vld [vmem:[%s6146_s8 + $0xf0] sm:$0xff]  }
 0xd32   : > { %v5784_v62 = vld [vmem:[%s6146_s8 + $0x30] sm:$0xff]  }
 0xd33   : > { %5055 = vmatmul.mubr.msk.bf16.vlgmr.msra.gmra.mrb[32].mxu1 %vm865_vm1, %v6683_v17  ;;  %5056 = vmatmul.mubr.msk.bf16.vlgmr.msra.gmra.mrb[40].mxu0 %vm865_vm1, %v6683_v17 }
 0xd34   : > { %2935 = vmatpush1.bf16.msra.mxu1 %v4999_v1  ;;  %2978 = vmatpush1.bf16.msra.mxu0 %v5001_v13  ;;  %v5789_v1 = vld [vmem:[%s6146_s8 + $0xb8] sm:$0xff]   ;;  %v5790_v13 = vld [vmem:[%s6146_s8 + $0x140] sm:$0xff]  }
 0xd35   : > { %2936 = vmatprep.subr.bf16.mxu1 %v5016_v19  ;;  %2979 = vmatprep.subr.bf16.mxu0 %v5018_v14  ;;  %v5791_v19 = vld [vmem:[%s6146_s8 + $0x1c0] sm:$0xff]  }
 0xd36   : > { %2966 = vmatprep.mubr.bf16.mxu1 %v5978_v5  ;;  %3009 = vmatprep.mubr.bf16.mxu0 %v5978_v5  ;;  %v5758_v5 = vld [vmem:[%s6146_s8 + $0x40] sm:$0xff]  }
 0xd37   : > { %v2269_v14 = vld [vmem:[%s6156_s3] sm:$0xff] }
 0xd38   : > { %2937 = vmatpush1.bf16.msra.mxu1 %v5015_v28  ;;  %2980 = vmatpush1.bf16.msra.mxu0 %v5017_v29  ;;  %v2276_v15 = vrot.slane %v2269_v14, %v6285_v32  ;;  %v2284_v20 = vrot.slane %v2269_v14, %v6246_v31  ;;  %v2280_v23 = vrot.slane %v2269_v14, %v6175_v10 }
 0xd39   : > { %2938 = vmatprep.subr.bf16.mxu1 %v5032_v33  ;;  %2981 = vmatprep.subr.bf16.mxu0 %v5034_v35  ;;  %v2288_v27 = vrot.slane %v2269_v14, %v6387_v8 }
 0xd3c   : > { %2939 = vmatpush1.bf16.msra.mxu1 %v5031_v42  ;;  %2982 = vmatpush1.bf16.msra.mxu0 %v5033_v43 }
 0xd3d   : > { %2940 = vmatprep.subr.bf16.mxu1 %v5048_v45  ;;  %2983 = vmatprep.subr.bf16.mxu0 %v5050_v46 }
 0xd40   : > { %2941 = vmatpush1.bf16.msra.mxu1 %v5047_v47  ;;  %2984 = vmatpush1.bf16.msra.mxu0 %v5049_v11 }
 0xd41   : > { %5286 = vmatprep.subr.bf16.mxu1 %v5758_v5  ;;  %5308 = vmatprep.subr.bf16.mxu0 %v5759_v48 }
 0xd43   : > { %5057 = vmatmul.mubr.msk.bf16.vlgmr.msra.gmra.mrb[36].mxu1 %vm865_vm1, %v6683_v17  ;;  %5058 = vmatmul.mubr.msk.bf16.vlgmr.msra.gmra.mrb[44].mxu0 %vm865_vm1, %v6683_v17  ;;  %v5770_v17 = vld [vmem:[%s6146_s8 + $0x58] sm:$0xff]  }
 0xd44   : > { %5287 = vmatpush3.bf16.msra.mxu1 %v5760_v49  ;;  %5309 = vmatpush3.bf16.msra.mxu0 %v5761_v7 }
 0xd45   : > { %5288 = vmatprep.subr.bf16.mxu1 %v5762_v9  ;;  %5310 = vmatprep.subr.bf16.mxu0 %v5763_v36 }
 0xd48   : > { %5289 = vmatpush3.bf16.msra.mxu1 %v5764_v34  ;;  %5311 = vmatpush3.bf16.msra.mxu0 %v5765_v22 }
 0xd49   : > { %5290 = vmatprep.subr.bf16.mxu1 %v5766_v38  ;;  %5312 = vmatprep.subr.bf16.mxu0 %v5767_v21 }
 0xd4c   : > { %5291 = vmatpush3.bf16.msra.mxu1 %v5768_v50  ;;  %5313 = vmatpush3.bf16.msra.mxu0 %v5769_v25 }
 0xd4d   : > { %5292 = vmatprep.subr.bf16.mxu1 %v5770_v17  ;;  %5314 = vmatprep.subr.bf16.mxu0 %v5771_v52 }
 0xd50   : > { %5293 = vmatpush3.bf16.msra.mxu1 %v5772_v53  ;;  %5315 = vmatpush3.bf16.msra.mxu0 %v5773_v26  ;;  %v5792_v53 = vld [vmem:[%s6146_s8 + $0x100] sm:$0xff]  }
 0xd51   : > { %5294 = vmatprep.subr.bf16.mxu1 %v5774_v12  ;;  %5316 = vmatprep.subr.bf16.mxu0 %v5775_v55  ;;  %v5793_v26 = vld [vmem:[%s6146_s8 + $0x180] sm:$0xff]   ;;  %v5794_v12 = vld [vmem:[%s6146_s8 + $0x148] sm:$0xff]  }
 0xd52   : > { %v5795_v55 = vld [vmem:[%s6146_s8 + $0x1c8] sm:$0xff]  }
 0xd54   : > { %5295 = vmatpush3.bf16.msra.mxu1 %v5776_v56  ;;  %5317 = vmatpush3.bf16.msra.mxu0 %v5777_v59  ;;  %v5796_v56 = vld [vmem:[%s6146_s8 + $0x108] sm:$0xff]  }
 0xd55   : > { %5296 = vmatprep.subr.bf16.mxu1 %v5778_v58  ;;  %5318 = vmatprep.subr.bf16.mxu0 %v5779_v44  ;;  %v5797_v59 = vld [vmem:[%s6146_s8 + $0x188] sm:$0xff]   ;;  %v2292_v58 = vrot.slane %v2269_v14, %v6532_v6  ;;  %v2300_v44 = vrot.slane %v2269_v14, %v6543_v16 }
 0xd58   : > { %5297 = vmatpush3.bf16.msra.mxu1 %v5780_v60  ;;  %5319 = vmatpush3.bf16.msra.mxu0 %v5781_v37  ;;  %v5798_v60 = vld [vmem:[%s6146_s8 + $0x150] sm:$0xff]  }
 0xd59   : > { %5298 = vmatprep.subr.bf16.mxu1 %v5782_v61  ;;  %5320 = vmatprep.subr.bf16.mxu0 %v5783_v2  ;;  %v5799_v37 = vld [vmem:[%s6146_s8 + $0x1d0] sm:$0xff]   ;;  %v2296_v61 = vrot.slane %v2269_v14, %v6432_v51  ;;  %v2304_v2 = vrot.slane %v2269_v14, %v6629_v24 }
 0xd5c   : > { %5299 = vmatpush3.bf16.msra.mxu1 %v5784_v62  ;;  %5321 = vmatpush3.bf16.msra.mxu0 %v5785_v63 }
 0xd5d   : > { %5300 = vmatprep.subr.bf16.mxu1 %v5786_v4  ;;  %5322 = vmatprep.subr.bf16.mxu0 %v5787_v18  ;;  %v5800_v4 = vld [vmem:[%s6146_s8 + $0x110] sm:$0xff]  }
 0xd5e   : > { %v5801_v18 = vld [vmem:[%s6146_s8 + $0x190] sm:$0xff]  }
 0xd60   : > { %5301 = vmatpush3.bf16.msra.mxu1 %v5788_v0  ;;  %5323 = vmatpush3.bf16.msra.mxu0 %v5789_v1 }
 0xd61   : > { %5330 = vmatprep.subr.bf16.mxu1 %v5790_v13  ;;  %5352 = vmatprep.subr.bf16.mxu0 %v5791_v19 }
 0xde6   : > { %v2710_v28 = vpop.f32.mrb[24].mxu1  ;;  %v2753_v29 = vpop.f32.mrb[32].mxu0 }
 0xde7   : > { %v2711_v33 = vadd.f32 %v2710_v28, %v2276_v15  ;;  %v2754_v35 = vadd.f32 %v2753_v29, %v2284_v20  ;;  %v2712_v39 = vpop.f32.mrb[25].mxu1  ;;  %v2755_v40 = vpop.f32.mrb[33].mxu0 }
 0xde8   : > { %v2713_v30 = vadd.f32 %v2712_v39, %v2280_v23  ;;  %v2756_v54 = vadd.f32 %v2755_v40, %v2288_v27  ;;  %v2714_v42 = vpop.f32.mrb[26].mxu1  ;;  %v2757_v43 = vpop.f32.mrb[34].mxu0 }
 0xde9   : > { %v2715_v45 = vadd.f32 %v2714_v42, %v2276_v15  ;;  %v2758_v46 = vadd.f32 %v2757_v43, %v2284_v20  ;;  %v2716_v47 = vpop.f32.mrb[27].mxu1  ;;  %v2759_v11 = vpop.f32.mrb[35].mxu0  ;;  %v3020_v49 = vmax.f32 %v2711_v33, 0.0  ;;  %v3022_v7 = vmax.f32 %v2754_v35, 0.0  ;;  %v5802_v15 = vld [vmem:[%s6146_s8 + $0x158] sm:$0xff]  }
 0xdea   : > { %v2717_v5 = vadd.f32 %v2716_v47, %v2280_v23  ;;  %v2760_v48 = vadd.f32 %v2759_v11, %v2288_v27  ;;  %v3021_v34 = vmax.f32 %v2713_v30, 0.0  ;;  %v3023_v22 = vmax.f32 %v2756_v54, 0.0  ;;  %v5803_v20 = vld [vmem:[%s6146_s8 + $0x1d8] sm:$0xff]   ;;  %v5806_v11 = vld [vmem:[%s6146_s8 + $0x160] sm:$0xff]  }
 0xdeb   : > { %v3036_v9 = vmax.f32 %v2715_v45, 0.0  ;;  %v3038_v36 = vmax.f32 %v2758_v46, 0.0  ;;  %v5804_v54 = vld [vmem:[%s6146_s8 + $0x118] sm:$0xff]  }
 0xdec   : > { %v3037_v38 = vmax.f32 %v2717_v5, 0.0  ;;  %v3039_v21 = vmax.f32 %v2760_v48, 0.0  ;;  %v5805_v42 = vld [vmem:[%s6146_s8 + $0x198] sm:$0xff]   ;;  %v5807_v5 = vld [vmem:[%s6146_s8 + $0x1e0] sm:$0xff]  }
 0xded   : > { %v3052_v50 = vpack.c.bf16 %v3036_v9, %v3020_v49  ;;  %v3054_v25 = vpack.c.bf16 %v3038_v36, %v3022_v7 }
 0xdee   : > { %v3053_v17 = vpack.c.bf16 %v3037_v38, %v3021_v34  ;;  %v3055_v52 = vpack.c.bf16 %v3039_v21, %v3023_v22  ;;  %v5808_v21 = vld [vmem:[%s6146_s8 + $0x120] sm:$0xff]  }
 0xdf0   : > { %4128 = vmatprep.mubr.bf16.mxu1 %v3053_v17  ;;  %4169 = vmatprep.mubr.bf16.mxu0 %v3055_v52  ;;  %v5811_v17 = vld [vmem:[%s6146_s8 + $0x1e8] sm:$0xff]  }
 0xdf1   : > { %4129 = vmatmul.mubr.bf16.vlgmr.msra.gmra.mrb[40].mxu1 %v3052_v50  ;;  %4170 = vmatmul.mubr.bf16.vlgmr.msra.gmra.mrb[48].mxu0 %v3054_v25  ;;  %v5809_v50 = vld [vmem:[%s6146_s8 + $0x1a0] sm:$0xff]   ;;  %v5810_v25 = vld [vmem:[%s6146_s8 + $0x168] sm:$0xff]  }
 0xdf2   : > { %5331 = vmatpush3.bf16.msra.mxu1 %v5792_v53  ;;  %5353 = vmatpush3.bf16.msra.mxu0 %v5793_v26  ;;  %v6815_v52 = vld [vmem:[%s6156_s3 + $0x8] sm:$0xff] }
 0xdf3   : > { %5332 = vmatprep.subr.bf16.mxu1 %v5794_v12  ;;  %5354 = vmatprep.subr.bf16.mxu0 %v5795_v55  ;;  %v5812_v53 = vld [vmem:[%s6146_s8 + $0x128] sm:$0xff]   ;;  %v2308_v12 = vrot.slane %v6815_v52, %v6285_v32  ;;  %v2316_v55 = vrot.slane %v6815_v52, %v6246_v31 }
 0xdf4   : > { %v5813_v26 = vld [vmem:[%s6146_s8 + $0x1a8] sm:$0xff]  }
 0xdf6   : > { %v2796_v62 = vpop.f32.mrb[28].mxu1  ;;  %v2839_v63 = vpop.f32.mrb[36].mxu0  ;;  %5333 = vmatpush3.bf16.msra.mxu1 %v5796_v56  ;;  %5355 = vmatpush3.bf16.msra.mxu0 %v5797_v59  ;;  %v5814_v56 = vld [vmem:[%s6146_s8 + $0x170] sm:$0xff]  }
 0xdf7   : > { %v2797_v0 = vadd.f32 %v2796_v62, %v2292_v58  ;;  %v2840_v1 = vadd.f32 %v2839_v63, %v2300_v44  ;;  %v2798_v13 = vpop.f32.mrb[29].mxu1  ;;  %v2841_v19 = vpop.f32.mrb[37].mxu0  ;;  %5334 = vmatprep.subr.bf16.mxu1 %v5798_v60  ;;  %5356 = vmatprep.subr.bf16.mxu0 %v5799_v37  ;;  %v5815_v59 = vld [vmem:[%s6146_s8 + $0x1f0] sm:$0xff]  }
 0xdf8   : > { %v2799_v23 = vadd.f32 %v2798_v13, %v2296_v61  ;;  %v2842_v27 = vadd.f32 %v2841_v19, %v2304_v2  ;;  %v2800_v28 = vpop.f32.mrb[30].mxu1  ;;  %v2843_v14 = vpop.f32.mrb[38].mxu0 }
 0xdf9   : > { %v2801_v29 = vadd.f32 %v2800_v28, %v2292_v58  ;;  %v2844_v33 = vadd.f32 %v2843_v14, %v2300_v44  ;;  %v2802_v35 = vpop.f32.mrb[31].mxu1  ;;  %v2845_v39 = vpop.f32.mrb[39].mxu0  ;;  %v3024_v43 = vmax.f32 %v2797_v0, 0.0  ;;  %v3026_v45 = vmax.f32 %v2840_v1, 0.0  ;;  %v5819_v0 = vld [vmem:[%s6146_s8 + $0x1f8] sm:$0xff]  }
 0xdfa   : > { %v2803_v40 = vadd.f32 %v2802_v35, %v2296_v61  ;;  %v2846_v30 = vadd.f32 %v2845_v39, %v2304_v2  ;;  %5335 = vmatpush3.bf16.msra.mxu1 %v5800_v4  ;;  %5357 = vmatpush3.bf16.msra.mxu0 %v5801_v18  ;;  %v3025_v48 = vmax.f32 %v2799_v23, 0.0  ;;  %v3027_v49 = vmax.f32 %v2842_v27, 0.0  ;;  %v5816_v61 = vld [vmem:[%s6146_s8 + $0x130] sm:$0xff]   ;;  %v5818_v18 = vld [vmem:[%s6146_s8 + $0x178] sm:$0xff]  }
 0xdfb   : > { %v3040_v46 = vmax.f32 %v2801_v29, 0.0  ;;  %v3042_v47 = vmax.f32 %v2844_v33, 0.0  ;;  %5336 = vmatprep.subr.bf16.mxu1 %v5802_v15  ;;  %5358 = vmatprep.subr.bf16.mxu0 %v5803_v20  ;;  %v2312_v58 = vrot.slane %v6815_v52, %v6175_v10  ;;  %v2320_v44 = vrot.slane %v6815_v52, %v6387_v8  ;;  %v5817_v2 = vld [vmem:[%s6146_s8 + $0x1b0] sm:$0xff]   ;;  %v5820_v14 = vld [vmem:[%s6146_s8 + $0x138] sm:$0xff]  }
 0xdfc   : > { %v3041_v7 = vmax.f32 %v2803_v40, 0.0  ;;  %v3043_v9 = vmax.f32 %v2846_v30, 0.0  ;;  %v5821_v29 = vld [vmem:[%s6146_s8 + $0x1b8] sm:$0xff]   ;;  %v5822_v30 = vld [vmem:[%s6146_s8 + $0x240] sm:$0xff]  }
 0xdfd   : > { %v6806_v36 = vpack.c.bf16 %v3040_v46, %v3024_v43  ;;  %v6808_v34 = vpack.c.bf16 %v3042_v47, %v3026_v45 }
 0xdfe   : > { %v3057_v22 = vpack.c.bf16 %v3041_v7, %v3025_v48  ;;  %v3059_v38 = vpack.c.bf16 %v3043_v9, %v3027_v49  ;;  %5337 = vmatpush3.bf16.msra.mxu1 %v5804_v54  ;;  %5359 = vmatpush3.bf16.msra.mxu0 %v5805_v42  ;;  %v5823_v54 = vld [vmem:[%s6146_s8 + $0x2c0] sm:$0xff]   ;;  %v5826_v9 = vld [vmem:[%s6146_s8 + $0x248] sm:$0xff]  }
 0xdff   : > { %5338 = vmatprep.subr.bf16.mxu1 %v5806_v11  ;;  %5360 = vmatprep.subr.bf16.mxu0 %v5807_v5  ;;  %v5824_v49 = vld [vmem:[%s6146_s8 + $0x200] sm:$0xff]  }
 0xe00   : > { %4210 = vmatprep.mubr.bf16.mxu1 %v3057_v22  ;;  %4251 = vmatprep.mubr.bf16.mxu0 %v3059_v38  ;;  %v5825_v7 = vld [vmem:[%s6146_s8 + $0x280] sm:$0xff]   ;;  %v5827_v22 = vld [vmem:[%s6146_s8 + $0x2c8] sm:$0xff]  }
 0xe01   : > { %v5828_v38 = vld [vmem:[%s6146_s8 + $0x208] sm:$0xff]  }
 0xe02   : > { %5339 = vmatpush3.bf16.msra.mxu1 %v5808_v21  ;;  %5361 = vmatpush3.bf16.msra.mxu0 %v5809_v50  ;;  %v2324_v21 = vrot.slane %v6815_v52, %v6532_v6  ;;  %v2332_v50 = vrot.slane %v6815_v52, %v6543_v16  ;;  %v5832_v6 = vld [vmem:[%s6146_s8 + $0x210] sm:$0xff]  }
 0xe03   : > { %5340 = vmatprep.subr.bf16.mxu1 %v5810_v25  ;;  %5362 = vmatprep.subr.bf16.mxu0 %v5811_v17  ;;  %v5829_v25 = vld [vmem:[%s6146_s8 + $0x288] sm:$0xff]   ;;  %v5830_v17 = vld [vmem:[%s6146_s8 + $0x250] sm:$0xff]  }
 0xe06   : > { %v2882_v60 = vpop.f32.mrb[32].mxu1  ;;  %v2925_v37 = vpop.f32.mrb[40].mxu0  ;;  %5341 = vmatpush3.bf16.msra.mxu1 %v5812_v53  ;;  %5363 = vmatpush3.bf16.msra.mxu0 %v5813_v26  ;;  %v5831_v53 = vld [vmem:[%s6146_s8 + $0x2d0] sm:$0xff]  }
 0xe07   : > { %v2883_v62 = vadd.f32 %v2882_v60, %v2308_v12  ;;  %v2926_v63 = vadd.f32 %v2925_v37, %v2316_v55  ;;  %v2884_v4 = vpop.f32.mrb[33].mxu1  ;;  %v2927_v31 = vpop.f32.mrb[41].mxu0  ;;  %5342 = vmatprep.subr.bf16.mxu1 %v5814_v56  ;;  %5364 = vmatprep.subr.bf16.mxu0 %v5815_v59  ;;  %v5834_v60 = vld [vmem:[%s6146_s8 + $0x258] sm:$0xff]  }
 0xe08   : > { %v2885_v10 = vadd.f32 %v2884_v4, %v2312_v58  ;;  %v2928_v1 = vadd.f32 %v2927_v31, %v2320_v44  ;;  %v2886_v13 = vpop.f32.mrb[34].mxu1  ;;  %v2929_v8 = vpop.f32.mrb[42].mxu0 }
 0xe09   : > { %v2887_v19 = vadd.f32 %v2886_v13, %v2308_v12  ;;  %v2930_v15 = vadd.f32 %v2929_v8, %v2316_v55  ;;  %v2888_v20 = vpop.f32.mrb[35].mxu1  ;;  %v2931_v23 = vpop.f32.mrb[43].mxu0  ;;  %v3028_v33 = vmax.f32 %v2883_v62, 0.0  ;;  %v3030_v35 = vmax.f32 %v2926_v63, 0.0 }
 0xe0a   : > { %v2889_v27 = vadd.f32 %v2888_v20, %v2312_v58  ;;  %v2932_v28 = vadd.f32 %v2931_v23, %v2320_v44  ;;  %5343 = vmatpush3.bf16.msra.mxu1 %v5816_v61  ;;  %5365 = vmatpush3.bf16.msra.mxu0 %v5817_v2  ;;  %v3029_v42 = vmax.f32 %v2885_v10, 0.0  ;;  %v3031_v43 = vmax.f32 %v2928_v1, 0.0  ;;  %v5833_v44 = vld [vmem:[%s6146_s8 + $0x290] sm:$0xff]   ;;  %v5836_v10 = vld [vmem:[%s6146_s8 + $0x218] sm:$0xff]   ;;  %v5838_v20 = vld [vmem:[%s6146_s8 + $0x260] sm:$0xff]  }
 0xe0b   : > { %v3044_v39 = vmax.f32 %v2887_v19, 0.0  ;;  %v3046_v40 = vmax.f32 %v2930_v15, 0.0  ;;  %5344 = vmatprep.subr.bf16.mxu1 %v5818_v18  ;;  %5366 = vmatprep.subr.bf16.mxu0 %v5819_v0  ;;  %v5837_v15 = vld [vmem:[%s6146_s8 + $0x298] sm:$0xff]  }
 0xe0c   : > { %v3045_v45 = vmax.f32 %v2889_v27, 0.0  ;;  %v3047_v46 = vmax.f32 %v2932_v28, 0.0 }
 0xe0d   : > { %v6837_v47 = vpack.c.bf16 %v3044_v39, %v3028_v33  ;;  %v6839_v11 = vpack.c.bf16 %v3046_v40, %v3030_v35 }
 0xe0e   : > { %v3061_v5 = vpack.c.bf16 %v3045_v45, %v3029_v42  ;;  %v3063_v48 = vpack.c.bf16 %v3047_v46, %v3031_v43  ;;  %5345 = vmatpush3.bf16.msra.mxu1 %v5820_v14  ;;  %5367 = vmatpush3.bf16.msra.mxu0 %v5821_v29  ;;  %v5839_v29 = vld [vmem:[%s6146_s8 + $0x2e0] sm:$0xff]   ;;  %v5842_v42 = vld [vmem:[%s6146_s8 + $0x268] sm:$0xff]  }
 0xe0f   : > { %5374 = vmatprep.subr.bf16.mxu1 %v5822_v30  ;;  %5396 = vmatprep.subr.bf16.mxu0 %v5823_v54  ;;  %v5840_v30 = vld [vmem:[%s6146_s8 + $0x220] sm:$0xff]   ;;  %v5843_v43 = vld [vmem:[%s6146_s8 + $0x2e8] sm:$0xff]  }
 0xe10   : > { %v5841_v54 = vld [vmem:[%s6146_s8 + $0x2a0] sm:$0xff]   ;;  %v5844_v45 = vld [vmem:[%s6146_s8 + $0x228] sm:$0xff]  }
 0xe11   : > { %4211 = vmatmul.mubr.bf16.vlgmr.msra.gmra.mrb[44].mxu1 %v6806_v36  ;;  %4252 = vmatmul.mubr.bf16.vlgmr.msra.gmra.mrb[52].mxu0 %v6808_v34  ;;  %v2328_v36 = vrot.slane %v6815_v52, %v6432_v51  ;;  %v2336_v34 = vrot.slane %v6815_v52, %v6629_v24  ;;  %v5835_v24 = vld [vmem:[%s6146_s8 + $0x2d8] sm:$0xff]   ;;  %v5845_v46 = vld [vmem:[%s6146_s8 + $0x2a8] sm:$0xff]  }
 0xe12   : > { %5375 = vmatpush3.bf16.msra.mxu1 %v5824_v49  ;;  %4292 = vmatprep.mubr.bf16.mxu1 %v3061_v5  ;;  %v5846_v5 = vld [vmem:[%s6146_s8 + $0x270] sm:$0xff]  }
 0xe13   : > { %5397 = vmatpush3.bf16.msra.mxu0 %v5825_v7  ;;  %4333 = vmatprep.mubr.bf16.mxu0 %v3063_v48  ;;  %v5847_v48 = vld [vmem:[%s6146_s8 + $0x2f0] sm:$0xff]  }
 0xe14   : > { %5376 = vmatprep.subr.bf16.mxu1 %v5826_v9  ;;  %5398 = vmatprep.subr.bf16.mxu0 %v5827_v22  ;;  %v5848_v49 = vld [vmem:[%s6146_s8 + $0x230] sm:$0xff]   ;;  %v5850_v9 = vld [vmem:[%s6146_s8 + $0x278] sm:$0xff]  }
 0xe15   : > { %v5849_v7 = vld [vmem:[%s6146_s8 + $0x2b0] sm:$0xff]   ;;  %v5851_v22 = vld [vmem:[%s6146_s8 + $0x2f8] sm:$0xff]  }
 0xe16   : > { %v2968_v26 = vpop.f32.mrb[36].mxu1  ;;  %v3011_v12 = vpop.f32.mrb[44].mxu0  ;;  %5377 = vmatpush3.bf16.msra.mxu1 %v5828_v38  ;;  %v5852_v38 = vld [vmem:[%s6146_s8 + $0x238] sm:$0xff]  }
 0xe17   : > { %v2969_v55 = vadd.f32 %v2968_v26, %v2324_v21  ;;  %v3012_v56 = vadd.f32 %v3011_v12, %v2332_v50  ;;  %5399 = vmatpush3.bf16.msra.mxu0 %v5829_v25  ;;  %v2970_v59 = vpop.f32.mrb[37].mxu1  ;;  %v3013_v58 = vpop.f32.mrb[45].mxu0  ;;  %5378 = vmatprep.subr.bf16.mxu1 %v5830_v17  ;;  %v5855_v25 = vld [vmem:[%s6146_s8 + $0x3c0] sm:$0xff]   ;;  %v5860_v26 = vld [vmem:[%s6146_s8 + $0x308] sm:$0xff]  }
 0xe18   : > { %v2971_v37 = vadd.f32 %v2970_v59, %v2328_v36  ;;  %v3014_v61 = vadd.f32 %v3013_v58, %v2336_v34  ;;  %v2972_v2 = vpop.f32.mrb[38].mxu1  ;;  %v3015_v62 = vpop.f32.mrb[46].mxu0  ;;  %5400 = vmatprep.subr.bf16.mxu0 %v5831_v53  ;;  %v5856_v17 = vld [vmem:[%s6146_s8 + $0x300] sm:$0xff]   ;;  %v5859_v53 = vld [vmem:[%s6146_s8 + $0x3c8] sm:$0xff]   ;;  %v5867_v59 = vld [vmem:[%s6146_s8 + $0x3d8] sm:$0xff]  }
 0xe19   : > { %v2973_v52 = vadd.f32 %v2972_v2, %v2324_v21  ;;  %v3016_v63 = vadd.f32 %v3015_v62, %v2332_v50  ;;  %v2974_v4 = vpop.f32.mrb[39].mxu1  ;;  %v3017_v31 = vpop.f32.mrb[47].mxu0  ;;  %v3032_v1 = vmax.f32 %v2969_v55, 0.0  ;;  %v3034_v13 = vmax.f32 %v3012_v56, 0.0  ;;  %v5853_v21 = vld [vmem:[%s6146_s8 + $0x2b8] sm:$0xff]   ;;  %v5854_v50 = vld [vmem:[%s6146_s8 + $0x340] sm:$0xff]  }
 0xe1a   : > { %v2975_v18 = vadd.f32 %v2974_v4, %v2328_v36  ;;  %v3018_v0 = vadd.f32 %v3017_v31, %v2336_v34  ;;  %5379 = vmatpush3.bf16.msra.mxu1 %v5832_v6  ;;  %v3033_v23 = vmax.f32 %v2971_v37, 0.0  ;;  %v3035_v27 = vmax.f32 %v3014_v61, 0.0  ;;  %v5857_v36 = vld [vmem:[%s6146_s8 + $0x380] sm:$0xff]   ;;  %v5858_v34 = vld [vmem:[%s6146_s8 + $0x348] sm:$0xff]   ;;  %v5862_v6 = vld [vmem:[%s6146_s8 + $0x350] sm:$0xff]  }
 0xe1b   : > { %v3048_v8 = vmax.f32 %v2973_v52, 0.0  ;;  %v3050_v19 = vmax.f32 %v3016_v63, 0.0  ;;  %5401 = vmatpush3.bf16.msra.mxu0 %v5833_v44  ;;  %5380 = vmatprep.subr.bf16.mxu1 %v5834_v60  ;;  %v5861_v12 = vld [vmem:[%s6146_s8 + $0x388] sm:$0xff]   ;;  %v5863_v55 = vld [vmem:[%s6146_s8 + $0x3d0] sm:$0xff]   ;;  %v5866_v56 = vld [vmem:[%s6146_s8 + $0x358] sm:$0xff]  }
 0xe1c   : > { %v3049_v28 = vmax.f32 %v2975_v18, 0.0  ;;  %v3051_v14 = vmax.f32 %v3018_v0, 0.0  ;;  %5402 = vmatprep.subr.bf16.mxu0 %v5835_v24  ;;  %v5868_v58 = vld [vmem:[%s6146_s8 + $0x318] sm:$0xff]   ;;  %v5870_v60 = vld [vmem:[%s6146_s8 + $0x360] sm:$0xff]   ;;  %v5874_v62 = vld [vmem:[%s6146_s8 + $0x368] sm:$0xff]  }
 0xe1d   : > { %v6867_v33 = vpack.c.bf16 %v3048_v8, %v3032_v1  ;;  %v6869_v35 = vpack.c.bf16 %v3050_v19, %v3034_v13  ;;  %v5869_v44 = vld [vmem:[%s6146_s8 + $0x398] sm:$0xff]   ;;  %v5871_v37 = vld [vmem:[%s6146_s8 + $0x3e0] sm:$0xff]   ;;  %v5875_v24 = vld [vmem:[%s6146_s8 + $0x3e8] sm:$0xff]  }
 0xe1e   : > { %v3065_v39 = vpack.c.bf16 %v3049_v28, %v3033_v23  ;;  %v3067_v40 = vpack.c.bf16 %v3051_v14, %v3035_v27  ;;  %5381 = vmatpush3.bf16.msra.mxu1 %v5836_v10  ;;  %v5872_v61 = vld [vmem:[%s6146_s8 + $0x320] sm:$0xff]   ;;  %v5876_v52 = vld [vmem:[%s6146_s8 + $0x328] sm:$0xff]   ;;  %v5878_v4 = vld [vmem:[%s6146_s8 + $0x370] sm:$0xff]  }
 0xe1f   : > { %5403 = vmatpush3.bf16.msra.mxu0 %v5837_v15  ;;  %5382 = vmatprep.subr.bf16.mxu1 %v5838_v20  ;;  %v5873_v2 = vld [vmem:[%s6146_s8 + $0x3a0] sm:$0xff]   ;;  %v5877_v63 = vld [vmem:[%s6146_s8 + $0x3a8] sm:$0xff]   ;;  %v5879_v31 = vld [vmem:[%s6146_s8 + $0x3f0] sm:$0xff]  }
 0xe20   : > { %5404 = vmatprep.subr.bf16.mxu0 %v5839_v29  ;;  %v5880_v18 = vld [vmem:[%s6146_s8 + $0x330] sm:$0xff]   ;;  %v5882_v10 = vld [vmem:[%s6146_s8 + $0x378] sm:$0xff]   ;;  %v6922_v20 = vld [vmem:[%s6151_s10 + $0x8] sm:$0xff]  ;;  %s7082_s10 = sld [smem:[#allocation17_spill]] (!%p5187_p5) }
 0xe21   : > { %v5881_v0 = vld [vmem:[%s6146_s8 + $0x3b0] sm:$0xff]   ;;  %v5883_v1 = vld [vmem:[%s6146_s8 + $0x3f8] sm:$0xff]   ;;  %v3327_v23 = vrot.slane %v6922_v20, %v6285_v32 }
 0xe22   : > { %5383 = vmatpush3.bf16.msra.mxu1 %v5840_v30  ;;  %v5884_v13 = vld [vmem:[%s6146_s8 + $0x338] sm:$0xff]  }
 0xe23   : > { %5405 = vmatpush3.bf16.msra.mxu0 %v5841_v54  ;;  %5384 = vmatprep.subr.bf16.mxu1 %v5842_v42  ;;  %v5885_v8 = vld [vmem:[%s6146_s8 + $0x3b8] sm:$0xff]  }
 0xe24   : > { %5406 = vmatprep.subr.bf16.mxu0 %v5843_v43 }
 0xe26   : > { %5385 = vmatpush3.bf16.msra.mxu1 %v5844_v45 }
 0xe27   : > { %5407 = vmatpush3.bf16.msra.mxu0 %v5845_v46  ;;  %5386 = vmatprep.subr.bf16.mxu1 %v5846_v5 }
 0xe28   : > { %5408 = vmatprep.subr.bf16.mxu0 %v5847_v48 }
 0xe2a   : > { %5387 = vmatpush3.bf16.msra.mxu1 %v5848_v49 }
 0xe2b   : > { %5409 = vmatpush3.bf16.msra.mxu0 %v5849_v7  ;;  %5388 = vmatprep.subr.bf16.mxu1 %v5850_v9 }
 0xe2c   : > { %5410 = vmatprep.subr.bf16.mxu0 %v5851_v22 }
 0xe2e   : > { %5389 = vmatpush3.bf16.msra.mxu1 %v5852_v38 }
 0xe2f   : > { %5411 = vmatpush3.bf16.msra.mxu0 %v5853_v21  ;;  %5418 = vmatprep.subr.bf16.mxu1 %v5854_v50 }
 0xe30   : > { %5440 = vmatprep.subr.bf16.mxu0 %v5855_v25 }
 0xe31   : > { %4293 = vmatmul.mubr.bf16.vlgmr.msra.gmra.mrb[48].mxu1 %v6837_v47  ;;  %v5864_v47 = vld [vmem:[%s6146_s8 + $0x310] sm:$0xff]  }
 0xe32   : > { %4334 = vmatmul.mubr.bf16.vlgmr.msra.gmra.mrb[56].mxu0 %v6839_v11  ;;  %5419 = vmatpush3.bf16.msra.mxu1 %v5856_v17  ;;  %v5865_v11 = vld [vmem:[%s6146_s8 + $0x390] sm:$0xff]  }
 0xe33   : > { %4374 = vmatprep.mubr.bf16.mxu1 %v3065_v39  ;;  %5441 = vmatpush3.bf16.msra.mxu0 %v5857_v36 }
 0xe34   : > { %4415 = vmatprep.mubr.bf16.mxu0 %v3067_v40  ;;  %5420 = vmatprep.subr.bf16.mxu1 %v5858_v34 }
 0xe35   : > { %5442 = vmatprep.subr.bf16.mxu0 %v5859_v53 }
 0xe36   : > { %5421 = vmatpush3.bf16.msra.mxu1 %v5860_v26 }
 0xe37   : > { %5443 = vmatpush3.bf16.msra.mxu0 %v5861_v12  ;;  %5422 = vmatprep.subr.bf16.mxu1 %v5862_v6 }
 0xe38   : > { %5444 = vmatprep.subr.bf16.mxu0 %v5863_v55 }
 0xe3a   : > { %5423 = vmatpush3.bf16.msra.mxu1 %v5864_v47 }
 0xe3b   : > { %5445 = vmatpush3.bf16.msra.mxu0 %v5865_v11  ;;  %5424 = vmatprep.subr.bf16.mxu1 %v5866_v56 }
 0xe3c   : > { %5446 = vmatprep.subr.bf16.mxu0 %v5867_v59 }
 0xe3e   : > { %5425 = vmatpush3.bf16.msra.mxu1 %v5868_v58 }
 0xe3f   : > { %5447 = vmatpush3.bf16.msra.mxu0 %v5869_v44  ;;  %5426 = vmatprep.subr.bf16.mxu1 %v5870_v60 }
 0xe40   : > { %5448 = vmatprep.subr.bf16.mxu0 %v5871_v37 }
 0xe42   : > { %5427 = vmatpush3.bf16.msra.mxu1 %v5872_v61 }
 0xe43   : > { %5449 = vmatpush3.bf16.msra.mxu0 %v5873_v2  ;;  %5428 = vmatprep.subr.bf16.mxu1 %v5874_v62 }
 0xe44   : > { %5450 = vmatprep.subr.bf16.mxu0 %v5875_v24 }
 0xe46   : > { %5429 = vmatpush3.bf16.msra.mxu1 %v5876_v52 }
 0xe47   : > { %5451 = vmatpush3.bf16.msra.mxu0 %v5877_v63  ;;  %5430 = vmatprep.subr.bf16.mxu1 %v5878_v4 }
 0xe48   : > { %5452 = vmatprep.subr.bf16.mxu0 %v5879_v31 }
 0xe4a   : > { %5431 = vmatpush3.bf16.msra.mxu1 %v5880_v18 }
 0xe4b   : > { %5453 = vmatpush3.bf16.msra.mxu0 %v5881_v0  ;;  %5432 = vmatprep.subr.bf16.mxu1 %v5882_v10 }
 0xe4c   : > { %5454 = vmatprep.subr.bf16.mxu0 %v5883_v1 }
 0xe4e   : > { %5433 = vmatpush3.bf16.msra.mxu1 %v5884_v13 }
 0xe4f   : > { %5455 = vmatpush3.bf16.msra.mxu0 %v5885_v8 }
 0xe51   : > { %4375 = vmatmul.mubr.bf16.vlgmr.msra.gmra.mrb[52].mxu1 %v6867_v33 }
 0xe52   : > { %4416 = vmatmul.mubr.bf16.vlgmr.msra.gmra.mrb[60].mxu0 %v6869_v35 }
 0xec4   : > { %v5302_v19 = vpop.f32.mrb[40].mxu1  ;;  %v5324_v15 = vpop.f32.mrb[48].mxu0 }
 0xec5   : > { %v5303_v27 = vpop.f32.mrb[41].mxu1  ;;  %v5325_v28 = vpop.f32.mrb[49].mxu0 }
 0xec6   : > { %v5304_v14 = vadd.f32 %v5303_v27, %v5302_v19  ;;  %v5326_v29 = vadd.f32 %v5325_v28, %v5324_v15  ;;  %v5305_v39 = vpop.f32.mrb[42].mxu1  ;;  %v5327_v40 = vpop.f32.mrb[50].mxu0 }
 0xec7   : > { %v5306_v30 = vpop.f32.mrb[43].mxu1  ;;  %v5328_v54 = vpop.f32.mrb[51].mxu0 }
 0xec8   : > { %v4131_v42 = vadd.f32 %v5304_v14, %v3327_v23  ;;  %v5307_v43 = vadd.f32 %v5306_v30, %v5305_v39  ;;  %v5329_v33 = vadd.f32 %v5328_v54, %v5327_v40 }
 0xeca   : > { %v4172_v45 = vadd.f32 %v5326_v29, %v4131_v42  ;;  %v4134_v35 = vadd.f32 %v5307_v43, %v3327_v23 }
 0xecc   : > { %v4175_v46 = vadd.f32 %v5329_v33, %v4134_v35 }
 0xee4   : > { %v5346_v5 = vpop.f32.mrb[44].mxu1  ;;  %v5368_v48 = vpop.f32.mrb[52].mxu0 }
 0xee5   : > { %v5347_v49 = vpop.f32.mrb[45].mxu1  ;;  %v5369_v7 = vpop.f32.mrb[53].mxu0 }
 0xee6   : > { %v5348_v9 = vadd.f32 %v5347_v49, %v5346_v5  ;;  %v5370_v32 = vadd.f32 %v5369_v7, %v5368_v48  ;;  %v5349_v22 = vpop.f32.mrb[46].mxu1  ;;  %v5371_v38 = vpop.f32.mrb[54].mxu0 }
 0xee7   : > { %v5350_v21 = vpop.f32.mrb[47].mxu1  ;;  %v5372_v50 = vpop.f32.mrb[55].mxu0 }
 0xee8   : > { %v4213_v25 = vadd.f32 %v5348_v9, %v4172_v45  ;;  %v5351_v17 = vadd.f32 %v5350_v21, %v5349_v22  ;;  %v5373_v36 = vadd.f32 %v5372_v50, %v5371_v38  ;;  %v4455_v21 = vrot.slane %v6922_v20, %v6432_v51  ;;  %v5920_v51 = vld [vmem:[%s7044_s19] sm:$0xff] (!%p5187_p5)  }
 0xeea   : > { %v4254_v34 = vadd.f32 %v5370_v32, %v4213_v25  ;;  %v4216_v53 = vadd.f32 %v5351_v17, %v4175_v46  ;;  %v4461_v25 = vrot.slane %v6922_v20, %v6543_v16  ;;  %v5921_v16 = vld [vmem:[%s7044_s19 + $0x8] sm:$0xff] (!%p5187_p5)   ;;  %v5922_v20 = vld [vmem:[%s7044_s19 + $0x10] sm:$0xff] (!%p5187_p5)  }
 0xeec   : > { %v4257_v26 = vadd.f32 %v5373_v36, %v4216_v53 }
 0xf04   : > { %v5390_v12 = vpop.f32.mrb[48].mxu1 }
 0xf05   : > { %v5412_v6 = vpop.f32.mrb[56].mxu0  ;;  %v5391_v55 = vpop.f32.mrb[49].mxu1 }
 0xf06   : > { %v5392_v47 = vadd.f32 %v5391_v55, %v5390_v12  ;;  %v5413_v11 = vpop.f32.mrb[57].mxu0  ;;  %v5393_v56 = vpop.f32.mrb[50].mxu1  ;;  %v5982_v55 = vmov (!%p5187_p5), 0.0  }
 0xf07   : > { %v5414_v59 = vadd.f32 %v5413_v11, %v5412_v6  ;;  %v5415_v58 = vpop.f32.mrb[58].mxu0  ;;  %v5394_v44 = vpop.f32.mrb[51].mxu1  ;;  %5649 = vmatprep.subr.bf16.mxu0 (!%p5187_p5), %v5982_v55  ;;  %5657 = vmatprep.mubr.msk.bf16.mxu0 (!%p5187_p5), %vm5983_vm3, %v5982_v55 }
 0xf08   : > { %v4295_v60 = vadd.f32 %v5392_v47, %v4254_v34  ;;  %v5395_v37 = vadd.f32 %v5394_v44, %v5393_v56  ;;  %v5416_v61 = vpop.f32.mrb[59].mxu0  ;;  %5650 = vmatpush3.bf16.msra.mxu0 (!%p5187_p5), %v5920_v51  ;;  %v5923_v47 = vld [vmem:[%s7044_s19 + $0x18] sm:$0xff] (!%p5187_p5)   ;;  %v5984_v56 = vmov (!%p5187_p5), 0  }
 0xf09   : > { %v5417_v2 = vadd.f32 %v5416_v61, %v5415_v58  ;;  %5651 = vmatprep.subr.bf16.mxu0 (!%p5187_p5), %v5982_v55  ;;  %5918 = vset.pattern.permute.xlu1 (!%p5187_p5), %v5984_v56 }
 0xf0a   : > { %v4336_v62 = vadd.f32 %v5414_v59, %v4295_v60  ;;  %v4298_v24 = vadd.f32 %v5395_v37, %v4257_v26  ;;  %5919 = vset.pattern.permute.xlu0 (!%p5187_p5), %v5984_v56  ;;  %v5188_v59 = vld [vmem:[%s7045_s20] ss:$0 sm:$0xff] (!%p5187_p5) }
 0xf0c   : > { %v4339_v52 = vadd.f32 %v5417_v2, %v4298_v24  ;;  %5652 = vmatpush3.bf16.msra.mxu0 (!%p5187_p5), %v5921_v16 }
 0xf0d   : > { %5653 = vmatprep.subr.bf16.mxu0 (!%p5187_p5), %v5982_v55 }
 0xf10   : > { %5654 = vmatpush3.bf16.msra.mxu0 (!%p5187_p5), %v5922_v20 }
 0xf11   : > { %5655 = vmatprep.subr.bf16.mxu0 (!%p5187_p5), %v5982_v55 }
 0xf14   : > { %5656 = vmatpush3.bf16.msra.mxu0 (!%p5187_p5), %v5923_v47 }
 0xf24   : > { %v5434_v63 = vpop.f32.mrb[52].mxu1 }
 0xf25   : > { %v5456_v4 = vpop.f32.mrb[60].mxu0  ;;  %v5435_v31 = vpop.f32.mrb[53].mxu1 }
 0xf26   : > { %v5436_v18 = vadd.f32 %v5435_v31, %v5434_v63  ;;  %v5457_v0 = vpop.f32.mrb[61].mxu0  ;;  %v5437_v10 = vpop.f32.mrb[54].mxu1 }
 0xf27   : > { %v5458_v1 = vadd.f32 %v5457_v0, %v5456_v4  ;;  %v5459_v13 = vpop.f32.mrb[62].mxu0  ;;  %v5438_v8 = vpop.f32.mrb[55].mxu1 }
 0xf28   : > { %v4377_v19 = vadd.f32 %v5436_v18, %v4336_v62  ;;  %v5439_v15 = vadd.f32 %v5438_v8, %v5437_v10  ;;  %v5460_v23 = vpop.f32.mrb[63].mxu0 }
 0xf29   : > { %v5461_v27 = vadd.f32 %v5460_v23, %v5459_v13  ;;  %v4554_v13 = vld [vmem:[%s7041_s16] sm:$0xff] (!%p5187_p5) }
 0xf2a   : > { %v4418_v28 = vadd.f32 %v5458_v1, %v4377_v19  ;;  %v4380_v14 = vadd.f32 %v5439_v15, %v4339_v52 }
 0xf2c   : > { %v4421_v29 = vadd.f32 %v5461_v27, %v4380_v14  ;;  %v4424_v39 = vadd.f32 %v4418_v28, %v6677_v41 }
 0xf2e   : > { %v4426_v40 = vsel %vm865_vm1, %v4424_v39, 0.0  ;;  %v4425_v30 = vadd.f32 %v4421_v29, %v6679_v57 }
 0xf2f   : > { %4427 = vadd.xlane.f32.xlu1 %v4426_v40 }
 0xf30   : > { %v4429_v54 = vsel %vm865_vm1, %v4425_v30, 0.0 }
 0xf31   : > { %4430 = vadd.xlane.f32.xlu0 %v4429_v54 }
 0xfbc   : > { %v4428_v42 = vpop.xlane.xlu1 %4427 }
 0xfbd   : > { %v4432_v43 = vmul.f32 0.015625, %v4428_v42  ;;  %v4555_v42 = vld [vmem:[%s7041_s16 + $0x8] sm:$0xff] (!%p5187_p5) }
 0xfbe   : > { %v4431_v33 = vpop.xlane.xlu0 %4430 }
 0xfbf   : > { %v4434_v45 = vsub.f32 %v4424_v39, %v4432_v43  ;;  %v4433_v35 = vmul.f32 0.015625, %v4431_v33  ;;  %v4557_v39 = vand.u32 (!%p5187_p5), 127, %v912_v3  ;;  %v4629_v43 = vld [vmem:[%s7082_s10] sm:$0xff] (!%p5187_p5)  ;;  %v4630_v3 = vld [vmem:[%s7082_s10 + $0x8] sm:$0xff] (!%p5187_p5) }
 0xfc1   : > { %v4435_v46 = vsub.f32 %v4425_v30, %v4433_v35  ;;  %v4436_v5 = vmul.f32 %v4434_v45, %v4434_v45 }
 0xfc3   : > { %v4438_v48 = vsel %vm865_vm1, %v4436_v5, 0.0  ;;  %v4437_v49 = vmul.f32 %v4435_v46, %v4435_v46 }
 0xfc4   : > { %4439 = vadd.xlane.f32.xlu1 %v4438_v48 }
 0xfc5   : > { %v4441_v41 = vsel %vm865_vm1, %v4437_v49, 0.0 }
 0xfc6   : > { %4442 = vadd.xlane.f32.xlu0 %v4441_v41 }
0x1051   : > { %v4440_v7 = vpop.xlane.xlu1 %4439 }
0x1052   : > { %v4444_v57 = vmul.f32 0.015625, %v4440_v7 }
0x1053   : > { %v4443_v9 = vpop.xlane.xlu0 %4442 }
0x1054   : > { %v4446_v32 = vadd.f32 1e-05, %v4444_v57  ;;  %v4445_v22 = vmul.f32 0.015625, %v4443_v9 }
0x1056   : > { %5910 = vrsqrt.f32 %v4446_v32  ;;  %v4447_v38 = vadd.f32 1e-05, %v4445_v22 }
0x1058   : > { %5912 = vrsqrt.f32 %v4447_v38 }
0x1060   : > { %v5911_v50 = vpop.eup %5910 }
0x1061   : > { %v4450_v17 = vmul.f32 %v5911_v50, %v4434_v45 }
0x1062   : > { %v5913_v36 = vpop.eup %5912 }
0x1063   : > { %v4456_v34 = vmul.f32 %v4455_v21, %v4450_v17  ;;  %v4451_v53 = vmul.f32 %v5913_v36, %v4435_v46  ;;  %4469 = sbr.rel (%p5187_p5) target bundleno = 5144 (0x1418), region = 112 }
0x1065   : > { %v4462_v26 = vadd.f32 %v4461_v25, %v4456_v34  ;;  %v4457_v12 = vmul.f32 %v4455_v21, %v4451_v53 }
0x1067   : > { %4464 = vst.msk [vmem:[#allocation2] sm:$0xff] %vm865_vm1, %v4462_v26  ;;  %v4463_v6 = vadd.f32 %v4461_v25, %v4457_v12 }
0x1069   : > { %4465 = vst.msk [vmem:[#allocation2 + $0x8] sm:$0xff] %vm865_vm1, %v4463_v6  ;;  %v4470_v11 = vpack.c.bf16 (!%p5187_p5), %v4463_v6, %v4462_v26 }
0x106b   : > { %5658 = vmatmul.mubr.msk.bf16.vlgmr.msra.gmra.mrb[0].mxu0 %vm865_vm1, %v4470_v11 }
0x113e   : > { %v4547_v58 = vpop.f32.mrb[0].mxu0 }
0x113f   : > { %v6955_v44 = vadd.f32 %v5188_v59, %v4547_v58  ;;  %v5659_v60 = vpop.f32.mrb[1].mxu0 }
0x1140   : > { %v4550_v37 = vpop.f32.mrb[2].mxu0 }
0x1141   : > { %v4617_v61 = vsub.f32 0.0, %v6955_v44  ;;  %v4551_v2 = vadd.f32 %v5188_v59, %v4550_v37  ;;  %v5660_v62 = vpop.f32.mrb[3].mxu0  ;;  %v4567_v24 = vsel %vm4566_vm4, %v6955_v44, -inf }
0x1142   : > { %4568 = vmax.xlane.f32.xlu1 %v4567_v24  ;;  %v4727_v24 = vld [vmem:[%s7083_s18 + $0x8] sm:$0xff] }
0x1143   : > { %v4619_v52 = vmul.f32 1.442695, %v4617_v61  ;;  %v4618_v63 = vsub.f32 0.0, %v4551_v2  ;;  %v4570_v31 = vsel %vm4566_vm4, %v4551_v2, -inf  ;;  %vm4731_vm9 = vcmp.gt.f32.partialorder %v4727_v24, 0.0 }
0x1145   : > { %5924 = vpow2.f32 %v4619_v52  ;;  %v4621_v4 = vmul.f32 1.442695, %v4618_v63  ;;  %v4729_v52 = vmax.f32 %v4727_v24, 1e-30 }
0x1146   : > { %4571 = vmax.xlane.f32.xlu1 %v4570_v31 }
0x1147   : > { %5926 = vpow2.f32 %v4621_v4 }
0x114f   : > { %v5925_v18 = vpop.eup %5924 }
0x1150   : > { %v4623_v0 = vadd.f32 1.0, %v5925_v18 }
0x1151   : > { %v5927_v10 = vpop.eup %5926 }
0x1152   : > { %5928 = vrcp.f32 %v4623_v0  ;;  %v4624_v1 = vadd.f32 1.0, %v5927_v10 }
0x1154   : > { %5930 = vrcp.f32 %v4624_v1 }
0x1157   : > { %4559 = vperm.xlu1 %5918, %v4554_v13  }
0x115c   : > { %v5929_v8 = vpop.eup %5928 }
0x115d   : > { %4710 = vrot.lane.b32.xlu0 %v5929_v8, %s5985_s5 }
0x115e   : > { %v5931_v19 = vpop.eup %5930 }
0x1161   : > { %4712 = vrot.lane.b32.xlu0 %v5931_v19, %s5985_s5 }
0x11cf   : > { %v4711_v15 = vpop.permute.xlu0 %4710  ;;  %v6966_v23 = vpop.xlane.xlu1 %4568 }
0x11d0   : > { %v4716_v27 = vsel %vm4566_vm4, %v4711_v15, 0.0  ;;  %v4573_v21 = vsub.f32 %v6955_v44, %v6966_v23 }
0x11d1   : > { %4717 = vadd.xlane.f32.xlu0 %v4716_v27 }
0x11d2   : > { %v4575_v50 = vmul.f32 1.442695, %v4573_v21 }
0x11d3   : > { %v4713_v28 = vpop.permute.xlu0 %4712  ;;  %v6969_v14 = vpop.xlane.xlu1 %4571 }
0x11d4   : > { %v4719_v29 = vsel %vm4566_vm4, %v4713_v28, 0.0  ;;  %v4574_v33 = vsub.f32 %v4551_v2, %v6969_v14 }
0x11d5   : > { %4720 = vadd.xlane.f32.xlu1 %v4719_v29 }
0x11d6   : > { %v4577_v45 = vmul.f32 1.442695, %v4574_v33 }
0x11d7   : > { %v4560_v40 = vpop.permute.xlu1 %4559 }
0x11d8   : > { %vm4564_vm5 = vcmp.eq.s32.totalorder %v4557_v39, %v4560_v40  ;;  %5932 = vpow2.f32 %v4577_v45 }
0x11d9   : > { %v4591_v30 = vsel %vm4564_vm5, %v6955_v44, 0.0  ;;  %5934 = vpow2.f32 %v4575_v50 }
0x11da   : > { %v4593_v54 = vsel %vm4566_vm4, %v4591_v30, 0.0 }
0x11db   : > { %4594 = vadd.xlane.f32.xlu0 %v4593_v54 }
0x11e2   : > { %v5933_v35 = vpop.eup %5932 }
0x11e3   : > { %v4582_v46 = vsel %vm4566_vm4, %v5933_v35, 0.0  ;;  %v5935_v17 = vpop.eup %5934 }
0x11e4   : > { %v4579_v36 = vsel %vm4566_vm4, %v5935_v17, 0.0 }
0x11e6   : > { %4562 = vperm.xlu1 %5918, %v4555_v42  }
0x11ea   : > { %4633 = vrot.lane.b32.xlu1 %v4629_v43, %s5986_s27 }
0x11ee   : > { %4635 = vrot.lane.b32.xlu1 %v4630_v3, %s5986_s27 }
0x1212   : > { %4583 = vadd.xlane.f32.xlu1 %v4582_v46 }
0x125e   : > { %v4718_v25 = vpop.xlane.xlu0 %4717 }
0x125f   : > { %5936 = vrcp.f32 %v4718_v25 }
0x1262   : > { %v4721_v5 = vpop.xlane.xlu1 %4720 }
0x1263   : > { %5938 = vrcp.f32 %v4721_v5 }
0x1266   : > { %v4563_v48 = vpop.permute.xlu1 %4562 }
0x1267   : > { %vm4565_vm6 = vcmp.eq.s32.totalorder %v4557_v39, %v4563_v48 }
0x1268   : > { %v4592_v49 = vsel %vm4565_vm6, %v4551_v2, 0.0  ;;  %v4595_v11 = vpop.xlane.xlu0 %4594  ;;  %v4726_v2 = vld [vmem:[%s7083_s18] sm:$0xff] }
0x1269   : > { %v4596_v41 = vsel %vm4566_vm4, %v4592_v49, 0.0  ;;  %v5937_v34 = vpop.eup %5936  ;;  %v4728_v62 = vmax.f32 %v4726_v2, 1e-30  ;;  %vm4730_vm8 = vcmp.gt.f32.partialorder %v4726_v2, 0.0 }
0x126a   : > { %4597 = vadd.xlane.f32.xlu0 %v4596_v41  ;;  %v4634_v7 = vpop.permute.xlu1 %4633  ;;  %v4723_v53 = vmul.f32 %v5937_v34, %v5929_v8 }
0x126b   : > { %v4639_v22 = vsub.f32 %v5929_v8, %v4634_v7 }
0x126c   : > { %v4736_v12 = vadd.f32 1e-14, %v4723_v53 }
0x126d   : > { %v4641_v38 = vand.u32 2147483647, %v4639_v22  ;;  %v5939_v26 = vpop.eup %5938 }
0x126e   : > { %v4636_v57 = vpop.permute.xlu1 %4635  ;;  %v4725_v6 = vmul.f32 %v5939_v26, %v5931_v19  ;;  %5940 = vlog2.f32 %v4736_v12 }
0x126f   : > { %v4640_v9 = vsub.f32 %v5931_v19, %v4636_v57 }
0x1270   : > { %v4737_v51 = vadd.f32 1e-14, %v4725_v6 }
0x1271   : > { %v4642_v32 = vand.u32 2147483647, %v4640_v9 }
0x1272   : > { %5942 = vlog2.f32 %v4737_v51 }
0x1273   : > { %4647 = vrot.lane.b32.xlu1 %v4642_v32, %s5987_s7 }
0x1278   : > { %v5941_v55 = vpop.eup %5940 }
0x1279   : > { %v4739_v16 = vmul.f32 0.6931472, %v5941_v55 }
0x127c   : > { %v5943_v20 = vpop.eup %5942 }
0x127d   : > { %v4741_v47 = vmul.f32 0.6931472, %v5943_v20 }
0x1280   : > { %4645 = vrot.lane.b32.xlu0 %v4641_v38, %s5987_s7 }
0x129f   : > { %4580 = vadd.xlane.f32.xlu0 %v4579_v36  ;;  %v4584_v56 = vpop.xlane.xlu1 %4583 }
0x12a0   : > { %5944 = vlog2.f32 %v4584_v56 }
0x12a1   : > { %5946 = vlog2.f32 %v4728_v62 }
0x12a2   : > { %5948 = vlog2.f32 %v4729_v52 }
0x12aa   : > { %v5945_v31 = vpop.eup %5944 }
0x12ab   : > { %v5947_v18 = vpop.eup %5946  ;;  %v4588_v0 = vmul.f32 0.6931472, %v5945_v31 }
0x12ac   : > { %v4733_v8 = vmul.f32 0.6931472, %v5947_v18  ;;  %v5949_v19 = vpop.eup %5948 }
0x12ad   : > { %v4590_v28 = vadd.f32 %v4588_v0, %v6969_v14  ;;  %v4735_v30 = vmul.f32 0.6931472, %v5949_v19 }
0x12b5   : > { %4666 = vrot.lane.b32.xlu0 %v4641_v38, %s5988_s9 }
0x12b9   : > { %4668 = vrot.lane.b32.xlu0 %v4642_v32, %s5988_s9 }
0x12bd   : > { %4744 = vrot.lane.b32.xlu0 %v4739_v16, %s5985_s5 }
0x12c1   : > { %4746 = vrot.lane.b32.xlu0 %v4741_v47, %s5985_s5 }
0x12c5   : > { %4687 = vrot.lane.b32.xlu0 %v4641_v38, %s5989_s1 }
0x12c9   : > { %4689 = vrot.lane.b32.xlu0 %v4642_v32, %s5989_s1 }
0x12e5   : > { %v4648_v58 = vpop.permute.xlu1 %4647 }
0x12e6   : > { %v4652_v60 = vsel %vm4601_vm7, %v4648_v58, 0.0 }
0x12f7   : > { %v4598_v59 = vpop.xlane.xlu0 %4597 }
0x12f8   : > { %v4600_v54 = vsub.f32 %v4590_v28, %v4598_v59 }
0x12fa   : > { %v4603_v46 = vsel %vm4601_vm7, %v4600_v54, 0.0 }
0x12fb   : > { %v4646_v44 = vpop.permute.xlu0 %4645 }
0x12fc   : > { %v4651_v37 = vsel %vm4601_vm7, %v4646_v44, 0.0 }
0x12fd   : > { %v4653_v61 = vadd.f32 %v4652_v60, %v4651_v37 }
0x12ff   : > { %4654 = vadd.xlane.f32.xlu0 %v4653_v61 }
0x132c   : > { %v4581_v63 = vpop.xlane.xlu0 %4580 }
0x132d   : > { %5950 = vlog2.f32 %v4581_v63 }
0x1330   : > { %v4667_v4 = vpop.permute.xlu0 %4666 }
0x1331   : > { %v4672_v1 = vsel %vm4601_vm7, %v4667_v4, 0.0 }
0x1334   : > { %v4669_v10 = vpop.permute.xlu0 %4668 }
0x1335   : > { %v4673_v13 = vsel %vm4601_vm7, %v4669_v10, 0.0 }
0x1336   : > { %v4674_v15 = vadd.f32 %v4673_v13, %v4672_v1 }
0x1337   : > { %v5951_v27 = vpop.eup %5950 }
0x1338   : > { %v4586_v29 = vmul.f32 0.6931472, %v5951_v27  ;;  %v4745_v39 = vpop.permute.xlu0 %4744  ;;  %4675 = vadd.xlane.f32.xlu0 %v4674_v15 }
0x1339   : > { %v4750_v40 = vsub.f32 %v4733_v8, %v4745_v39 }
0x133a   : > { %v4589_v42 = vadd.f32 %v4586_v29, %v6966_v23 }
0x133b   : > { %v4752_v43 = vmul.f32 %v4750_v40, %v4726_v2 }
0x133c   : > { %v4747_v3 = vpop.permute.xlu0 %4746  ;;  %v4599_v33 = vsub.f32 %v4589_v42, %v4595_v11 }
0x133d   : > { %v4751_v45 = vsub.f32 %v4735_v30, %v4747_v3  ;;  %v4754_v48 = vsel %vm4730_vm8, %v4752_v43, 0.0 }
0x133e   : > { %v4602_v35 = vsel %vm4601_vm7, %v4599_v33, 0.0  ;;  %v4756_v7 = vsel %vm4566_vm4, %v4754_v48, 0.0 }
0x133f   : > { %v4753_v5 = vmul.f32 %v4751_v45, %v4727_v24  ;;  %v4604_v14 = vadd.f32 %v4603_v46, %v4602_v35 }
0x1340   : > { %v4688_v49 = vpop.permute.xlu0 %4687 }
0x1341   : > { %4605 = vadd.xlane.f32.xlu1 %v4604_v14  ;;  %v4755_v41 = vsel %vm4731_vm9, %v4753_v5, 0.0  ;;  %v4693_v32 = vsel %vm4601_vm7, %v4688_v49, 0.0 }
0x1342   : > { %v4757_v23 = vsel %vm4566_vm4, %v4755_v41, 0.0 }
0x1343   : > { %v4758_v57 = vadd.f32 %v4757_v23, %v4756_v7 }
0x1344   : > { %v4690_v9 = vpop.permute.xlu0 %4689 }
0x1345   : > { %v4694_v22 = vsel %vm4601_vm7, %v4690_v9, 0.0  ;;  %4759 = vadd.xlane.f32.xlu0 %v4758_v57 }
0x1346   : > { %v4695_v38 = vadd.f32 %v4694_v22, %v4693_v32 }
0x1348   : > { %4696 = vadd.xlane.f32.xlu1 %v4695_v38 }
0x138c   : > { %v4655_v21 = vpop.xlane.xlu0 %4654 }
0x138d   : > { %v4656_v25 = vrot.slane %v4655_v21, 4 }
0x138f   : > { %v4657_v36 = vadd.f32 %v4656_v25, %v4655_v21 }
0x1391   : > { %v4658_v53 = vrot.slane %v4657_v36, 2 }
0x1393   : > { %v4659_v16 = vadd.f32 %v4658_v53, %v4657_v36 }
0x1395   : > { %v4660_v60 = vrot.slane %v4659_v16, 1 }
0x1397   : > { %v4661_v4 = vadd.f32 %v4660_v60, %v4659_v16 }
0x13c5   : > { %v4676_v50 = vpop.xlane.xlu0 %4675 }
0x13c6   : > { %v4677_v17 = vrot.slane %v4676_v50, 4 }
0x13c8   : > { %v4678_v34 = vadd.f32 %v4677_v17, %v4676_v50 }
0x13ca   : > { %v4679_v12 = vrot.slane %v4678_v34, 2 }
0x13cc   : > { %v4680_v11 = vadd.f32 %v4679_v12, %v4678_v34 }
0x13ce   : > { %v4606_v26 = vpop.xlane.xlu1 %4605  ;;  %v4681_v2 = vrot.slane %v4680_v11, 1 }
0x13cf   : > { %v4607_v6 = vrot.slane %v4606_v26, 4 }
0x13d0   : > { %v4682_v31 = vadd.f32 %v4681_v2, %v4680_v11 }
0x13d1   : > { %v4608_v51 = vadd.f32 %v4607_v6, %v4606_v26 }
0x13d2   : > { %v4760_v55 = vpop.xlane.xlu0 %4759 }
0x13d3   : > { %v4609_v20 = vrot.slane %v4608_v51, 2  ;;  %v4761_v47 = vrot.slane %v4760_v55, 4 }
0x13d5   : > { %v4762_v56 = vadd.f32 %v4761_v47, %v4760_v55  ;;  %v4697_v59 = vpop.xlane.xlu1 %4696  ;;  %v4610_v58 = vadd.f32 %v4609_v20, %v4608_v51 }
0x13d6   : > { %v4698_v44 = vrot.slane %v4697_v59, 4 }
0x13d7   : > { %v4763_v37 = vrot.slane %v4762_v56, 2  ;;  %v4611_v61 = vrot.slane %v4610_v58, 1 }
0x13d8   : > { %v4699_v62 = vadd.f32 %v4698_v44, %v4697_v59 }
0x13d9   : > { %v4764_v24 = vadd.f32 %v4763_v37, %v4762_v56  ;;  %v4612_v52 = vadd.f32 %v4611_v61, %v4610_v58 }
0x13da   : > { %v4700_v63 = vrot.slane %v4699_v62, 2 }
0x13db   : > { %5693 = vpush %v4612_v52  ;;  %v4765_v0 = vrot.slane %v4764_v24, 1 }
0x13dc   : > { %v4701_v18 = vadd.f32 %v4700_v63, %v4699_v62  ;;  %5695 = vpush %v4661_v4 }
0x13dd   : > { %5697 = vpush %v4682_v31  ;;  %v4766_v13 = vadd.f32 %v4765_v0, %v4764_v24 }
0x13de   : > { %v4702_v10 = vrot.slane %v4701_v18, 1 }
0x13e0   : > { %v4703_v1 = vadd.f32 %v4702_v10, %v4701_v18 }
0x13e2   : > { %5699 = vpush %v4703_v1 }
0x13e3   : > { %5701 = vpush %v4766_v13 }
0x140c   : > { %s5694_s2 = spop %5693 }
0x140d   : > { %s4616_s26 = smul.f32 0.0625, %s5694_s2  ;;  %s5696_s21 = spop %5695 }
0x140e   : > { %s4665_s8 = smul.f32 0.0625, %s5696_s21  ;;  %s5698_s27 = spop %5697 }
0x140f   : > { %4772 = sst [smem:[#allocation3]] %s4616_s26  ;;  %s4686_s30 = smul.f32 0.0625, %s5698_s27 }
0x1410   : > { %4774 = sst [smem:[#allocation3 + $0x1]] %s4665_s8 }
0x1411   : > { %4776 = sst [smem:[#allocation3 + $0x2]] %s4686_s30 }
0x1413   : > { %s5700_s3 = spop %5699 }
0x1414   : > { %s4707_s7 = smul.f32 0.0625, %s5700_s3  ;;  %s5702_s9 = spop %5701 }
0x1415   : > { %s4770_s1 = smul.f32 0.0052083335, %s5702_s9 }
0x1416   : > { %4778 = sst [smem:[#allocation3 + $0x3]] %s4707_s7 }
0x1417   : > { %4780 = sst [smem:[#allocation3 + $0x4]] %s4770_s1 }
0x1418 PF: > { %p5707_p6 = scmp.eq.s32.totalorder %s6107_s25, 1  ;;  %s7084_s28 = sld [smem:[#allocation19_spill]] }
0x141e   : > { %s4788_s5 = sshll.u32 %s7084_s28, 4  ;;  %s4789_s5 = int_to_ptr.vmem [resolvable:$true] %s4788_s5 }
0x141f   : > { %s5952_s2 = scalar_lea.vmem %s4789_s5, 16  ;;  %p5959_p10 = scmp.lt.s32.totalorder %s4789_s5, %s4789_s5 }
0x1420   : > { %p5953_p7 = scmp.ne.s32.totalorder %s4789_s5, %s5952_s2  ;;  %p5960_p11 = scmp.lt.s32.totalorder %s5952_s2, %s5952_s2 }
0x1422   : > { %p5954_p8 = pnand %p5953_p7, %p5707_p6  ;;  %p5961_p12 = por %p5960_p11, %p5959_p10 }
0x1424   : > { %p5955_p9 = pneg %p5954_p8 }
0x1426   : > { %p5962_p13 = pnand %p5961_p12, %p5955_p9 }
0x1428   : > { %5965 = shalt.err (!%p5962_p13)
}
0x1429   : > { %s5990_s26 = smov [#allocation3]  }
0x142a   : > { %5704 = dma.smem_to_vmem (%p5707_p6), %s5990_s26, 16, %s4789_s5, [#allocation4]  }
0x142b   : > { %5971 = dma.done.wait (%p5707_p6), [#allocation4], 16  }
0x142c   : > { %5973 = vsyncadd (%p5707_p6), [#allocation4], 4294967280 }
0x142d   : > { %4796 = sfence }
0x142e PF: > { %s7085_s21 = sld [smem:[#allocation6_spill]] }
0x1434   : > { %s32_s2 = sadd.s32 1, %s7085_s21  }
0x1435   : > { %p29_p0 = scmp.ge.s32.totalorder %s32_s2, 4  }
0x1437   :  { %31 = sbr.rel (!%p29_p0) target bundleno = 15 (0xf), region = 168 }
0x143e   :  { %4802 = vsyncpa [#allocation4], 1 }
0x143f   :  { %4804 = vsyncpa [#allocation4 + $0x1], 1 }

</bundles_post_ra>
